<compile_context>
chip_gen: v7x
topology: tpu7x:2x2x1
jax: 0.10.0
libtpu: 0.0.40
codegen_flags: <defaults>
</compile_context>

<pallas_src>
import functools

import jax
import jax.numpy as jnp
from jax.experimental import pallas as pl
from jax.experimental.pallas import tpu as pltpu


IN_DIM = 1140
IN_DIM_PAD = 1152                      # fc1 input padded to 9*128 lanes
HIDDEN = 1024
IN_TAIL = IN_DIM_PAD - HIDDEN          # 128 extra fc1 inputs (116 real + 12 zero)
OUT_DIM = 4000
OUT_DIM_PAD = 4096                     # fc8 output padded to 32*128, sliced after
N_HIDDEN = 7                           # fc1..fc7 (all followed by ReLU)
N_OUT_TILES = OUT_DIM_PAD // HIDDEN    # 4 fc8 output tiles
N_STEPS = N_HIDDEN + N_OUT_TILES       # 11 grid steps total
WEIGHT_BUFFERS = 3                     # prefetch depth for streamed weights


# ----------------------------------------------------------------------------
# Kernel: the whole network, one grid step per 1024-wide weight slab
# ----------------------------------------------------------------------------

def _net_kernel(x_ref, w_ref, b_ref, w1t_ref, o_ref, act_ref):
    """Steps 0..6: act <- relu(act @ W[l] + b[l])   (fc1..fc7; step 0 also adds
    fc1's tail-input contribution).  Steps 7..10: output tile <- act @ W8_tile
    + b8_tile (no ReLU).  The activation is carried in a bf16 VMEM scratch; only
    the 2 MiB weight slab + bias row is streamed per step."""
    l = pl.program_id(0)

    @pl.when(l == 0)
    def _():
        # Seed the carried activation with the first 1024 input features.
        act_ref[...] = x_ref[:, :HIDDEN].astype(act_ref.dtype)

    h = act_ref[...]                                            # (M, 1024) bf16
    y = jnp.dot(h, w_ref[0], preferred_element_type=jnp.float32)

    # fc1's remaining input features (cols 1024:1152, zero past 1140) contribute
    # only on step 0; mask the operand so later steps add exact zeros.  This
    # tiny (M,128)x(128,1024) matmul is hidden under the 2 MiB weight DMA and
    # avoids padding every hidden/fc8 weight slab from K=1024 to K=1152.
    x_tail = jnp.where(l == 0, x_ref[:, HIDDEN:], 0.0).astype(w1t_ref.dtype)
    y = y + jnp.dot(x_tail, w1t_ref[...], preferred_element_type=jnp.float32)

    y = y + b_ref[0]                                            # (1, 1024) bias

    @pl.when(l < N_HIDDEN)          # fc1..fc7: ReLU, carry activation in bf16
    def _():
        act_ref[...] = jnp.maximum(y, 0.0).astype(act_ref.dtype)

    @pl.when(l >= N_HIDDEN)         # fc8 tiles: no ReLU, emit the output tile
    def _():
        o_ref[...] = y.astype(o_ref.dtype)


# ----------------------------------------------------------------------------
# pallas_call wrapper
# ----------------------------------------------------------------------------

def _fused_net(x, w_stack, b_stack, w1_tail, *, weight_buffers):
    """x: (M,1152) f32, w_stack: (11,1024,1024) bf16, b_stack: (11,1,1024) f32,
    w1_tail: (128,1024) bf16  ->  (M, 4096) f32."""
    M = x.shape[0]
    assert M % 8 == 0
    assert w_stack.shape == (N_STEPS, HIDDEN, HIDDEN)
    assert b_stack.shape == (N_STEPS, 1, HIDDEN)
    assert w1_tail.shape == (IN_TAIL, HIDDEN)

    # Deeper buffering on the streamed weights keeps the next weight DMAs
    # queued (per-step compute is ~0 at small batch).
    w_kwargs = {}
    if weight_buffers is not None:
        w_kwargs["pipeline_mode"] = pl.Buffered(weight_buffers)
    w_spec = pl.BlockSpec((1, HIDDEN, HIDDEN), lambda l: (l, 0, 0), **w_kwargs)

    weight_bytes = (w_stack.size * w_stack.dtype.itemsize
                    + w1_tail.size * w1_tail.dtype.itemsize)
    cost = pl.CostEstimate(
        flops=2 * M * (IN_DIM_PAD * HIDDEN
                       + (N_HIDDEN - 1) * HIDDEN * HIDDEN
                       + HIDDEN * OUT_DIM_PAD),
        transcendentals=0,
        bytes_accessed=(weight_bytes
                        + b_stack.size * b_stack.dtype.itemsize
                        + x.size * x.dtype.itemsize
                        + M * OUT_DIM_PAD * 4),
    )

    return pl.pallas_call(
        _net_kernel,
        out_shape=jax.ShapeDtypeStruct((M, OUT_DIM_PAD), jnp.float32),
        grid_spec=pltpu.PrefetchScalarGridSpec(
            num_scalar_prefetch=0,
            grid=(N_STEPS,),
            in_specs=[
                pl.BlockSpec((M, IN_DIM_PAD), lambda l: (0, 0)),    # x (resident)
                w_spec,                                             # W[l] streamed
                pl.BlockSpec((1, 1, HIDDEN), lambda l: (l, 0, 0)),  # b[l]
                pl.BlockSpec((IN_TAIL, HIDDEN), lambda l: (0, 0)),  # fc1 tail (res.)
            ],
            # Steps 0..6 revisit output tile 0 (written only at step 7);
            # steps 7..10 write / flush tiles 0..3 of the padded fc8 output.
            out_specs=pl.BlockSpec(
                (M, HIDDEN), lambda l: (0, jnp.maximum(l - N_HIDDEN, 0))),
            scratch_shapes=[pltpu.VMEM((M, HIDDEN), jnp.bfloat16)],  # carried act
        ),
        compiler_params=pltpu.CompilerParams(
            dimension_semantics=("arbitrary",),       # cross-layer carry
            vmem_limit_bytes=32 * 1024 * 1024,        # ~7 MiB used; safe v5e..v7x
        ),
        cost_estimate=cost,
    )(x, w_stack, b_stack, w1_tail)


# ----------------------------------------------------------------------------
# Model: parameter construction + forward pass
# ----------------------------------------------------------------------------

def _init_layer(key, din, dout):
    """Matches nn.Linear's default init range; weight stored (in, out)."""
    kw, kb = jax.random.split(key)
    bound = 1.0 / (din ** 0.5)
    w = jax.random.uniform(kw, (din, dout), jnp.float32, -bound, bound)
    b = jax.random.uniform(kb, (dout,), jnp.float32, -bound, bound)
    return w, b


def init_params(key):
    """All padding / splitting / bf16 casting / stacking done ONCE here."""
    keys = jax.random.split(key, 8)

    # fc1 (1140 -> 1024): pad K to 1152, split into 1024-row main + 128-row tail.
    w1, b1 = _init_layer(keys[0], IN_DIM, HIDDEN)
    w1 = jnp.pad(w1, ((0, IN_DIM_PAD - IN_DIM), (0, 0)))        # (1152, 1024)
    w1_main, w1_tail = w1[:HIDDEN], w1[HIDDEN:]

    # fc2..fc7 (1024 -> 1024)
    mids = [_init_layer(keys[i], HIDDEN, HIDDEN) for i in range(1, N_HIDDEN)]

    # fc8 (1024 -> 4000): pad N to 4096, split into four 1024-wide tiles.
    w8, b8 = _init_layer(keys[7], HIDDEN, OUT_DIM)
    w8 = jnp.pad(w8, ((0, 0), (0, OUT_DIM_PAD - OUT_DIM)))      # (1024, 4096)
    b8 = jnp.pad(b8, (0, OUT_DIM_PAD - OUT_DIM))                # (4096,)
    w8_tiles = [w8[:, j * HIDDEN:(j + 1) * HIDDEN] for j in range(N_OUT_TILES)]
    b8_tiles = [b8[j * HIDDEN:(j + 1) * HIDDEN] for j in range(N_OUT_TILES)]

    w_stack = jnp.stack([w1_main] + [w for w, _ in mids] + w8_tiles)
    b_stack = jnp.stack([b1] + [b for _, b in mids] + b8_tiles)

    return {
        "w_stack": w_stack.astype(jnp.bfloat16),                # (11, 1024, 1024)
        "b_stack": b_stack.reshape(N_STEPS, 1, HIDDEN),          # (11, 1, 1024) f32
        "w1_tail": w1_tail.astype(jnp.bfloat16),                 # (128, 1024)
    }


@functools.partial(jax.jit, static_argnames=("weight_buffers",))
def net_forward(x, params, weight_buffers=WEIGHT_BUFFERS):
    """Inference forward pass of `Net` (dropout disabled, as in .eval())."""
    # TODO(synk): training-mode dropout (p=0.5) with pltpu.prng_random_bits is
    # not implemented; this reproduces inference semantics (dropout = identity).
    M = x.shape[0]
    m_pad = (-M) % 8
    # Pad batch to a multiple of 8 sublanes and features 1140 -> 1152 with
    # zeros (padded rows / features contribute nothing; sliced off at the end).
    x = jnp.pad(x, ((0, m_pad), (0, IN_DIM_PAD - IN_DIM)))
    out = _fused_net(x, params["w_stack"], params["b_stack"], params["w1_tail"],
                     weight_buffers=weight_buffers)
    return out[:M, :OUT_DIM]


def reference_forward(x, params):
    """Pure-JAX reference using the same bf16 weights / f32 accumulation."""
    w_stack, b_stack = params["w_stack"], params["b_stack"]
    xp = jnp.pad(x, ((0, 0), (0, IN_DIM_PAD - IN_DIM)))
    y = (jnp.dot(xp[:, :HIDDEN].astype(jnp.bfloat16), w_stack[0],
                 preferred_element_type=jnp.float32)
         + jnp.dot(xp[:, HIDDEN:].astype(jnp.bfloat16), params["w1_tail"],
                   preferred_element_type=jnp.float32)
         + b_stack[0])
    h = jnp.maximum(y, 0.0).astype(jnp.bfloat16)
    for l in range(1, N_HIDDEN):
        y = jnp.dot(h, w_stack[l], preferred_element_type=jnp.float32) + b_stack[l]
        h = jnp.maximum(y, 0.0).astype(jnp.bfloat16)
    tiles = [jnp.dot(h, w_stack[N_HIDDEN + j], preferred_element_type=jnp.float32)
             + b_stack[N_HIDDEN + j] for j in range(N_OUT_TILES)]
    return jnp.concatenate(tiles, axis=-1)[:, :OUT_DIM]


if __name__ == "__main__":
    key = jax.random.PRNGKey(0)
    key, kx = jax.random.split(key)

    batch = 8                       # small batch, multiple of the 8-sublane tile
    x = jax.random.normal(kx, (batch, IN_DIM), jnp.float32)
    params = init_params(key)

    try:
        out = jax.block_until_ready(net_forward(x, params))
    except Exception:
        # Fall back to default double-buffered weights if this JAX/libtpu build
        # rejects the pl.Buffered deep-prefetch hint.
        out = jax.block_until_ready(net_forward(x, params, weight_buffers=None))

    assert out.shape == (batch, OUT_DIM), out.shape
    assert out.dtype == jnp.float32
    assert bool(jnp.all(jnp.isfinite(out)))

    # Numerical check against a pure-JAX reference with identical bf16 weights.
    ref = jax.block_until_ready(reference_forward(x, params))
    scale = float(jnp.max(jnp.abs(ref))) + 1e-6
    max_err = float(jnp.max(jnp.abs(out - ref)))
    assert max_err <= 5e-2 * scale + 1e-3, (max_err, scale)

    print("KERNEL_OK")
</pallas_src>

<mosaic_0001>
module attributes {stable_mosaic.version = 11 : i64} {
  func.func @_net_kernel(%arg0: i32, %arg1: memref<8x1152xf32, #tpu.memory_space<vmem>>, %arg2: memref<1x1024x1024xbf16, #tpu.memory_space<vmem>>, %arg3: memref<1x1x1024xf32, #tpu.memory_space<vmem>>, %arg4: memref<128x1024xbf16, #tpu.memory_space<vmem>>, %arg5: memref<8x1024xf32, #tpu.memory_space<vmem>>, %arg6: memref<8x1024xbf16, #tpu.memory_space<vmem>>) attributes {dimension_semantics = [#tpu.dimension_semantics<arbitrary>], iteration_bounds = array<i64: 11>, scalar_prefetch = 0 : i64, scratch_operands = 1 : i64, tpu.core_type = #tpu.core_type<tc>, window_params = [{pipeline_mode = #tpu.pipeline_mode<synchronous>, transform_indices = @transform_0, window_bounds = array<i64: 8, 1152>}, {transform_indices = @transform_1, window_bounds = array<i64: 1, 1024, 1024>}, {transform_indices = @transform_2, window_bounds = array<i64: 1, 1, 1024>}, {pipeline_mode = #tpu.pipeline_mode<synchronous>, transform_indices = @transform_3, window_bounds = array<i64: 128, 1024>}, {transform_indices = @transform_4, window_bounds = array<i64: 8, 1024>}]} {
    %c0_i32 = arith.constant 0 : i32
    %0 = arith.cmpi eq, %arg0, %c0_i32 : i32
    %1 = arith.extui %0 : i1 to i32
    %c0_i32_0 = arith.constant 0 : i32
    %2 = arith.cmpi ne, %1, %c0_i32_0 : i32
    scf.if %2 {
      %c0_17 = arith.constant 0 : index
      %c0_18 = arith.constant 0 : index
      %25 = vector.load %arg1[%c0_17, %c0_18] : memref<8x1152xf32, #tpu.memory_space<vmem>>, vector<8x1024xf32>
      %26 = arith.truncf %25 : vector<8x1024xf32> to vector<8x1024xbf16>
      %c0_19 = arith.constant 0 : index
      %c0_20 = arith.constant 0 : index
      %27 = vector.load %arg6[%c0_19, %c0_20] : memref<8x1024xbf16, #tpu.memory_space<vmem>>, vector<8x1024xbf16>
      tpu.vector_store %arg6[%c0_19, %c0_20], %26 {strides = array<i32>} : memref<8x1024xbf16, #tpu.memory_space<vmem>>, vector<8x1024xbf16>,
    } else {
    }
    %c0 = arith.constant 0 : index
    %c0_1 = arith.constant 0 : index
    %3 = vector.load %arg6[%c0, %c0_1] : memref<8x1024xbf16, #tpu.memory_space<vmem>>, vector<8x1024xbf16>
    %c0_2 = arith.constant 0 : index
    %c0_3 = arith.constant 0 : index
    %c0_4 = arith.constant 0 : index
    %4 = vector.load %arg2[%c0_2, %c0_3, %c0_4] : memref<1x1024x1024xbf16, #tpu.memory_space<vmem>>, vector<1x1024x1024xbf16>
    %5 = vector.shape_cast %4 : vector<1x1024x1024xbf16> to vector<1024x1024xbf16>
    %cst = arith.constant dense<0.000000e+00> : vector<8x1024xf32>
    %6 = tpu.matmul %3, %5, %cst {dimension_numbers = #tpu.dot_dimension_numbers<[1], [0], [0], [1], [0, 0, 1, 1], [], []>} : vector<8x1024xbf16>, vector<1024x1024xbf16>, vector<8x1024xf32> -> vector<8x1024xf32>
    %c0_i32_5 = arith.constant 0 : i32
    %7 = arith.cmpi eq, %arg0, %c0_i32_5 : i32
    %c0_6 = arith.constant 0 : index
    %c1024 = arith.constant 1024 : index
    %8 = vector.load %arg1[%c0_6, %c1024] : memref<8x1152xf32, #tpu.memory_space<vmem>>, vector<8x128xf32>
    %cst_7 = arith.constant 0.000000e+00 : f32
    %9 = vector.broadcast %cst_7 : f32 to vector<8x128xf32>
    %10 = arith.select %7, %8, %9 : vector<8x128xf32>
    %11 = arith.truncf %10 : vector<8x128xf32> to vector<8x128xbf16>
    %c0_8 = arith.constant 0 : index
    %c0_9 = arith.constant 0 : index
    %12 = vector.load %arg4[%c0_8, %c0_9] : memref<128x1024xbf16, #tpu.memory_space<vmem>>, vector<128x1024xbf16>
    %cst_10 = arith.constant dense<0.000000e+00> : vector<8x1024xf32>
    %13 = tpu.matmul %11, %12, %cst_10 {dimension_numbers = #tpu.dot_dimension_numbers<[1], [0], [0], [1], [0, 0, 1, 1], [], []>} : vector<8x128xbf16>, vector<128x1024xbf16>, vector<8x1024xf32> -> vector<8x1024xf32>
    %14 = arith.addf %6, %13 : vector<8x1024xf32>
    %c0_11 = arith.constant 0 : index
    %c0_12 = arith.constant 0 : index
    %c0_13 = arith.constant 0 : index
    %15 = vector.load %arg3[%c0_11, %c0_12, %c0_13] : memref<1x1x1024xf32, #tpu.memory_space<vmem>>, vector<1x1x1024xf32>
    %16 = vector.shape_cast %15 : vector<1x1x1024xf32> to vector<1x1024xf32>
    %17 = vector.broadcast %16 : vector<1x1024xf32> to vector<8x1024xf32>
    %18 = arith.addf %14, %17 : vector<8x1024xf32>
    %c7_i32 = arith.constant 7 : i32
    %19 = arith.cmpi slt, %arg0, %c7_i32 : i32
    %20 = arith.extui %19 : i1 to i32
    %c0_i32_14 = arith.constant 0 : i32
    %21 = arith.cmpi ne, %20, %c0_i32_14 : i32
    scf.if %21 {
      %cst_17 = arith.constant 0.000000e+00 : f32
      %25 = vector.broadcast %cst_17 : f32 to vector<8x1024xf32>
      %26 = arith.maximumf %18, %25 : vector<8x1024xf32>
      %27 = arith.truncf %26 : vector<8x1024xf32> to vector<8x1024xbf16>
      %c0_18 = arith.constant 0 : index
      %c0_19 = arith.constant 0 : index
      %28 = vector.load %arg6[%c0_18, %c0_19] : memref<8x1024xbf16, #tpu.memory_space<vmem>>, vector<8x1024xbf16>
      tpu.vector_store %arg6[%c0_18, %c0_19], %27 {strides = array<i32>} : memref<8x1024xbf16, #tpu.memory_space<vmem>>, vector<8x1024xbf16>,
    } else {
    }
    %c7_i32_15 = arith.constant 7 : i32
    %22 = arith.cmpi sge, %arg0, %c7_i32_15 : i32
    %23 = arith.extui %22 : i1 to i32
    %c0_i32_16 = arith.constant 0 : i32
    %24 = arith.cmpi ne, %23, %c0_i32_16 : i32
    scf.if %24 {
      %c0_17 = arith.constant 0 : index
      %c0_18 = arith.constant 0 : index
      %25 = vector.load %arg5[%c0_17, %c0_18] : memref<8x1024xf32, #tpu.memory_space<vmem>>, vector<8x1024xf32>
      tpu.vector_store %arg5[%c0_17, %c0_18], %18 {strides = array<i32>} : memref<8x1024xf32, #tpu.memory_space<vmem>>, vector<8x1024xf32>,
    } else {
    }
    return
  }
  func.func @transform_0(%arg0: i32) -> (i32, i32) {
    %c0_i32 = arith.constant 0 : i32
    %c0_i32_0 = arith.constant 0 : i32
    %c0_i32_1 = arith.constant 0 : i32
    return %c0_i32, %c0_i32_0 : i32, i32
  }
  func.func @transform_1(%arg0: i32) -> (i32, i32, i32) {
    %c0_i32 = arith.constant 0 : i32
    %c0_i32_0 = arith.constant 0 : i32
    %c0_i32_1 = arith.constant 0 : i32
    return %arg0, %c0_i32, %c0_i32_0 : i32, i32, i32
  }
  func.func @transform_2(%arg0: i32) -> (i32, i32, i32) {
    %c0_i32 = arith.constant 0 : i32
    %c0_i32_0 = arith.constant 0 : i32
    %c0_i32_1 = arith.constant 0 : i32
    return %arg0, %c0_i32, %c0_i32_0 : i32, i32, i32
  }
  func.func @transform_3(%arg0: i32) -> (i32, i32) {
    %c0_i32 = arith.constant 0 : i32
    %c0_i32_0 = arith.constant 0 : i32
    %c0_i32_1 = arith.constant 0 : i32
    return %c0_i32, %c0_i32_0 : i32, i32
  }
  func.func @transform_4(%arg0: i32) -> (i32, i32) {
    %c7_i32 = arith.constant 7 : i32
    %0 = arith.subi %arg0, %c7_i32 : i32
    %c0_i32 = arith.constant 0 : i32
    %1 = arith.maxsi %0, %c0_i32 : i32
    %c0_i32_0 = arith.constant 0 : i32
    %c0_i32_1 = arith.constant 0 : i32
    return %c0_i32_0, %1 : i32, i32
  }
}

</mosaic_0001>

<bundles_post_ra>
// kernel: net_forward.1
= control target key start
LH: loop header
LB: loop body
LE: loop exit
PB: predicated region body
PF: predicated region fallthrough
CT: control target
= control target key end

     0   :  { %s6826_s0 = inlined_call_operand.vmem [shape: f32[8,1152], index: 0, kind: input, shape index: {}]   ;;  %s6827_s1 = inlined_call_operand.hbm [shape: bf16[11,1024,1024], index: 1, kind: input, shape index: {}]   ;;  %s6828_s2 = inlined_call_operand.hbm [shape: f32[11,1,1024], index: 2, kind: input, shape index: {}]   ;;  %s6829_s3 = inlined_call_operand.hbm [shape: bf16[128,1024], index: 3, kind: input, shape index: {}]   ;;  %s6830_s4 = inlined_call_operand.hbm [shape: f32[8,4096], index: 4, kind: output, shape index: {}]  }
   0x1   :  { %6838 = sst [smem:[#allocation17_spill]] %s6827_s1 }
   0x2   :  { %6839 = sst [smem:[#allocation18_spill]] %s6829_s3 }
   0x3   :  { %9 = vsyncpa [#allocation4], 0 }
   0x4   :  { %11 = vsyncpa [#allocation4 + $0x1], 0 }
   0x5   :  { %12 = vsyncpa [#allocation7], 0 }
   0x6   :  { %14 = vsyncpa [#allocation7 + $0x1], 0 }
   0x7   :  { %15 = vsyncpa [#allocation5], 0 }
   0x8   :  { %17 = vsyncpa [#allocation5 + $0x1], 0  ;;  %s5830_s15 = smov 0   ;;  %s5832_s16 = smov 0  }
   0x9   :  { %s5834_s17 = smov 0   ;;  %s5836_s18 = smov 0  }
   0xa   :  { %s5838_s19 = smov 0   ;;  %s5840_s20 = smov 0  }
   0xb   :  { %s5842_s21 = smov 0  }
   0xc LB: > { %6840 = sst [smem:[#allocation14_spill]] %s5792_s20  ;;  %s5864_s22 = sadd.s32 4294967295, %s5796_s21   ;;  %s5796_s21 = sphi %s5842_s21, %s6875_s21   ;;  %s5792_s20 = sphi %s5840_s20, %s6869_s20   ;;  %s5788_s19 = sphi %s5838_s19, %s6874_s19   ;;  %s5784_s18 = sphi %s5836_s18, %s6873_s18   ;;  %s5780_s17 = sphi %s5834_s17, %s6872_s17   ;;  %s5776_s16 = sphi %s5832_s16, %s6871_s16   ;;  %s5772_s15 = sphi %s5830_s15, %s6870_s15  }
   0xd   : > { %s4871_s23 = sadd.s32 4294967294, %s5796_s21   ;;  %s5868_s24 = sadd.s32 1, %s5796_s21  }
   0xe   : > { %p64_p0 = scmp.ne.s32.totalorder %s5788_s19, %s5784_s18  ;;  %p6831_p1 = scmp.eq.s32.totalorder %s5864_s22, 0 }
   0xf   : > { %s4872_s25 = sadd.s32 4294967289, %s5796_s21  ;;  %s4873_s26 = sadd.s32 4294967289, %s5868_s24 }
  0x10   : > { %p122_p2 = scmp.gt.s32.totalorder %s4872_s25, 0  ;;  %p5876_p3 = por %p6831_p1, %p64_p0 }
  0x11   : > { %p125_p4 = scmp.gt.s32.totalorder %s4873_s26, 0  ;;  %s130_s28 = sadd.s32 1, %s5780_s17 }
  0x12   : > { %s6841_s27 = scalar_select %p5876_p3, 1, 0 }
  0x13   : > { %s6877_s25 = smov (!%p122_p2, %s4872_s25), 0  ;;  %s6879_s26 = smov (!%p125_p4, %s4873_s26), 0 }
  0x14   : > { %p140_p5 = scmp.ne.s32.totalorder %s5780_s17, %s5776_s16  ;;  %s127_s29 = ssub.s32 %s6877_s25, %s6879_s26 }
  0x15   : > { %p141_p6 = scmp.eq.s32.totalorder %s5864_s22, 10  ;;  %p128_p7 = scmp.eq.s32.totalorder %s127_s29, 0 }
  0x16   : > { %p146_p8 = scmp.ne.s32.totalorder %s5776_s16, %s5772_s15  ;;  %p147_p10 = scmp.eq.s32.totalorder %s4871_s23, 10 }
  0x17   : > { %p5886_p9 = por %p141_p6, %p140_p5  ;;  %p4874_p12 = scmp.ge.s32.totalorder %s5796_s21, 1 }
  0x18   : > { %s5891_s5 = scalar_select %p128_p7, %s5780_s17, %s130_s28  }
  0x19   : > { %s6842_s30 = scalar_select %p5886_p9, 1, 0 }
  0x1a   : > { %6843 = sst [smem:[#allocation15_spill]] %s5891_s5  ;;  %p5893_p11 = por %p147_p10, %p146_p8 }
  0x1b   : > { %p154_p13 = scmp.lt.s32.totalorder %s5796_s21, 12  ;;  %s5798_s8 = smov [#allocation8]  }
  0x1c   : > { %s6844_s6 = scalar_select %p5893_p11, 1, 0 }
  0x1d   : > { %p5900_p2 = pnand %p4874_p12, %p154_p13  ;;  %s169_s9 = sshll.u32 %s5798_s8, 4  ;;  %s5904_s9 = int_to_ptr.vmem [resolvable:$true] %s169_s9 }
  0x1e   : > { %s48_s10 = ssub.s32 %s5796_s21, %s5868_s24  ;;  %s51_s13 = sadd.s32 1, %s5792_s20 }
  0x1f   : > { %s6845_s7 = scalar_select %p5900_p2, 1, 0 }
  0x20   : > { %p5522_p4 = pneg %p5900_p2  ;;  %p5916_p6 = scmp.eq.s32.totalorder %s48_s10, 0 }
  0x21   : > { %s6848_s3 = sld [smem:[#allocation18_spill]] }
  0x22   : > { %p5912_p5 = pnand %p5522_p4, %p6831_p1 }
  0x23   : > { %s6847_s12 = scalar_select %p5916_p6, 1, 0 }
  0x24   : > { %p5612_p10 = pneg %p5912_p5 }
  0x27   : > { %s5610_s23 = scalar_lea.hbm %s6848_s3, 8192 }
  0x28   : > { %p5611_p8 = scmp.ne.s32.totalorder %s6848_s3, %s5610_s23  ;;  %p5617_p4 = scmp.lt.u32.totalorder %s5610_s23, %s6848_s3 }
  0x2a   : > { %p5613_p12 = pnand %p5612_p10, %p5611_p8 }
  0x2c   : > { %p5614_p13 = pneg %p5613_p12 }
  0x2e   : > { %p5619_p0 = pnand %p5617_p4, %p5614_p13 }
  0x30   : > { %5622 = shalt.err (!%p5619_p0)
}
  0x31   : > { %s5623_s8 = scalar_lea.vmem %s5904_s9, 8192  ;;  %p5631_p9 = scmp.lt.s32.totalorder %s5904_s9, %s5904_s9 }
  0x32   : > { %p5624_p1 = scmp.ne.s32.totalorder %s5904_s9, %s5623_s8  ;;  %p5632_p3 = scmp.lt.s32.totalorder %s5623_s8, %s5623_s8 }
  0x34   : > { %p5626_p7 = pnand %p5624_p1, %p5612_p10  ;;  %p5633_p2 = por %p5632_p3, %p5631_p9 }
  0x36   : > { %p5627_p11 = pneg %p5626_p7 }
  0x38   : > { %p5634_p6 = pnand %p5633_p2, %p5627_p11 }
  0x3a   : > { %5637 = shalt.err (!%p5634_p6)
}
  0x3b   : > { %s6835_s10 = smov 512   ;;  %s6836_s14 = smov 32  }
  0x3c   : > { %5525 = dma.hbm_to_vmem [thread:$0]  (!%p5912_p5), %s6848_s3, 8192, %s5904_s9, [#allocation7], %s6835_s10, %s6835_s10, %s6836_s14  }
  0x3d   : > { %p6849_p1 = scmp.ne.s32.totalorder %s6847_s12, 0  ;;  %p59_p3 = scmp.eq.s32.totalorder %s5796_s21, 0 }
  0x3e   : > { %p5538_p9 = scmp.lt.s32.totalorder %s5796_s21, 11  ;;  %s5955_s26 = sand.u32 1, %s5792_s20  }
  0x3f   : > { %s5950_s25 = scalar_select %p6849_p1, %s5792_s20, %s51_s13  }
  0x40   : > { %s5501_s28 = sshll.u32 %s5796_s21, 16  ;;  %p6851_p11 = scmp.ne.s32.totalorder %s5792_s20, %s5788_s19 }
  0x41   : > { %6850 = sst [smem:[#allocation16_spill]] %s5950_s25  ;;  %s4877_s11 = sshll.u32 %s5955_s26, 12 }
  0x42   : > { %p60_p0 = por %p59_p3, %p6851_p11  ;;  %s6852_s1 = sld [smem:[#allocation17_spill]] }
  0x43   : > { %s187_s12 = scalar_lea.vmem [#allocation3], %s4877_s11  ;;  %s184_s23 = scalar_lea.sflag [#allocation4], %s5955_s26 }
  0x44   : > { %p5967_p2 = pnand %p5538_p9, %p60_p0  ;;  %s194_s13 = sshll.u32 %s187_s12, 4  ;;  %s5972_s13 = int_to_ptr.vmem [resolvable:$true] %s194_s13 }
  0x46   : > { %p5640_p6 = pneg %p5967_p2 }
  0x48   : > { %s5965_s5 = scalar_lea.hbm %s6852_s1, %s5501_s28  ;;  %s5643_s8 = scalar_lea.hbm %s6852_s1, 720896 }
  0x49   : > { %s5638_s10 = scalar_lea.hbm %s5965_s5, 65536  ;;  %p5644_p10 = scmp.lt.u32.totalorder %s5965_s5, %s6852_s1 }
  0x4a   : > { %p5639_p5 = scmp.ne.s32.totalorder %s5965_s5, %s5638_s10  ;;  %p5645_p12 = scmp.lt.u32.totalorder %s5643_s8, %s5638_s10 }
  0x4b   : > { %p5647_p4 = scmp.lt.u32.totalorder %s5638_s10, %s5965_s5 }
  0x4c   : > { %p5641_p7 = pnand %p5640_p6, %p5639_p5  ;;  %p5646_p13 = por %p5645_p12, %p5644_p10 }
  0x4e   : > { %p5642_p8 = pneg %p5641_p7  ;;  %p5648_p1 = por %p5647_p4, %p5646_p13 }
  0x50   : > { %p5649_p3 = pnand %p5648_p1, %p5642_p8 }
  0x52   : > { %5652 = shalt.err (!%p5649_p3)
}
  0x53   : > { %s5653_s11 = scalar_lea.vmem %s5972_s13, 65536  ;;  %s5801_s12 = smov [#allocation3]  }
  0x54   : > { %p5654_p9 = scmp.ne.s32.totalorder %s5972_s13, %s5653_s11  ;;  %s5658_s28 = sshll.u32 %s5801_s12, 4  ;;  %s5659_s28 = int_to_ptr.vmem [resolvable:$false] %s5658_s28 }
  0x55   : > { %s5660_s3 = scalar_lea.vmem %s5659_s28, 131072  ;;  %p5661_p5 = scmp.lt.s32.totalorder %s5972_s13, %s5659_s28 }
  0x56   : > { %p5656_p11 = pnand %p5654_p9, %p5640_p6  ;;  %p5662_p7 = scmp.lt.s32.totalorder %s5660_s3, %s5653_s11 }
  0x58   : > { %p5657_p0 = pneg %p5656_p11  ;;  %p5663_p10 = por %p5662_p7, %p5661_p5 }
  0x5a   : > { %p5664_p12 = pnand %p5663_p10, %p5657_p0 }
  0x5c   : > { %5667 = shalt.err (!%p5664_p12)
}
  0x5d   : > { %s6854_s10 = smov 32   ;;  %s6855_s14 = smov 512  }
  0x5e   : > { %5529 = dma.hbm_to_vmem [thread:$0]  (!%p5967_p2), %s5965_s5, 65536, %s5972_s13, %s184_s23, %s6855_s14, %s6855_s14, %s6854_s10  }
  0x5f   : > { %s4880_s29 = sshll.u32 %s5955_s26, 3  ;;  %s5502_s8 = sshll.u32 %s5796_s21, 7 }
  0x60   : > { %s6010_s28 = scalar_lea.hbm %s6828_s2, %s5502_s8  ;;  %s208_s3 = scalar_lea.vmem [#allocation6], %s4880_s29 }
  0x61   : > { %s216_s18 = sshll.u32 %s208_s3, 4  ;;  %s6856_s1 = sand.u32 1, %s5796_s21   ;;  %s217_s18 = int_to_ptr.vmem [resolvable:$true] %s216_s18 }
  0x62   : > { %s205_s25 = scalar_lea.sflag [#allocation7], %s6856_s1  ;;  %s5668_s20 = scalar_lea.hbm %s6010_s28, 128 }
  0x63   : > { %p5669_p8 = scmp.ne.s32.totalorder %s6010_s28, %s5668_s20  ;;  %s5673_s13 = scalar_lea.hbm %s6828_s2, 1408 }
  0x64   : > { %p5674_p1 = scmp.lt.u32.totalorder %s6010_s28, %s6828_s2  ;;  %p5675_p3 = scmp.lt.u32.totalorder %s5673_s13, %s5668_s20 }
  0x65   : > { %p5671_p13 = pnand %p5669_p8, %p5640_p6  ;;  %p5677_p11 = scmp.lt.u32.totalorder %s5668_s20, %s6010_s28 }
  0x66   : > { %p5676_p9 = por %p5675_p3, %p5674_p1 }
  0x67   : > { %p5672_p4 = pneg %p5671_p13 }
  0x68   : > { %p5678_p0 = por %p5677_p11, %p5676_p9 }
  0x6a   : > { %p5679_p5 = pnand %p5678_p0, %p5672_p4 }
  0x6c   : > { %5682 = shalt.err (!%p5679_p5)
}
  0x6d   : > { %s5683_s1 = scalar_lea.vmem %s217_s18, 128  ;;  %s5802_s14 = smov [#allocation6]  }
  0x6e   : > { %p5684_p7 = scmp.ne.s32.totalorder %s217_s18, %s5683_s1  ;;  %s5688_s29 = sshll.u32 %s5802_s14, 4  ;;  %s5689_s29 = int_to_ptr.vmem [resolvable:$false] %s5688_s29 }
  0x6f   : > { %s5690_s8 = scalar_lea.vmem %s5689_s29, 256  ;;  %p5691_p8 = scmp.lt.s32.totalorder %s217_s18, %s5689_s29 }
  0x70   : > { %p5686_p10 = pnand %p5684_p7, %p5640_p6  ;;  %p5692_p13 = scmp.lt.s32.totalorder %s5690_s8, %s5683_s1 }
  0x72   : > { %p5687_p12 = pneg %p5686_p10  ;;  %p5693_p1 = por %p5692_p13, %p5691_p8 }
  0x74   : > { %p5694_p3 = pnand %p5693_p1, %p5687_p12 }
  0x76   : > { %5697 = shalt.err (!%p5694_p3)
}
  0x77   : > { %5532 = dma.hbm_to_vmem [thread:$0]  (!%p5967_p2), %s6010_s28, 128, %s217_s18, %s205_s25  }
  0x78   : > { %p6857_p4 = scmp.ne.s32.totalorder %s6845_s7, 0 }
  0x79   : > { %s227_s20 = sand.u32 (!%p6857_p4), 1, %s5788_s19   ;;  %p6858_p6 = scmp.ne.s32.totalorder (!%p6857_p4), %s6841_s27, 0 }
  0x7a   : > { %225 = sbr.rel (%p6857_p4) target bundleno = 985 (0x3d9), region = 36  ;;  %s4884_s11 = sshll.u32 (!%p6857_p4), %s227_s20, 12 }
  0x7b   : > { %s228_s12 = scalar_lea.sflag (!%p6857_p4), [#allocation4], %s227_s20  ;;  %s6036_s3 = scalar_lea.vmem (!%p6857_p4), [#allocation3], %s4884_s11 }
  0x81   : > { %5755 = dma.done.wait (%p6858_p6), %s228_s12, 65536  }
  0x82   : > { %5757 = vsyncadd (%p6858_p6), %s228_s12, 4294901760  ;;  %s236_s9 = sand.u32 1, %s5864_s22   ;;  %s4885_s5 = sshll.u32 %s227_s20, 3 }
  0x83   : > { %s237_s25 = scalar_lea.sflag [#allocation7], %s236_s9  ;;  %s6043_s18 = scalar_lea.vmem [#allocation6], %s4885_s5 }
  0x84   : > { %5759 = dma.done.wait (%p6858_p6), %s237_s25, 128  }
  0x85   : > { %5761 = vsyncadd (%p6858_p6), %s237_s25, 4294967168  ;;  %p6859_p2 = scmp.eq.s32.totalorder %s5864_s22, 0 }
  0x87   : > { %5763 = dma.done.wait (%p6859_p2), [#allocation7], 8192   ;;  %p6860_p9 = pmov %p6859_p2 }
  0x88   : > { %s271_s7 = sand.u32 1, %s5776_s16   ;;  %p6861_p11 = scmp.ne.s32.totalorder %s5864_s22, 0 }
  0x89   : > { %5765 = vsyncadd (%p6860_p9), [#allocation7], 4294959104  ;;  %s4887_s28 = sshll.u32 %s271_s7, 6  ;;  %v283_v0 = vld [vmem:[%s6826_s0] sm:$0xff] (!%p6861_p11)  ;;  %v284_v1 = vld [vmem:[%s6826_s0 + $0x8] sm:$0xff] (!%p6861_p11) }
  0x8a   : > { %s6056_s26 = scalar_lea.vmem [#allocation9], %s4887_s28  ;;  %282 = sbr.rel (%p6861_p11) target bundleno = 145 (0x91), region = 52  ;;  %v285_v2 = vld [vmem:[%s6826_s0 + $0x10] sm:$0xff] (!%p6861_p11)  ;;  %v5503_v3 = vpack.c.bf16 (!%p6861_p11), %v284_v1, %v283_v0  ;;  %v286_v4 = vld [vmem:[%s6826_s0 + $0x18] sm:$0xff] (!%p6861_p11)  ;;  %v287_v5 = vld [vmem:[%s6826_s0 + $0x20] sm:$0xff] (!%p6861_p11) }
  0x8b   : > { %v288_v6 = vld [vmem:[%s6826_s0 + $0x28] sm:$0xff] (!%p6861_p11)  ;;  %v5504_v7 = vpack.c.bf16 (!%p6861_p11), %v286_v4, %v285_v2  ;;  %v289_v9 = vld [vmem:[%s6826_s0 + $0x30] sm:$0xff] (!%p6861_p11)  ;;  %v290_v10 = vld [vmem:[%s6826_s0 + $0x38] sm:$0xff] (!%p6861_p11) }
  0x8c   : > { %v5505_v8 = vpack.c.bf16 (!%p6861_p11), %v288_v6, %v287_v5  ;;  %323 = vst [vmem:[#allocation2] sm:$0xff] (!%p6861_p11), %v5503_v3  ;;  %v5506_v11 = vpack.c.bf16 (!%p6861_p11), %v290_v10, %v289_v9 }
  0x8d   : > { %324 = vst [vmem:[#allocation2 + $0x8] sm:$0xff] (!%p6861_p11), %v5504_v7 }
  0x8e   : > { %325 = vst [vmem:[#allocation2 + $0x10] sm:$0xff] (!%p6861_p11), %v5505_v8  ;;  %326 = vst [vmem:[#allocation2 + $0x18] sm:$0xff] (!%p6861_p11), %v5506_v11 }
  0x91 PF: > { %v849_v12 = vld [vmem:[#allocation8] sm:$0xff]  ;;  %v850_v14 = vld [vmem:[#allocation8 + $0x8] sm:$0xff]  ;;  %v5803_v20 = vmov 0   ;;  %p6862_p0 = scmp.eq.s32.totalorder %s5864_s22, 0  ;;  %p5489_p5 = scmp.ge.s32.totalorder %s5864_s22, 7 }
  0x92   : > { %v853_v13 = vld [vmem:[#allocation8 + $0x20] sm:$0xff]  ;;  %v854_v16 = vld [vmem:[#allocation8 + $0x28] sm:$0xff]  ;;  %1265 = vmatprep.mubr.bf16.mxu0 %v5803_v20  ;;  %1306 = vmatprep.mubr.bf16.mxu1 %v5803_v20 }
  0x93   : > { %v4894_v15 = vcombine.high %v849_v12, %v853_v13  ;;  %v4893_v17 = vcombine.low %v849_v12, %v853_v13  ;;  %v857_v18 = vld [vmem:[#allocation8 + $0x40] sm:$0xff]  ;;  %v4896_v21 = vcombine.high %v850_v14, %v854_v16  ;;  %v4895_v22 = vcombine.low %v850_v14, %v854_v16  ;;  %v858_v24 = vld [vmem:[#allocation8 + $0x48] sm:$0xff]  ;;  %s844_s23 = scalar_select %p6862_p0, 1, 0  ;;  %v851_v12 = vld [vmem:[#allocation8 + $0x10] sm:$0xff] }
  0x94   : > { %v861_v19 = vld [vmem:[#allocation8 + $0x60] sm:$0xff]  ;;  %v862_v25 = vld [vmem:[#allocation8 + $0x68] sm:$0xff]  ;;  %v855_v13 = vld [vmem:[#allocation8 + $0x30] sm:$0xff] }
  0x95   : > { %v4902_v23 = vcombine.high %v857_v18, %v861_v19  ;;  %v865_v26 = vld [vmem:[#allocation8 + $0x80] sm:$0xff]  ;;  %1233 = vmatprep.subr.bf16.mxu0 %v4894_v15  ;;  %v4904_v27 = vcombine.high %v858_v24, %v862_v25  ;;  %v866_v29 = vld [vmem:[#allocation8 + $0x88] sm:$0xff]  ;;  %1274 = vmatprep.subr.bf16.mxu1 %v4896_v21  ;;  %v4901_v31 = vcombine.low %v857_v18, %v861_v19  ;;  %v845_v11 = vstv %s844_s23  ;;  %v852_v14 = vld [vmem:[#allocation8 + $0x18] sm:$0xff] }
  0x96   : > { %v869_v28 = vld [vmem:[#allocation8 + $0xa0] sm:$0xff]  ;;  %v870_v30 = vld [vmem:[#allocation8 + $0xa8] sm:$0xff]  ;;  %1234 = vmatpush1.bf16.msra.mxu0 %v4893_v17  ;;  %1275 = vmatpush1.bf16.msra.mxu1 %v4895_v22  ;;  %v4903_v32 = vcombine.low %v858_v24, %v862_v25  ;;  %v856_v15 = vld [vmem:[#allocation8 + $0x38] sm:$0xff]  ;;  %vm846_vm0 = vcmp.eq.s32.totalorder %v845_v11, 1  ;;  %v4898_v19 = vcombine.high %v851_v12, %v855_v13 }
  0x97   : > { %1235 = vmatprep.subr.bf16.mxu0 %v4902_v23  ;;  %v4910_v33 = vcombine.high %v865_v26, %v869_v28  ;;  %1276 = vmatprep.subr.bf16.mxu1 %v4904_v27  ;;  %v4912_v34 = vcombine.high %v866_v29, %v870_v30  ;;  %v873_v35 = vld [vmem:[#allocation8 + $0xc0] sm:$0xff]  ;;  %v874_v37 = vld [vmem:[#allocation8 + $0xc8] sm:$0xff]  ;;  %v4909_v39 = vcombine.low %v865_v26, %v869_v28  ;;  %v859_v22 = vld [vmem:[#allocation8 + $0x50] sm:$0xff] }
  0x98   : > { %v877_v36 = vld [vmem:[#allocation8 + $0xe0] sm:$0xff]  ;;  %v878_v38 = vld [vmem:[#allocation8 + $0xe8] sm:$0xff]  ;;  %v4911_v40 = vcombine.low %v866_v29, %v870_v30  ;;  %v4900_v21 = vcombine.high %v852_v14, %v856_v15  ;;  %v863_v23 = vld [vmem:[#allocation8 + $0x70] sm:$0xff]  ;;  %v4897_v28 = vcombine.low %v851_v12, %v855_v13  ;;  %v4899_v29 = vcombine.low %v852_v14, %v856_v15 }
  0x99   : > { %v4918_v41 = vcombine.high %v873_v35, %v877_v36  ;;  %v4920_v42 = vcombine.high %v874_v37, %v878_v38  ;;  %v881_v43 = vld [vmem:[#allocation8 + $0x100] sm:$0xff]  ;;  %v882_v45 = vld [vmem:[#allocation8 + $0x108] sm:$0xff]  ;;  %v4917_v47 = vcombine.low %v873_v35, %v877_v36  ;;  %v4919_v48 = vcombine.low %v874_v37, %v878_v38  ;;  %v860_v25 = vld [vmem:[#allocation8 + $0x58] sm:$0xff] }
  0x9a   : > { %1236 = vmatpush1.bf16.msra.mxu0 %v4901_v31  ;;  %1277 = vmatpush1.bf16.msra.mxu1 %v4903_v32  ;;  %v885_v44 = vld [vmem:[#allocation8 + $0x120] sm:$0xff]  ;;  %v886_v46 = vld [vmem:[#allocation8 + $0x128] sm:$0xff]  ;;  %v864_v26 = vld [vmem:[#allocation8 + $0x78] sm:$0xff]  ;;  %v4906_v30 = vcombine.high %v859_v22, %v863_v23  ;;  %v4905_v36 = vcombine.low %v859_v22, %v863_v23 }
  0x9b   : > { %1237 = vmatprep.subr.bf16.mxu0 %v4910_v33  ;;  %1278 = vmatprep.subr.bf16.mxu1 %v4912_v34  ;;  %v4926_v49 = vcombine.high %v881_v43, %v885_v44  ;;  %v4928_v50 = vcombine.high %v882_v45, %v886_v46  ;;  %v889_v51 = vld [vmem:[#allocation8 + $0x140] sm:$0xff]  ;;  %v890_v53 = vld [vmem:[#allocation8 + $0x148] sm:$0xff]  ;;  %v4925_v55 = vcombine.low %v881_v43, %v885_v44  ;;  %vm6093_vm1 = vmpackc.low %vm846_vm0, %vm846_vm0 }
  0x9c   : > { %v893_v52 = vld [vmem:[#allocation8 + $0x160] sm:$0xff]  ;;  %v894_v54 = vld [vmem:[#allocation8 + $0x168] sm:$0xff]  ;;  %v4927_v56 = vcombine.low %v882_v45, %v886_v46  ;;  %v4908_v31 = vcombine.high %v860_v25, %v864_v26  ;;  %v867_v32 = vld [vmem:[#allocation8 + $0x90] sm:$0xff]  ;;  %v4907_v37 = vcombine.low %v860_v25, %v864_v26 }
  0x9d   : > { %v4934_v57 = vcombine.high %v889_v51, %v893_v52  ;;  %v4936_v58 = vcombine.high %v890_v53, %v894_v54  ;;  %v897_v59 = vld [vmem:[#allocation8 + $0x180] sm:$0xff]  ;;  %v898_v61 = vld [vmem:[#allocation8 + $0x188] sm:$0xff]  ;;  %v4933_v63 = vcombine.low %v889_v51, %v893_v52  ;;  %v4935_v0 = vcombine.low %v890_v53, %v894_v54  ;;  %v871_v33 = vld [vmem:[#allocation8 + $0xb0] sm:$0xff] }
  0x9e   : > { %1238 = vmatpush1.bf16.msra.mxu0 %v4909_v39  ;;  %1279 = vmatpush1.bf16.msra.mxu1 %v4911_v40  ;;  %v901_v60 = vld [vmem:[#allocation8 + $0x1a0] sm:$0xff]  ;;  %v902_v62 = vld [vmem:[#allocation8 + $0x1a8] sm:$0xff]  ;;  %v868_v34 = vld [vmem:[#allocation8 + $0x98] sm:$0xff]  ;;  %v4914_v38 = vcombine.high %v867_v32, %v871_v33  ;;  %v4913_v44 = vcombine.low %v867_v32, %v871_v33 }
  0x9f   : > { %1239 = vmatprep.subr.bf16.mxu0 %v4918_v41  ;;  %1280 = vmatprep.subr.bf16.mxu1 %v4920_v42  ;;  %v4942_v1 = vcombine.high %v897_v59, %v901_v60  ;;  %v4944_v2 = vcombine.high %v898_v61, %v902_v62  ;;  %v905_v3 = vld [vmem:[#allocation8 + $0x1c0] sm:$0xff]  ;;  %v906_v5 = vld [vmem:[#allocation8 + $0x1c8] sm:$0xff]  ;;  %v4941_v7 = vcombine.low %v897_v59, %v901_v60  ;;  %v872_v35 = vld [vmem:[#allocation8 + $0xb8] sm:$0xff] }
  0xa0   : > { %v909_v4 = vld [vmem:[#allocation8 + $0x1e0] sm:$0xff]  ;;  %v910_v6 = vld [vmem:[#allocation8 + $0x1e8] sm:$0xff]  ;;  %v4943_v8 = vcombine.low %v898_v61, %v902_v62  ;;  %v4916_v39 = vcombine.high %v868_v34, %v872_v35  ;;  %v875_v40 = vld [vmem:[#allocation8 + $0xd0] sm:$0xff]  ;;  %v4915_v45 = vcombine.low %v868_v34, %v872_v35 }
  0xa1   : > { %v4950_v9 = vcombine.high %v905_v3, %v909_v4  ;;  %v4952_v10 = vcombine.high %v906_v5, %v910_v6  ;;  %v4949_v16 = vcombine.low %v905_v3, %v909_v4  ;;  %v843_v17 = vld [vmem:[%s6826_s0 + $0x40] sm:$0xff]  ;;  %v4951_v18 = vcombine.low %v906_v5, %v910_v6  ;;  %v879_v41 = vld [vmem:[#allocation8 + $0xf0] sm:$0xff]  ;;  %v876_v42 = vld [vmem:[#allocation8 + $0xd8] sm:$0xff] }
  0xa2   : > { %1240 = vmatpush1.bf16.msra.mxu0 %v4917_v47  ;;  %1281 = vmatpush1.bf16.msra.mxu1 %v4919_v48  ;;  %v6091_v24 = vpack.c.bf16 %v843_v17, %v843_v17  ;;  %v880_v43 = vld [vmem:[#allocation8 + $0xf8] sm:$0xff]  ;;  %v4922_v46 = vcombine.high %v875_v40, %v879_v41  ;;  %v883_v48 = vld [vmem:[#allocation8 + $0x110] sm:$0xff]  ;;  %v4921_v52 = vcombine.low %v875_v40, %v879_v41 }
  0xa3   : > { %1241 = vmatprep.subr.bf16.mxu0 %v4926_v49  ;;  %1282 = vmatprep.subr.bf16.mxu1 %v4928_v50  ;;  %v4924_v47 = vcombine.high %v876_v42, %v880_v43  ;;  %v887_v49 = vld [vmem:[#allocation8 + $0x130] sm:$0xff]  ;;  %v884_v50 = vld [vmem:[#allocation8 + $0x118] sm:$0xff]  ;;  %v4923_v53 = vcombine.low %v876_v42, %v880_v43 }
  0xa4   : > { %v888_v51 = vld [vmem:[#allocation8 + $0x138] sm:$0xff]  ;;  %v4930_v54 = vcombine.high %v883_v48, %v887_v49  ;;  %v4929_v59 = vcombine.low %v883_v48, %v887_v49  ;;  %v331_v15 = vld [vmem:[%s6036_s3] sm:$0xff] }
  0xa5   : > { %v4931_v60 = vcombine.low %v884_v50, %v888_v51  ;;  %v459_v17 = vld [vmem:[%s6036_s3 + $0x400] sm:$0xff]  ;;  %v6115_v32 = vld [vmem:[#allocation2 + $0x8] sm:$0xff] }
  0xa6   : > { %1242 = vmatpush1.bf16.msra.mxu0 %v4925_v55  ;;  %1283 = vmatpush1.bf16.msra.mxu1 %v4927_v56  ;;  %v891_v55 = vld [vmem:[#allocation8 + $0x150] sm:$0xff]  ;;  %v6130_v41 = vcombine.high %v6115_v32, %v6115_v32 }
  0xa7   : > { %1243 = vmatprep.subr.bf16.mxu0 %v4934_v57  ;;  %1284 = vmatprep.subr.bf16.mxu1 %v4936_v58  ;;  %v895_v56 = vld [vmem:[#allocation8 + $0x170] sm:$0xff]  ;;  %v892_v57 = vld [vmem:[#allocation8 + $0x158] sm:$0xff] }
  0xa8   : > { %v896_v58 = vld [vmem:[#allocation8 + $0x178] sm:$0xff]  ;;  %v4938_v61 = vcombine.high %v891_v55, %v895_v56  ;;  %v4937_v3 = vcombine.low %v891_v55, %v895_v56  ;;  %v339_v25 = vld [vmem:[%s6036_s3 + $0x40] sm:$0xff] }
  0xa9   : > { %v4940_v62 = vcombine.high %v892_v57, %v896_v58  ;;  %v4939_v4 = vcombine.low %v892_v57, %v896_v58  ;;  %v343_v26 = vld [vmem:[%s6036_s3 + $0x60] sm:$0xff] }
  0xaa   : > { %1244 = vmatpush1.bf16.msra.mxu0 %v4933_v63  ;;  %1285 = vmatpush1.bf16.msra.mxu1 %v4935_v0  ;;  %v899_v63 = vld [vmem:[#allocation8 + $0x190] sm:$0xff]  ;;  %v4986_v34 = vcombine.high %v339_v25, %v343_v26  ;;  %v4985_v42 = vcombine.low %v339_v25, %v343_v26 }
  0xab   : > { %1245 = vmatprep.subr.bf16.mxu0 %v4942_v1  ;;  %1286 = vmatprep.subr.bf16.mxu1 %v4944_v2  ;;  %v903_v0 = vld [vmem:[#allocation8 + $0x1b0] sm:$0xff]  ;;  %v900_v1 = vld [vmem:[#allocation8 + $0x198] sm:$0xff] }
  0xac   : > { %v904_v2 = vld [vmem:[#allocation8 + $0x1b8] sm:$0xff]  ;;  %v4946_v5 = vcombine.high %v899_v63, %v903_v0  ;;  %v4945_v11 = vcombine.low %v899_v63, %v903_v0  ;;  %v479_v40 = vld [vmem:[%s6036_s3 + $0x4a0] sm:$0xff] }
  0xad   : > { %v4948_v6 = vcombine.high %v900_v1, %v904_v2  ;;  %v4947_v12 = vcombine.low %v900_v1, %v904_v2  ;;  %v483_v48 = vld [vmem:[%s6036_s3 + $0x4c0] sm:$0xff] }
  0xae   : > { %1246 = vmatpush1.bf16.msra.mxu0 %v4941_v7  ;;  %1287 = vmatpush1.bf16.msra.mxu1 %v4943_v8  ;;  %v907_v7 = vld [vmem:[#allocation8 + $0x1d0] sm:$0xff] }
  0xaf   : > { %1247 = vmatprep.subr.bf16.mxu0 %v4950_v9  ;;  %1288 = vmatprep.subr.bf16.mxu1 %v4952_v10  ;;  %v911_v8 = vld [vmem:[#allocation8 + $0x1f0] sm:$0xff]  ;;  %v908_v9 = vld [vmem:[#allocation8 + $0x1d8] sm:$0xff] }
  0xb0   : > { %v912_v10 = vld [vmem:[#allocation8 + $0x1f8] sm:$0xff]  ;;  %v4954_v13 = vcombine.high %v907_v7, %v911_v8  ;;  %v487_v49 = vld [vmem:[%s6036_s3 + $0x4e0] sm:$0xff] }
  0xb1   : > { %v4956_v14 = vcombine.high %v908_v9, %v912_v10  ;;  %v5129_v56 = vcombine.low %v483_v48, %v487_v49 }
  0xb2   : > { %1248 = vmatpush1.bf16.msra.mxu0 %v4949_v16  ;;  %1289 = vmatpush1.bf16.msra.mxu1 %v4951_v18  ;;  %v335_v16 = vld [vmem:[%s6036_s3 + $0x20] sm:$0xff] }
  0xb3   : > { %1315 = vmatprep.subr.bf16.mxu0 %v4898_v19  ;;  %1356 = vmatprep.subr.bf16.mxu1 %v4900_v21  ;;  %v463_v18 = vld [vmem:[%s6036_s3 + $0x420] sm:$0xff]  ;;  %v4953_v19 = vcombine.low %v907_v7, %v911_v8  ;;  %v4955_v21 = vcombine.low %v908_v9, %v912_v10  ;;  %v4978_v22 = vcombine.high %v331_v15, %v335_v16 }
  0xb4   : > { %v5106_v23 = vcombine.high %v459_v17, %v463_v18  ;;  %v5105_v33 = vcombine.low %v459_v17, %v463_v18 }
  0xb5   : > { %4959 = vmatmul.mubr.msk.bf16.vlgmr.msra.gmra.mrb[0].mxu0 %vm6093_vm1, %v6091_v24  ;;  %4962 = vmatmul.mubr.msk.bf16.vlgmr.msra.gmra.mrb[0].mxu1 %vm6093_vm1, %v6091_v24 }
  0xb6   : > { %1316 = vmatpush1.bf16.msra.mxu0 %v4897_v28  ;;  %1357 = vmatpush1.bf16.msra.mxu1 %v4899_v29  ;;  %v467_v28 = vld [vmem:[%s6036_s3 + $0x440] sm:$0xff] }
  0xb7   : > { %1317 = vmatprep.subr.bf16.mxu0 %v4906_v30  ;;  %1358 = vmatprep.subr.bf16.mxu1 %v4908_v31  ;;  %v471_v29 = vld [vmem:[%s6036_s3 + $0x460] sm:$0xff]  ;;  %v4977_v31 = vcombine.low %v331_v15, %v335_v16 }
  0xb8   : > { %1347 = vmatprep.mubr.bf16.mxu0 %v5803_v20  ;;  %1388 = vmatprep.mubr.bf16.mxu1 %v5803_v20  ;;  %v4932_v20 = vcombine.high %v884_v50, %v888_v51  ;;  %v6113_v30 = vld [vmem:[#allocation2] sm:$0xff]  ;;  %v5114_v35 = vcombine.high %v467_v28, %v471_v29  ;;  %v5113_v43 = vcombine.low %v467_v28, %v471_v29 }
  0xb9   : > { %v5130_v51 = vcombine.high %v483_v48, %v487_v49 }
  0xba   : > { %1318 = vmatpush1.bf16.msra.mxu0 %v4905_v36  ;;  %1359 = vmatpush1.bf16.msra.mxu1 %v4907_v37  ;;  %v347_v36 = vld [vmem:[%s6036_s3 + $0x80] sm:$0xff] }
  0xbb   : > { %1319 = vmatprep.subr.bf16.mxu0 %v4914_v38  ;;  %1360 = vmatprep.subr.bf16.mxu1 %v4916_v39  ;;  %v351_v37 = vld [vmem:[%s6036_s3 + $0xa0] sm:$0xff]  ;;  %v6121_v38 = vcombine.high %v6113_v30, %v6113_v30 }
  0xbc   : > { %v475_v39 = vld [vmem:[%s6036_s3 + $0x480] sm:$0xff] }
  0xbd   : > { %v5121_v27 = vcombine.low %v475_v39, %v479_v40 }
  0xbe   : > { %1320 = vmatpush1.bf16.msra.mxu0 %v4913_v44  ;;  %1361 = vmatpush1.bf16.msra.mxu1 %v4915_v45  ;;  %v4994_v44 = vcombine.high %v347_v36, %v351_v37  ;;  %v5122_v45 = vcombine.high %v475_v39, %v479_v40 }
  0xbf   : > { %1321 = vmatprep.subr.bf16.mxu0 %v4922_v46  ;;  %1362 = vmatprep.subr.bf16.mxu1 %v4924_v47  ;;  %v355_v46 = vld [vmem:[%s6036_s3 + $0xc0] sm:$0xff] }
  0xc0   : > { %v359_v47 = vld [vmem:[%s6036_s3 + $0xe0] sm:$0xff] }
  0xc1   : > { %v5002_v50 = vcombine.high %v355_v46, %v359_v47  ;;  %v5001_v55 = vcombine.low %v355_v46, %v359_v47 }
  0xc2   : > { %1322 = vmatpush1.bf16.msra.mxu0 %v4921_v52  ;;  %1363 = vmatpush1.bf16.msra.mxu1 %v4923_v53  ;;  %v363_v52 = vld [vmem:[%s6036_s3 + $0x100] sm:$0xff] }
  0xc3   : > { %1323 = vmatprep.subr.bf16.mxu0 %v4930_v54  ;;  %1364 = vmatprep.subr.bf16.mxu1 %v4932_v20  ;;  %v367_v53 = vld [vmem:[%s6036_s3 + $0x120] sm:$0xff] }
  0xc4   : > { %v491_v54 = vld [vmem:[%s6036_s3 + $0x500] sm:$0xff]  ;;  %v5010_v57 = vcombine.high %v363_v52, %v367_v53  ;;  %v5009_v63 = vcombine.low %v363_v52, %v367_v53 }
  0xc5   : > { %v495_v20 = vld [vmem:[%s6036_s3 + $0x520] sm:$0xff] }
  0xc6   : > { %1324 = vmatpush1.bf16.msra.mxu0 %v4929_v59  ;;  %1365 = vmatpush1.bf16.msra.mxu1 %v4931_v60  ;;  %v5138_v58 = vcombine.high %v491_v54, %v495_v20  ;;  %v371_v59 = vld [vmem:[%s6036_s3 + $0x140] sm:$0xff]  ;;  %v5137_v0 = vcombine.low %v491_v54, %v495_v20 }
  0xc7   : > { %1325 = vmatprep.subr.bf16.mxu0 %v4938_v61  ;;  %1366 = vmatprep.subr.bf16.mxu1 %v4940_v62  ;;  %v375_v60 = vld [vmem:[%s6036_s3 + $0x160] sm:$0xff] }
  0xc8   : > { %v499_v61 = vld [vmem:[%s6036_s3 + $0x540] sm:$0xff]  ;;  %v5018_v1 = vcombine.high %v371_v59, %v375_v60  ;;  %v5017_v7 = vcombine.low %v371_v59, %v375_v60 }
  0xc9   : > { %v503_v62 = vld [vmem:[%s6036_s3 + $0x560] sm:$0xff] }
  0xca   : > { %1326 = vmatpush1.bf16.msra.mxu0 %v4937_v3  ;;  %1367 = vmatpush1.bf16.msra.mxu1 %v4939_v4  ;;  %v5146_v2 = vcombine.high %v499_v61, %v503_v62  ;;  %v379_v3 = vld [vmem:[%s6036_s3 + $0x180] sm:$0xff]  ;;  %v5145_v8 = vcombine.low %v499_v61, %v503_v62 }
  0xcb   : > { %1327 = vmatprep.subr.bf16.mxu0 %v4946_v5  ;;  %1368 = vmatprep.subr.bf16.mxu1 %v4948_v6  ;;  %v383_v4 = vld [vmem:[%s6036_s3 + $0x1a0] sm:$0xff] }
  0xcc   : > { %v507_v5 = vld [vmem:[%s6036_s3 + $0x580] sm:$0xff]  ;;  %v5026_v9 = vcombine.high %v379_v3, %v383_v4  ;;  %v5025_v15 = vcombine.low %v379_v3, %v383_v4 }
  0xcd   : > { %v511_v6 = vld [vmem:[%s6036_s3 + $0x5a0] sm:$0xff] }
  0xce   : > { %1328 = vmatpush1.bf16.msra.mxu0 %v4945_v11  ;;  %1369 = vmatpush1.bf16.msra.mxu1 %v4947_v12  ;;  %v5154_v10 = vcombine.high %v507_v5, %v511_v6  ;;  %v387_v11 = vld [vmem:[%s6036_s3 + $0x1c0] sm:$0xff]  ;;  %v5153_v16 = vcombine.low %v507_v5, %v511_v6 }
  0xcf   : > { %1329 = vmatprep.subr.bf16.mxu0 %v4954_v13  ;;  %1370 = vmatprep.subr.bf16.mxu1 %v4956_v14  ;;  %v391_v12 = vld [vmem:[%s6036_s3 + $0x1e0] sm:$0xff] }
  0xd0   : > { %v515_v13 = vld [vmem:[%s6036_s3 + $0x5c0] sm:$0xff]  ;;  %v5034_v17 = vcombine.high %v387_v11, %v391_v12  ;;  %v5033_v25 = vcombine.low %v387_v11, %v391_v12 }
  0xd1   : > { %v519_v14 = vld [vmem:[%s6036_s3 + $0x5e0] sm:$0xff] }
  0xd2   : > { %1330 = vmatpush1.bf16.msra.mxu0 %v4953_v19  ;;  %1371 = vmatpush1.bf16.msra.mxu1 %v4955_v21  ;;  %v5162_v18 = vcombine.high %v515_v13, %v519_v14  ;;  %v395_v19 = vld [vmem:[%s6036_s3 + $0x200] sm:$0xff]  ;;  %v5161_v26 = vcombine.low %v515_v13, %v519_v14 }
  0xd3   : > { %3985 = vmatprep.subr.bf16.mxu0 %v4978_v22  ;;  %4026 = vmatprep.subr.bf16.mxu1 %v5106_v23  ;;  %v399_v21 = vld [vmem:[%s6036_s3 + $0x220] sm:$0xff] }
  0xd4   : > { %v523_v22 = vld [vmem:[%s6036_s3 + $0x600] sm:$0xff]  ;;  %v5042_v28 = vcombine.high %v395_v19, %v399_v21 }
  0xd5   : > { %4965 = vmatmul.mubr.msk.bf16.vlgmr.msra.gmra.mrb[4].mxu0 %vm6093_vm1, %v6091_v24  ;;  %4968 = vmatmul.mubr.msk.bf16.vlgmr.msra.gmra.mrb[4].mxu1 %vm6093_vm1, %v6091_v24  ;;  %v4993_v24 = vcombine.low %v347_v36, %v351_v37  ;;  %v527_v23 = vld [vmem:[%s6036_s3 + $0x620] sm:$0xff]  ;;  %v5041_v36 = vcombine.low %v395_v19, %v399_v21 }
  0xd6   : > { %3986 = vmatpush1.bf16.msra.mxu0 %v4977_v31  ;;  %4027 = vmatpush1.bf16.msra.mxu1 %v5105_v33  ;;  %v5170_v29 = vcombine.high %v523_v22, %v527_v23  ;;  %v403_v31 = vld [vmem:[%s6036_s3 + $0x240] sm:$0xff]  ;;  %v5169_v37 = vcombine.low %v523_v22, %v527_v23 }
  0xd7   : > { %3987 = vmatprep.subr.bf16.mxu0 %v4986_v34  ;;  %4028 = vmatprep.subr.bf16.mxu1 %v5114_v35  ;;  %v407_v33 = vld [vmem:[%s6036_s3 + $0x260] sm:$0xff] }
  0xd8   : > { %4017 = vmatprep.mubr.bf16.mxu0 %v6121_v38  ;;  %4058 = vmatprep.mubr.bf16.mxu1 %v6130_v41  ;;  %v531_v34 = vld [vmem:[%s6036_s3 + $0x640] sm:$0xff]  ;;  %v5050_v39 = vcombine.high %v403_v31, %v407_v33  ;;  %v5049_v46 = vcombine.low %v403_v31, %v407_v33 }
  0xd9   : > { %v535_v35 = vld [vmem:[%s6036_s3 + $0x660] sm:$0xff] }
  0xda   : > { %3988 = vmatpush1.bf16.msra.mxu0 %v4985_v42  ;;  %4029 = vmatpush1.bf16.msra.mxu1 %v5113_v43  ;;  %v5178_v40 = vcombine.high %v531_v34, %v535_v35  ;;  %v411_v42 = vld [vmem:[%s6036_s3 + $0x280] sm:$0xff]  ;;  %v5177_v47 = vcombine.low %v531_v34, %v535_v35 }
  0xdb   : > { %3989 = vmatprep.subr.bf16.mxu0 %v4994_v44  ;;  %4030 = vmatprep.subr.bf16.mxu1 %v5122_v45  ;;  %v415_v43 = vld [vmem:[%s6036_s3 + $0x2a0] sm:$0xff] }
  0xdc   : > { %v539_v44 = vld [vmem:[%s6036_s3 + $0x680] sm:$0xff]  ;;  %v5058_v48 = vcombine.high %v411_v42, %v415_v43  ;;  %v5057_v52 = vcombine.low %v411_v42, %v415_v43  ;;  %v6201_v43 = vld [vmem:[#allocation2 + $0x10] sm:$0xff] }
  0xdd   : > { %v543_v45 = vld [vmem:[%s6036_s3 + $0x6a0] sm:$0xff] }
  0xde   : > { %3990 = vmatpush1.bf16.msra.mxu0 %v4993_v24  ;;  %4031 = vmatpush1.bf16.msra.mxu1 %v5121_v27  ;;  %v5186_v49 = vcombine.high %v539_v44, %v543_v45  ;;  %v419_v24 = vld [vmem:[%s6036_s3 + $0x2c0] sm:$0xff]  ;;  %v5185_v53 = vcombine.low %v539_v44, %v543_v45  ;;  %v6205_v44 = vcombine.low %v6115_v32, %v6115_v32 }
  0xdf   : > { %3991 = vmatprep.subr.bf16.mxu0 %v5002_v50  ;;  %4032 = vmatprep.subr.bf16.mxu1 %v5130_v51  ;;  %v423_v27 = vld [vmem:[%s6036_s3 + $0x2e0] sm:$0xff] }
  0xe0   : > { %v547_v50 = vld [vmem:[%s6036_s3 + $0x6c0] sm:$0xff]  ;;  %v5066_v54 = vcombine.high %v419_v24, %v423_v27  ;;  %v5065_v59 = vcombine.low %v419_v24, %v423_v27  ;;  %v6213_v27 = vcombine.high %v6201_v43, %v6201_v43 }
  0xe1   : > { %v551_v51 = vld [vmem:[%s6036_s3 + $0x6e0] sm:$0xff] }
  0xe2   : > { %3992 = vmatpush1.bf16.msra.mxu0 %v5001_v55  ;;  %4033 = vmatpush1.bf16.msra.mxu1 %v5129_v56  ;;  %v5194_v20 = vcombine.high %v547_v50, %v551_v51  ;;  %v427_v55 = vld [vmem:[%s6036_s3 + $0x300] sm:$0xff]  ;;  %v5193_v60 = vcombine.low %v547_v50, %v551_v51 }
  0xe3   : > { %3993 = vmatprep.subr.bf16.mxu0 %v5010_v57  ;;  %4034 = vmatprep.subr.bf16.mxu1 %v5138_v58  ;;  %v431_v56 = vld [vmem:[%s6036_s3 + $0x320] sm:$0xff] }
  0xe4   : > { %v555_v57 = vld [vmem:[%s6036_s3 + $0x700] sm:$0xff]  ;;  %v5074_v61 = vcombine.high %v427_v55, %v431_v56  ;;  %v5073_v3 = vcombine.low %v427_v55, %v431_v56 }
  0xe5   : > { %v559_v58 = vld [vmem:[%s6036_s3 + $0x720] sm:$0xff] }
  0xe6   : > { %3994 = vmatpush1.bf16.msra.mxu0 %v5009_v63  ;;  %4035 = vmatpush1.bf16.msra.mxu1 %v5137_v0  ;;  %v5202_v62 = vcombine.high %v555_v57, %v559_v58  ;;  %v435_v63 = vld [vmem:[%s6036_s3 + $0x340] sm:$0xff]  ;;  %v5201_v4 = vcombine.low %v555_v57, %v559_v58 }
  0xe7   : > { %3995 = vmatprep.subr.bf16.mxu0 %v5018_v1  ;;  %4036 = vmatprep.subr.bf16.mxu1 %v5146_v2  ;;  %v439_v0 = vld [vmem:[%s6036_s3 + $0x360] sm:$0xff] }
  0xe8   : > { %v563_v1 = vld [vmem:[%s6036_s3 + $0x740] sm:$0xff]  ;;  %v5082_v5 = vcombine.high %v435_v63, %v439_v0  ;;  %v5081_v11 = vcombine.low %v435_v63, %v439_v0 }
  0xe9   : > { %v567_v2 = vld [vmem:[%s6036_s3 + $0x760] sm:$0xff] }
  0xea   : > { %3996 = vmatpush1.bf16.msra.mxu0 %v5017_v7  ;;  %4037 = vmatpush1.bf16.msra.mxu1 %v5145_v8  ;;  %v5210_v6 = vcombine.high %v563_v1, %v567_v2  ;;  %v443_v7 = vld [vmem:[%s6036_s3 + $0x380] sm:$0xff]  ;;  %v5209_v12 = vcombine.low %v563_v1, %v567_v2 }
  0xeb   : > { %3997 = vmatprep.subr.bf16.mxu0 %v5026_v9  ;;  %4038 = vmatprep.subr.bf16.mxu1 %v5154_v10  ;;  %v447_v8 = vld [vmem:[%s6036_s3 + $0x3a0] sm:$0xff] }
  0xec   : > { %v571_v9 = vld [vmem:[%s6036_s3 + $0x780] sm:$0xff]  ;;  %v5090_v13 = vcombine.high %v443_v7, %v447_v8  ;;  %v5089_v19 = vcombine.low %v443_v7, %v447_v8 }
  0xed   : > { %v575_v10 = vld [vmem:[%s6036_s3 + $0x7a0] sm:$0xff] }
  0xee   : > { %3998 = vmatpush1.bf16.msra.mxu0 %v5025_v15  ;;  %4039 = vmatpush1.bf16.msra.mxu1 %v5153_v16  ;;  %v5218_v14 = vcombine.high %v571_v9, %v575_v10  ;;  %v451_v15 = vld [vmem:[%s6036_s3 + $0x3c0] sm:$0xff]  ;;  %v5217_v21 = vcombine.low %v571_v9, %v575_v10 }
  0xef   : > { %3999 = vmatprep.subr.bf16.mxu0 %v5034_v17  ;;  %4040 = vmatprep.subr.bf16.mxu1 %v5162_v18  ;;  %v455_v16 = vld [vmem:[%s6036_s3 + $0x3e0] sm:$0xff] }
  0xf0   : > { %v579_v17 = vld [vmem:[%s6036_s3 + $0x7c0] sm:$0xff]  ;;  %v5098_v22 = vcombine.high %v451_v15, %v455_v16  ;;  %v5097_v31 = vcombine.low %v451_v15, %v455_v16 }
  0xf1   : > { %v583_v18 = vld [vmem:[%s6036_s3 + $0x7e0] sm:$0xff] }
  0xf2   : > { %4000 = vmatpush1.bf16.msra.mxu0 %v5033_v25  ;;  %4041 = vmatpush1.bf16.msra.mxu1 %v5161_v26  ;;  %v5226_v23 = vcombine.high %v579_v17, %v583_v18  ;;  %v587_v25 = vld [vmem:[%s6036_s3 + $0x800] sm:$0xff]  ;;  %v5225_v33 = vcombine.low %v579_v17, %v583_v18 }
  0xf3   : > { %4001 = vmatprep.subr.bf16.mxu0 %v5042_v28  ;;  %4042 = vmatprep.subr.bf16.mxu1 %v5170_v29  ;;  %v591_v26 = vld [vmem:[%s6036_s3 + $0x820] sm:$0xff] }
  0xf4   : > { %v715_v28 = vld [vmem:[%s6036_s3 + $0xc00] sm:$0xff]  ;;  %v5234_v34 = vcombine.high %v587_v25, %v591_v26  ;;  %v5233_v45 = vcombine.low %v587_v25, %v591_v26 }
  0xf5   : > { %v719_v29 = vld [vmem:[%s6036_s3 + $0xc20] sm:$0xff] }
  0xf6   : > { %4002 = vmatpush1.bf16.msra.mxu0 %v5041_v36  ;;  %4043 = vmatpush1.bf16.msra.mxu1 %v5169_v37  ;;  %v5362_v35 = vcombine.high %v715_v28, %v719_v29  ;;  %v595_v36 = vld [vmem:[%s6036_s3 + $0x840] sm:$0xff] }
  0xf7   : > { %4003 = vmatprep.subr.bf16.mxu0 %v5050_v39  ;;  %4044 = vmatprep.subr.bf16.mxu1 %v5178_v40  ;;  %v599_v37 = vld [vmem:[%s6036_s3 + $0x860] sm:$0xff]  ;;  %v6197_v39 = vcombine.low %v6113_v30, %v6113_v30 }
  0xf8   : > { %v723_v40 = vld [vmem:[%s6036_s3 + $0xc40] sm:$0xff] }
  0xf9   : > { %v727_v42 = vld [vmem:[%s6036_s3 + $0xc60] sm:$0xff] }
  0xfa   : > { %4004 = vmatpush1.bf16.msra.mxu0 %v5049_v46  ;;  %4045 = vmatpush1.bf16.msra.mxu1 %v5177_v47  ;;  %v6207_v46 = vld [vmem:[#allocation2 + $0x18] sm:$0xff]  ;;  %v5361_v47 = vcombine.low %v715_v28, %v719_v29  ;;  %v5370_v30 = vcombine.high %v723_v40, %v727_v42  ;;  %v607_v24 = vld [vmem:[%s6036_s3 + $0x8a0] sm:$0xff] }
  0xfb   : > { %4005 = vmatprep.subr.bf16.mxu0 %v5058_v48  ;;  %4046 = vmatprep.subr.bf16.mxu1 %v5186_v49  ;;  %v5242_v48 = vcombine.high %v595_v36, %v599_v37  ;;  %v603_v49 = vld [vmem:[%s6036_s3 + $0x880] sm:$0xff]  ;;  %v6220_v51 = vcombine.high %v6207_v46, %v6207_v46 }
  0xfc   : > { %v731_v32 = vld [vmem:[%s6036_s3 + $0xc80] sm:$0xff] }
  0xfd   : > { %v735_v50 = vld [vmem:[%s6036_s3 + $0xca0] sm:$0xff] }
  0xfe   : > { %4006 = vmatpush1.bf16.msra.mxu0 %v5057_v52  ;;  %4047 = vmatpush1.bf16.msra.mxu1 %v5185_v53  ;;  %v5241_v52 = vcombine.low %v595_v36, %v599_v37  ;;  %v5369_v53 = vcombine.low %v723_v40, %v727_v42  ;;  %v611_v55 = vld [vmem:[%s6036_s3 + $0x8c0] sm:$0xff] }
  0xff   : > { %4007 = vmatprep.subr.bf16.mxu0 %v5066_v54  ;;  %4048 = vmatprep.subr.bf16.mxu1 %v5194_v20  ;;  %v5250_v54 = vcombine.high %v603_v49, %v607_v24  ;;  %v5378_v20 = vcombine.high %v731_v32, %v735_v50  ;;  %v615_v56 = vld [vmem:[%s6036_s3 + $0x8e0] sm:$0xff] }
 0x100   : > { %v739_v57 = vld [vmem:[%s6036_s3 + $0xcc0] sm:$0xff] }
 0x101   : > { %v743_v58 = vld [vmem:[%s6036_s3 + $0xce0] sm:$0xff] }
 0x102   : > { %4008 = vmatpush1.bf16.msra.mxu0 %v5065_v59  ;;  %4049 = vmatpush1.bf16.msra.mxu1 %v5193_v60  ;;  %v5249_v59 = vcombine.low %v603_v49, %v607_v24  ;;  %v5377_v60 = vcombine.low %v731_v32, %v735_v50  ;;  %v619_v63 = vld [vmem:[%s6036_s3 + $0x900] sm:$0xff] }
 0x103   : > { %4009 = vmatprep.subr.bf16.mxu0 %v5074_v61  ;;  %4050 = vmatprep.subr.bf16.mxu1 %v5202_v62  ;;  %v5258_v61 = vcombine.high %v611_v55, %v615_v56  ;;  %v5386_v62 = vcombine.high %v739_v57, %v743_v58  ;;  %v623_v0 = vld [vmem:[%s6036_s3 + $0x920] sm:$0xff] }
 0x104   : > { %v747_v1 = vld [vmem:[%s6036_s3 + $0xd00] sm:$0xff] }
 0x105   : > { %v751_v2 = vld [vmem:[%s6036_s3 + $0xd20] sm:$0xff] }
 0x106   : > { %4010 = vmatpush1.bf16.msra.mxu0 %v5073_v3  ;;  %4051 = vmatpush1.bf16.msra.mxu1 %v5201_v4  ;;  %v5257_v3 = vcombine.low %v611_v55, %v615_v56  ;;  %v5385_v4 = vcombine.low %v739_v57, %v743_v58  ;;  %v627_v7 = vld [vmem:[%s6036_s3 + $0x940] sm:$0xff] }
 0x107   : > { %4011 = vmatprep.subr.bf16.mxu0 %v5082_v5  ;;  %4052 = vmatprep.subr.bf16.mxu1 %v5210_v6  ;;  %v5266_v5 = vcombine.high %v619_v63, %v623_v0  ;;  %v5394_v6 = vcombine.high %v747_v1, %v751_v2  ;;  %v631_v8 = vld [vmem:[%s6036_s3 + $0x960] sm:$0xff] }
 0x108   : > { %v755_v9 = vld [vmem:[%s6036_s3 + $0xd40] sm:$0xff] }
 0x109   : > { %v759_v10 = vld [vmem:[%s6036_s3 + $0xd60] sm:$0xff] }
 0x10a   : > { %4012 = vmatpush1.bf16.msra.mxu0 %v5081_v11  ;;  %4053 = vmatpush1.bf16.msra.mxu1 %v5209_v12  ;;  %v5265_v11 = vcombine.low %v619_v63, %v623_v0  ;;  %v5393_v12 = vcombine.low %v747_v1, %v751_v2  ;;  %v635_v15 = vld [vmem:[%s6036_s3 + $0x980] sm:$0xff] }
 0x10b   : > { %4013 = vmatprep.subr.bf16.mxu0 %v5090_v13  ;;  %4054 = vmatprep.subr.bf16.mxu1 %v5218_v14  ;;  %v5274_v13 = vcombine.high %v627_v7, %v631_v8  ;;  %v5402_v14 = vcombine.high %v755_v9, %v759_v10  ;;  %v639_v16 = vld [vmem:[%s6036_s3 + $0x9a0] sm:$0xff] }
 0x10c   : > { %v763_v17 = vld [vmem:[%s6036_s3 + $0xd80] sm:$0xff] }
 0x10d   : > { %v767_v18 = vld [vmem:[%s6036_s3 + $0xda0] sm:$0xff] }
 0x10e   : > { %4014 = vmatpush1.bf16.msra.mxu0 %v5089_v19  ;;  %4055 = vmatpush1.bf16.msra.mxu1 %v5217_v21  ;;  %v5273_v19 = vcombine.low %v627_v7, %v631_v8  ;;  %v5401_v21 = vcombine.low %v755_v9, %v759_v10  ;;  %v643_v25 = vld [vmem:[%s6036_s3 + $0x9c0] sm:$0xff] }
 0x10f   : > { %4015 = vmatprep.subr.bf16.mxu0 %v5098_v22  ;;  %4056 = vmatprep.subr.bf16.mxu1 %v5226_v23  ;;  %v5282_v22 = vcombine.high %v635_v15, %v639_v16  ;;  %v5410_v23 = vcombine.high %v763_v17, %v767_v18  ;;  %v647_v26 = vld [vmem:[%s6036_s3 + $0x9e0] sm:$0xff] }
 0x110   : > { %v771_v28 = vld [vmem:[%s6036_s3 + $0xdc0] sm:$0xff] }
 0x111   : > { %v775_v29 = vld [vmem:[%s6036_s3 + $0xde0] sm:$0xff] }
 0x112   : > { %4016 = vmatpush1.bf16.msra.mxu0 %v5097_v31  ;;  %4057 = vmatpush1.bf16.msra.mxu1 %v5225_v33  ;;  %v5281_v31 = vcombine.low %v635_v15, %v639_v16  ;;  %v5409_v33 = vcombine.low %v763_v17, %v767_v18  ;;  %v651_v36 = vld [vmem:[%s6036_s3 + $0xa00] sm:$0xff] }
 0x113   : > { %4067 = vmatprep.subr.bf16.mxu0 %v5234_v34  ;;  %4108 = vmatprep.subr.bf16.mxu1 %v5362_v35  ;;  %v5290_v34 = vcombine.high %v643_v25, %v647_v26  ;;  %v5418_v35 = vcombine.high %v771_v28, %v775_v29  ;;  %v655_v37 = vld [vmem:[%s6036_s3 + $0xa20] sm:$0xff] }
 0x114   : > { %v779_v40 = vld [vmem:[%s6036_s3 + $0xe00] sm:$0xff] }
 0x115   : > { %4018 = vmatmul.mubr.bf16.vlgmr.msra.gmra.mrb[8].mxu0 %v6197_v39  ;;  %4059 = vmatmul.mubr.bf16.vlgmr.msra.gmra.mrb[8].mxu1 %v6205_v44  ;;  %v783_v42 = vld [vmem:[%s6036_s3 + $0xe20] sm:$0xff] }
 0x116   : > { %4068 = vmatpush1.bf16.msra.mxu0 %v5233_v45  ;;  %4109 = vmatpush1.bf16.msra.mxu1 %v5361_v47  ;;  %v5289_v45 = vcombine.low %v643_v25, %v647_v26  ;;  %v5417_v47 = vcombine.low %v771_v28, %v775_v29  ;;  %v659_v49 = vld [vmem:[%s6036_s3 + $0xa40] sm:$0xff] }
 0x117   : > { %4069 = vmatprep.subr.bf16.mxu0 %v5242_v48  ;;  %4110 = vmatprep.subr.bf16.mxu1 %v5370_v30  ;;  %v5298_v48 = vcombine.high %v651_v36, %v655_v37  ;;  %v5426_v30 = vcombine.high %v779_v40, %v783_v42  ;;  %v663_v24 = vld [vmem:[%s6036_s3 + $0xa60] sm:$0xff] }
 0x118   : > { %4099 = vmatprep.mubr.bf16.mxu0 %v6213_v27  ;;  %4140 = vmatprep.mubr.bf16.mxu1 %v6220_v51  ;;  %v787_v32 = vld [vmem:[%s6036_s3 + $0xe40] sm:$0xff] }
 0x119   : > { %v791_v50 = vld [vmem:[%s6036_s3 + $0xe60] sm:$0xff] }
 0x11a   : > { %4070 = vmatpush1.bf16.msra.mxu0 %v5241_v52  ;;  %4111 = vmatpush1.bf16.msra.mxu1 %v5369_v53  ;;  %v5297_v52 = vcombine.low %v651_v36, %v655_v37  ;;  %v5425_v53 = vcombine.low %v779_v40, %v783_v42  ;;  %v667_v55 = vld [vmem:[%s6036_s3 + $0xa80] sm:$0xff] }
 0x11b   : > { %4071 = vmatprep.subr.bf16.mxu0 %v5250_v54  ;;  %4112 = vmatprep.subr.bf16.mxu1 %v5378_v20  ;;  %v5306_v54 = vcombine.high %v659_v49, %v663_v24  ;;  %v5434_v20 = vcombine.high %v787_v32, %v791_v50  ;;  %v671_v56 = vld [vmem:[%s6036_s3 + $0xaa0] sm:$0xff] }
 0x11c   : > { %v795_v57 = vld [vmem:[%s6036_s3 + $0xe80] sm:$0xff] }
 0x11d   : > { %v799_v58 = vld [vmem:[%s6036_s3 + $0xea0] sm:$0xff] }
 0x11e   : > { %4072 = vmatpush1.bf16.msra.mxu0 %v5249_v59  ;;  %4113 = vmatpush1.bf16.msra.mxu1 %v5377_v60  ;;  %v5305_v59 = vcombine.low %v659_v49, %v663_v24  ;;  %v5433_v60 = vcombine.low %v787_v32, %v791_v50  ;;  %v675_v63 = vld [vmem:[%s6036_s3 + $0xac0] sm:$0xff]  ;;  %v332_v49 = vld [vmem:[%s6036_s3 + $0x8] sm:$0xff] }
 0x11f   : > { %4073 = vmatprep.subr.bf16.mxu0 %v5258_v61  ;;  %4114 = vmatprep.subr.bf16.mxu1 %v5386_v62  ;;  %v5314_v61 = vcombine.high %v667_v55, %v671_v56  ;;  %v5442_v62 = vcombine.high %v795_v57, %v799_v58  ;;  %v679_v0 = vld [vmem:[%s6036_s3 + $0xae0] sm:$0xff]  ;;  %v336_v24 = vld [vmem:[%s6036_s3 + $0x28] sm:$0xff] }
 0x120   : > { %v803_v1 = vld [vmem:[%s6036_s3 + $0xec0] sm:$0xff]  ;;  %v460_v32 = vld [vmem:[%s6036_s3 + $0x408] sm:$0xff] }
 0x121   : > { %v807_v2 = vld [vmem:[%s6036_s3 + $0xee0] sm:$0xff]  ;;  %v464_v50 = vld [vmem:[%s6036_s3 + $0x428] sm:$0xff] }
 0x122   : > { %4074 = vmatpush1.bf16.msra.mxu0 %v5257_v3  ;;  %4115 = vmatpush1.bf16.msra.mxu1 %v5385_v4  ;;  %v5313_v3 = vcombine.low %v667_v55, %v671_v56  ;;  %v5441_v4 = vcombine.low %v795_v57, %v799_v58  ;;  %v683_v7 = vld [vmem:[%s6036_s3 + $0xb00] sm:$0xff]  ;;  %v340_v55 = vld [vmem:[%s6036_s3 + $0x48] sm:$0xff]  ;;  %v6285_v57 = vcombine.low %v6201_v43, %v6201_v43 }
 0x123   : > { %4075 = vmatprep.subr.bf16.mxu0 %v5266_v5  ;;  %4116 = vmatprep.subr.bf16.mxu1 %v5394_v6  ;;  %v5322_v5 = vcombine.high %v675_v63, %v679_v0  ;;  %v5450_v6 = vcombine.high %v803_v1, %v807_v2  ;;  %v687_v8 = vld [vmem:[%s6036_s3 + $0xb20] sm:$0xff]  ;;  %v344_v56 = vld [vmem:[%s6036_s3 + $0x68] sm:$0xff] }
 0x124   : > { %v811_v9 = vld [vmem:[%s6036_s3 + $0xf00] sm:$0xff]  ;;  %v468_v58 = vld [vmem:[%s6036_s3 + $0x448] sm:$0xff] }
 0x125   : > { %v815_v10 = vld [vmem:[%s6036_s3 + $0xf20] sm:$0xff]  ;;  %v352_v43 = vld [vmem:[%s6036_s3 + $0xa8] sm:$0xff] }
 0x126   : > { %4076 = vmatpush1.bf16.msra.mxu0 %v5265_v11  ;;  %4117 = vmatpush1.bf16.msra.mxu1 %v5393_v12  ;;  %v5321_v11 = vcombine.low %v675_v63, %v679_v0  ;;  %v5449_v12 = vcombine.low %v803_v1, %v807_v2  ;;  %v691_v15 = vld [vmem:[%s6036_s3 + $0xb40] sm:$0xff]  ;;  %v4988_v63 = vcombine.high %v340_v55, %v344_v56  ;;  %v348_v1 = vld [vmem:[%s6036_s3 + $0x88] sm:$0xff] }
 0x127   : > { %4077 = vmatprep.subr.bf16.mxu0 %v5274_v13  ;;  %4118 = vmatprep.subr.bf16.mxu1 %v5402_v14  ;;  %v5330_v13 = vcombine.high %v683_v7, %v687_v8  ;;  %v5458_v14 = vcombine.high %v811_v9, %v815_v10  ;;  %v695_v16 = vld [vmem:[%s6036_s3 + $0xb60] sm:$0xff]  ;;  %v476_v2 = vld [vmem:[%s6036_s3 + $0x488] sm:$0xff] }
 0x128   : > { %v819_v17 = vld [vmem:[%s6036_s3 + $0xf40] sm:$0xff] }
 0x129   : > { %v823_v18 = vld [vmem:[%s6036_s3 + $0xf60] sm:$0xff] }
 0x12a   : > { %4078 = vmatpush1.bf16.msra.mxu0 %v5273_v19  ;;  %4119 = vmatpush1.bf16.msra.mxu1 %v5401_v21  ;;  %v5329_v19 = vcombine.low %v683_v7, %v687_v8  ;;  %v5457_v21 = vcombine.low %v811_v9, %v815_v10  ;;  %v699_v25 = vld [vmem:[%s6036_s3 + $0xb80] sm:$0xff]  ;;  %v356_v7 = vld [vmem:[%s6036_s3 + $0xc8] sm:$0xff] }
 0x12b   : > { %4079 = vmatprep.subr.bf16.mxu0 %v5282_v22  ;;  %4120 = vmatprep.subr.bf16.mxu1 %v5410_v23  ;;  %v5338_v22 = vcombine.high %v691_v15, %v695_v16  ;;  %v5466_v23 = vcombine.high %v819_v17, %v823_v18  ;;  %v703_v26 = vld [vmem:[%s6036_s3 + $0xba0] sm:$0xff]  ;;  %v360_v8 = vld [vmem:[%s6036_s3 + $0xe8] sm:$0xff] }
 0x12c   : > { %v827_v28 = vld [vmem:[%s6036_s3 + $0xf80] sm:$0xff]  ;;  %v484_v9 = vld [vmem:[%s6036_s3 + $0x4c8] sm:$0xff] }
 0x12d   : > { %v831_v29 = vld [vmem:[%s6036_s3 + $0xfa0] sm:$0xff]  ;;  %v488_v10 = vld [vmem:[%s6036_s3 + $0x4e8] sm:$0xff] }
 0x12e   : > { %4080 = vmatpush1.bf16.msra.mxu0 %v5281_v31  ;;  %4121 = vmatpush1.bf16.msra.mxu1 %v5409_v33  ;;  %v5337_v31 = vcombine.low %v691_v15, %v695_v16  ;;  %v5465_v33 = vcombine.low %v819_v17, %v823_v18  ;;  %v707_v36 = vld [vmem:[%s6036_s3 + $0xbc0] sm:$0xff]  ;;  %v364_v15 = vld [vmem:[%s6036_s3 + $0x108] sm:$0xff] }
 0x12f   : > { %4081 = vmatprep.subr.bf16.mxu0 %v5290_v34  ;;  %4122 = vmatprep.subr.bf16.mxu1 %v5418_v35  ;;  %v5346_v34 = vcombine.high %v699_v25, %v703_v26  ;;  %v5474_v35 = vcombine.high %v827_v28, %v831_v29  ;;  %v711_v37 = vld [vmem:[%s6036_s3 + $0xbe0] sm:$0xff]  ;;  %v368_v16 = vld [vmem:[%s6036_s3 + $0x128] sm:$0xff] }
 0x130   : > { %v835_v40 = vld [vmem:[%s6036_s3 + $0xfc0] sm:$0xff]  ;;  %v492_v17 = vld [vmem:[%s6036_s3 + $0x508] sm:$0xff] }
 0x131   : > { %v839_v42 = vld [vmem:[%s6036_s3 + $0xfe0] sm:$0xff]  ;;  %v496_v18 = vld [vmem:[%s6036_s3 + $0x528] sm:$0xff] }
 0x132   : > { %4082 = vmatpush1.bf16.msra.mxu0 %v5289_v45  ;;  %4123 = vmatpush1.bf16.msra.mxu1 %v5417_v47  ;;  %v5345_v45 = vcombine.low %v699_v25, %v703_v26  ;;  %v5473_v47 = vcombine.low %v827_v28, %v831_v29  ;;  %v372_v25 = vld [vmem:[%s6036_s3 + $0x148] sm:$0xff] }
 0x133   : > { %4083 = vmatprep.subr.bf16.mxu0 %v5298_v48  ;;  %4124 = vmatprep.subr.bf16.mxu1 %v5426_v30  ;;  %v5354_v48 = vcombine.high %v707_v36, %v711_v37  ;;  %v5482_v30 = vcombine.high %v835_v40, %v839_v42  ;;  %v376_v26 = vld [vmem:[%s6036_s3 + $0x168] sm:$0xff] }
 0x134   : > { %v500_v28 = vld [vmem:[%s6036_s3 + $0x548] sm:$0xff] }
 0x135   : > { %v504_v29 = vld [vmem:[%s6036_s3 + $0x568] sm:$0xff] }
 0x136   : > { %4084 = vmatpush1.bf16.msra.mxu0 %v5297_v52  ;;  %4125 = vmatpush1.bf16.msra.mxu1 %v5425_v53  ;;  %v5353_v52 = vcombine.low %v707_v36, %v711_v37  ;;  %v5481_v53 = vcombine.low %v835_v40, %v839_v42  ;;  %v380_v36 = vld [vmem:[%s6036_s3 + $0x188] sm:$0xff] }
 0x137   : > { %4085 = vmatprep.subr.bf16.mxu0 %v5306_v54  ;;  %4126 = vmatprep.subr.bf16.mxu1 %v5434_v20  ;;  %v4980_v54 = vcombine.high %v332_v49, %v336_v24  ;;  %v5108_v20 = vcombine.high %v460_v32, %v464_v50  ;;  %v384_v37 = vld [vmem:[%s6036_s3 + $0x1a8] sm:$0xff] }
 0x138   : > { %v508_v40 = vld [vmem:[%s6036_s3 + $0x588] sm:$0xff] }
 0x139   : > { %v512_v42 = vld [vmem:[%s6036_s3 + $0x5a8] sm:$0xff] }
 0x13a   : > { %4086 = vmatpush1.bf16.msra.mxu0 %v5305_v59  ;;  %4127 = vmatpush1.bf16.msra.mxu1 %v5433_v60  ;;  %v472_v59 = vld [vmem:[%s6036_s3 + $0x468] sm:$0xff]  ;;  %v6291_v60 = vcombine.low %v6207_v46, %v6207_v46  ;;  %v4987_v46 = vcombine.low %v340_v55, %v344_v56 }
 0x13b   : > { %4087 = vmatprep.subr.bf16.mxu0 %v5314_v61  ;;  %4128 = vmatprep.subr.bf16.mxu1 %v5442_v62  ;;  %v4979_v61 = vcombine.low %v332_v49, %v336_v24  ;;  %v5107_v62 = vcombine.low %v460_v32, %v464_v50  ;;  %v5116_v0 = vcombine.high %v468_v58, %v472_v59  ;;  %v388_v49 = vld [vmem:[%s6036_s3 + $0x1c8] sm:$0xff] }
 0x13c   : > { %v392_v24 = vld [vmem:[%s6036_s3 + $0x1e8] sm:$0xff] }
 0x13d   : > { %v516_v32 = vld [vmem:[%s6036_s3 + $0x5c8] sm:$0xff] }
 0x13e   : > { %4088 = vmatpush1.bf16.msra.mxu0 %v5313_v3  ;;  %4129 = vmatpush1.bf16.msra.mxu1 %v5441_v4  ;;  %v480_v3 = vld [vmem:[%s6036_s3 + $0x4a8] sm:$0xff]  ;;  %v5115_v4 = vcombine.low %v468_v58, %v472_v59 }
 0x13f   : > { %4089 = vmatprep.subr.bf16.mxu0 %v5322_v5  ;;  %4130 = vmatprep.subr.bf16.mxu1 %v5450_v6  ;;  %v4996_v5 = vcombine.high %v348_v1, %v352_v43  ;;  %v5124_v6 = vcombine.high %v476_v2, %v480_v3  ;;  %v520_v50 = vld [vmem:[%s6036_s3 + $0x5e8] sm:$0xff] }
 0x140   : > { %v396_v55 = vld [vmem:[%s6036_s3 + $0x208] sm:$0xff] }
 0x141   : > { %v400_v56 = vld [vmem:[%s6036_s3 + $0x228] sm:$0xff] }
 0x142   : > { %4090 = vmatpush1.bf16.msra.mxu0 %v5321_v11  ;;  %4131 = vmatpush1.bf16.msra.mxu1 %v5449_v12  ;;  %v4995_v11 = vcombine.low %v348_v1, %v352_v43  ;;  %v5123_v12 = vcombine.low %v476_v2, %v480_v3  ;;  %v524_v58 = vld [vmem:[%s6036_s3 + $0x608] sm:$0xff] }
 0x143   : > { %4091 = vmatprep.subr.bf16.mxu0 %v5330_v13  ;;  %4132 = vmatprep.subr.bf16.mxu1 %v5458_v14  ;;  %v5004_v13 = vcombine.high %v356_v7, %v360_v8  ;;  %v5132_v14 = vcombine.high %v484_v9, %v488_v10  ;;  %v528_v59 = vld [vmem:[%s6036_s3 + $0x628] sm:$0xff] }
 0x144   : > { %v404_v1 = vld [vmem:[%s6036_s3 + $0x248] sm:$0xff] }
 0x145   : > { %v408_v43 = vld [vmem:[%s6036_s3 + $0x268] sm:$0xff] }
 0x146   : > { %4092 = vmatpush1.bf16.msra.mxu0 %v5329_v19  ;;  %4133 = vmatpush1.bf16.msra.mxu1 %v5457_v21  ;;  %v5003_v19 = vcombine.low %v356_v7, %v360_v8  ;;  %v5131_v21 = vcombine.low %v484_v9, %v488_v10  ;;  %v532_v2 = vld [vmem:[%s6036_s3 + $0x648] sm:$0xff] }
 0x147   : > { %4093 = vmatprep.subr.bf16.mxu0 %v5338_v22  ;;  %4134 = vmatprep.subr.bf16.mxu1 %v5466_v23  ;;  %v5012_v22 = vcombine.high %v364_v15, %v368_v16  ;;  %v5140_v23 = vcombine.high %v492_v17, %v496_v18  ;;  %v536_v3 = vld [vmem:[%s6036_s3 + $0x668] sm:$0xff] }
 0x148   : > { %v412_v7 = vld [vmem:[%s6036_s3 + $0x288] sm:$0xff] }
 0x149   : > { %v416_v8 = vld [vmem:[%s6036_s3 + $0x2a8] sm:$0xff] }
 0x14a   : > { %4094 = vmatpush1.bf16.msra.mxu0 %v5337_v31  ;;  %4135 = vmatpush1.bf16.msra.mxu1 %v5465_v33  ;;  %v5011_v31 = vcombine.low %v364_v15, %v368_v16  ;;  %v5139_v33 = vcombine.low %v492_v17, %v496_v18  ;;  %v540_v9 = vld [vmem:[%s6036_s3 + $0x688] sm:$0xff] }
 0x14b   : > { %4095 = vmatprep.subr.bf16.mxu0 %v5346_v34  ;;  %4136 = vmatprep.subr.bf16.mxu1 %v5474_v35  ;;  %v5020_v34 = vcombine.high %v372_v25, %v376_v26  ;;  %v5148_v35 = vcombine.high %v500_v28, %v504_v29  ;;  %v544_v10 = vld [vmem:[%s6036_s3 + $0x6a8] sm:$0xff] }
 0x14c   : > { %v420_v15 = vld [vmem:[%s6036_s3 + $0x2c8] sm:$0xff] }
 0x14d   : > { %v424_v16 = vld [vmem:[%s6036_s3 + $0x2e8] sm:$0xff] }
 0x14e   : > { %4096 = vmatpush1.bf16.msra.mxu0 %v5345_v45  ;;  %4137 = vmatpush1.bf16.msra.mxu1 %v5473_v47  ;;  %v5019_v45 = vcombine.low %v372_v25, %v376_v26  ;;  %v5147_v47 = vcombine.low %v500_v28, %v504_v29  ;;  %v548_v17 = vld [vmem:[%s6036_s3 + $0x6c8] sm:$0xff] }
 0x14f   : > { %4097 = vmatprep.subr.bf16.mxu0 %v5354_v48  ;;  %4138 = vmatprep.subr.bf16.mxu1 %v5482_v30  ;;  %v5028_v48 = vcombine.high %v380_v36, %v384_v37  ;;  %v5156_v30 = vcombine.high %v508_v40, %v512_v42  ;;  %v552_v18 = vld [vmem:[%s6036_s3 + $0x6e8] sm:$0xff] }
 0x150   : > { %v428_v25 = vld [vmem:[%s6036_s3 + $0x308] sm:$0xff] }
 0x151   : > { %v432_v26 = vld [vmem:[%s6036_s3 + $0x328] sm:$0xff] }
 0x152   : > { %4098 = vmatpush1.bf16.msra.mxu0 %v5353_v52  ;;  %4139 = vmatpush1.bf16.msra.mxu1 %v5481_v53  ;;  %v5027_v52 = vcombine.low %v380_v36, %v384_v37  ;;  %v5155_v53 = vcombine.low %v508_v40, %v512_v42  ;;  %v556_v28 = vld [vmem:[%s6036_s3 + $0x708] sm:$0xff] }
 0x153   : > { %4149 = vmatprep.subr.bf16.mxu0 %v4980_v54  ;;  %4190 = vmatprep.subr.bf16.mxu1 %v5108_v20  ;;  %v5036_v54 = vcombine.high %v388_v49, %v392_v24  ;;  %v5164_v20 = vcombine.high %v516_v32, %v520_v50  ;;  %v560_v29 = vld [vmem:[%s6036_s3 + $0x728] sm:$0xff] }
 0x154   : > { %v436_v36 = vld [vmem:[%s6036_s3 + $0x348] sm:$0xff] }
 0x155   : > { %4100 = vmatmul.mubr.bf16.vlgmr.msra.gmra.mrb[12].mxu0 %v6285_v57  ;;  %4141 = vmatmul.mubr.bf16.vlgmr.msra.gmra.mrb[12].mxu1 %v6291_v60  ;;  %v440_v37 = vld [vmem:[%s6036_s3 + $0x368] sm:$0xff] }
 0x156   : > { %4150 = vmatpush1.bf16.msra.mxu0 %v4979_v61  ;;  %4191 = vmatpush1.bf16.msra.mxu1 %v5107_v62  ;;  %v5035_v61 = vcombine.low %v388_v49, %v392_v24  ;;  %v5163_v62 = vcombine.low %v516_v32, %v520_v50  ;;  %v564_v40 = vld [vmem:[%s6036_s3 + $0x748] sm:$0xff] }
 0x157   : > { %4151 = vmatprep.subr.bf16.mxu0 %v4988_v63  ;;  %4192 = vmatprep.subr.bf16.mxu1 %v5116_v0  ;;  %v5044_v63 = vcombine.high %v396_v55, %v400_v56  ;;  %v5172_v0 = vcombine.high %v524_v58, %v528_v59  ;;  %v568_v42 = vld [vmem:[%s6036_s3 + $0x768] sm:$0xff] }
 0x158   : > { %4181 = vmatprep.mubr.bf16.mxu0 %v6121_v38  ;;  %4222 = vmatprep.mubr.bf16.mxu1 %v6130_v41  ;;  %v444_v49 = vld [vmem:[%s6036_s3 + $0x388] sm:$0xff] }
 0x159   : > { %v448_v24 = vld [vmem:[%s6036_s3 + $0x3a8] sm:$0xff] }
 0x15a   : > { %4152 = vmatpush1.bf16.msra.mxu0 %v4987_v46  ;;  %4193 = vmatpush1.bf16.msra.mxu1 %v5115_v4  ;;  %v5043_v46 = vcombine.low %v396_v55, %v400_v56  ;;  %v5171_v4 = vcombine.low %v524_v58, %v528_v59  ;;  %v572_v32 = vld [vmem:[%s6036_s3 + $0x788] sm:$0xff] }
 0x15b   : > { %4153 = vmatprep.subr.bf16.mxu0 %v4996_v5  ;;  %4194 = vmatprep.subr.bf16.mxu1 %v5124_v6  ;;  %v5052_v5 = vcombine.high %v404_v1, %v408_v43  ;;  %v5180_v6 = vcombine.high %v532_v2, %v536_v3  ;;  %v576_v50 = vld [vmem:[%s6036_s3 + $0x7a8] sm:$0xff] }
 0x15c   : > { %v5220_v55 = vcombine.high %v572_v32, %v576_v50  ;;  %v452_v56 = vld [vmem:[%s6036_s3 + $0x3c8] sm:$0xff] }
 0x15d   : > { %v456_v58 = vld [vmem:[%s6036_s3 + $0x3e8] sm:$0xff] }
 0x15e   : > { %4154 = vmatpush1.bf16.msra.mxu0 %v4995_v11  ;;  %4195 = vmatpush1.bf16.msra.mxu1 %v5123_v12  ;;  %v5051_v11 = vcombine.low %v404_v1, %v408_v43  ;;  %v5179_v12 = vcombine.low %v532_v2, %v536_v3  ;;  %v5091_v43 = vcombine.low %v444_v49, %v448_v24 }
 0x15f   : > { %4155 = vmatprep.subr.bf16.mxu0 %v5004_v13  ;;  %4196 = vmatprep.subr.bf16.mxu1 %v5132_v14  ;;  %v5060_v13 = vcombine.high %v412_v7, %v416_v8  ;;  %v5188_v14 = vcombine.high %v540_v9, %v544_v10 }
 0x162   : > { %4156 = vmatpush1.bf16.msra.mxu0 %v5003_v19  ;;  %4197 = vmatpush1.bf16.msra.mxu1 %v5131_v21  ;;  %v5059_v19 = vcombine.low %v412_v7, %v416_v8  ;;  %v5187_v21 = vcombine.low %v540_v9, %v544_v10  ;;  %v588_v7 = vld [vmem:[%s6036_s3 + $0x808] sm:$0xff] }
 0x163   : > { %4157 = vmatprep.subr.bf16.mxu0 %v5012_v22  ;;  %4198 = vmatprep.subr.bf16.mxu1 %v5140_v23  ;;  %v5068_v22 = vcombine.high %v420_v15, %v424_v16  ;;  %v5196_v23 = vcombine.high %v548_v17, %v552_v18  ;;  %v592_v8 = vld [vmem:[%s6036_s3 + $0x828] sm:$0xff] }
 0x164   : > { %v716_v9 = vld [vmem:[%s6036_s3 + $0xc08] sm:$0xff] }
 0x165   : > { %v720_v10 = vld [vmem:[%s6036_s3 + $0xc28] sm:$0xff] }
 0x166   : > { %4158 = vmatpush1.bf16.msra.mxu0 %v5011_v31  ;;  %4199 = vmatpush1.bf16.msra.mxu1 %v5139_v33  ;;  %v5067_v31 = vcombine.low %v420_v15, %v424_v16  ;;  %v5195_v33 = vcombine.low %v548_v17, %v552_v18  ;;  %v596_v15 = vld [vmem:[%s6036_s3 + $0x848] sm:$0xff] }
 0x167   : > { %4159 = vmatprep.subr.bf16.mxu0 %v5020_v34  ;;  %4200 = vmatprep.subr.bf16.mxu1 %v5148_v35  ;;  %v5076_v34 = vcombine.high %v428_v25, %v432_v26  ;;  %v5204_v35 = vcombine.high %v556_v28, %v560_v29  ;;  %v600_v16 = vld [vmem:[%s6036_s3 + $0x868] sm:$0xff] }
 0x168   : > { %v724_v17 = vld [vmem:[%s6036_s3 + $0xc48] sm:$0xff] }
 0x169   : > { %v728_v18 = vld [vmem:[%s6036_s3 + $0xc68] sm:$0xff] }
 0x16a   : > { %4160 = vmatpush1.bf16.msra.mxu0 %v5019_v45  ;;  %4201 = vmatpush1.bf16.msra.mxu1 %v5147_v47  ;;  %v5075_v45 = vcombine.low %v428_v25, %v432_v26  ;;  %v5203_v47 = vcombine.low %v556_v28, %v560_v29  ;;  %v604_v25 = vld [vmem:[%s6036_s3 + $0x888] sm:$0xff] }
 0x16b   : > { %4161 = vmatprep.subr.bf16.mxu0 %v5028_v48  ;;  %4202 = vmatprep.subr.bf16.mxu1 %v5156_v30  ;;  %v5084_v48 = vcombine.high %v436_v36, %v440_v37  ;;  %v5212_v30 = vcombine.high %v564_v40, %v568_v42  ;;  %v608_v26 = vld [vmem:[%s6036_s3 + $0x8a8] sm:$0xff] }
 0x16c   : > { %v732_v28 = vld [vmem:[%s6036_s3 + $0xc88] sm:$0xff] }
 0x16d   : > { %v736_v29 = vld [vmem:[%s6036_s3 + $0xca8] sm:$0xff] }
 0x16e   : > { %4162 = vmatpush1.bf16.msra.mxu0 %v5027_v52  ;;  %4203 = vmatpush1.bf16.msra.mxu1 %v5155_v53  ;;  %v5083_v52 = vcombine.low %v436_v36, %v440_v37  ;;  %v5211_v53 = vcombine.low %v564_v40, %v568_v42  ;;  %v612_v36 = vld [vmem:[%s6036_s3 + $0x8c8] sm:$0xff] }
 0x16f   : > { %4163 = vmatprep.subr.bf16.mxu0 %v5036_v54  ;;  %4204 = vmatprep.subr.bf16.mxu1 %v5164_v20  ;;  %v5092_v54 = vcombine.high %v444_v49, %v448_v24  ;;  %v616_v37 = vld [vmem:[%s6036_s3 + $0x8e8] sm:$0xff] }
 0x170   : > { %v740_v40 = vld [vmem:[%s6036_s3 + $0xcc8] sm:$0xff] }
 0x171   : > { %v744_v42 = vld [vmem:[%s6036_s3 + $0xce8] sm:$0xff] }
 0x172   : > { %4164 = vmatpush1.bf16.msra.mxu0 %v5035_v61  ;;  %4205 = vmatpush1.bf16.msra.mxu1 %v5163_v62  ;;  %v580_v62 = vld [vmem:[%s6036_s3 + $0x7c8] sm:$0xff] }
 0x173   : > { %4165 = vmatprep.subr.bf16.mxu0 %v5044_v63  ;;  %4206 = vmatprep.subr.bf16.mxu1 %v5172_v0  ;;  %v584_v63 = vld [vmem:[%s6036_s3 + $0x7e8] sm:$0xff] }
 0x174   : > { %v620_v49 = vld [vmem:[%s6036_s3 + $0x908] sm:$0xff] }
 0x175   : > { %v624_v24 = vld [vmem:[%s6036_s3 + $0x928] sm:$0xff] }
 0x176   : > { %4166 = vmatpush1.bf16.msra.mxu0 %v5043_v46  ;;  %4207 = vmatpush1.bf16.msra.mxu1 %v5171_v4  ;;  %v5219_v46 = vcombine.low %v572_v32, %v576_v50  ;;  %v5100_v4 = vcombine.high %v452_v56, %v456_v58  ;;  %v748_v32 = vld [vmem:[%s6036_s3 + $0xd08] sm:$0xff] }
 0x177   : > { %4167 = vmatprep.subr.bf16.mxu0 %v5052_v5  ;;  %4208 = vmatprep.subr.bf16.mxu1 %v5180_v6  ;;  %v5228_v6 = vcombine.high %v580_v62, %v584_v63  ;;  %v752_v50 = vld [vmem:[%s6036_s3 + $0xd28] sm:$0xff] }
 0x17a   : > { %4168 = vmatpush1.bf16.msra.mxu0 %v5051_v11  ;;  %4209 = vmatpush1.bf16.msra.mxu1 %v5179_v12  ;;  %v5099_v11 = vcombine.low %v452_v56, %v456_v58  ;;  %v5227_v12 = vcombine.low %v580_v62, %v584_v63  ;;  %v628_v56 = vld [vmem:[%s6036_s3 + $0x948] sm:$0xff] }
 0x17b   : > { %4169 = vmatprep.subr.bf16.mxu0 %v5060_v13  ;;  %4210 = vmatprep.subr.bf16.mxu1 %v5188_v14  ;;  %v5236_v13 = vcombine.high %v588_v7, %v592_v8  ;;  %v5364_v14 = vcombine.high %v716_v9, %v720_v10  ;;  %v632_v58 = vld [vmem:[%s6036_s3 + $0x968] sm:$0xff] }
 0x17c   : > { %v756_v62 = vld [vmem:[%s6036_s3 + $0xd48] sm:$0xff] }
 0x17d   : > { %v760_v63 = vld [vmem:[%s6036_s3 + $0xd68] sm:$0xff] }
 0x17e   : > { %4170 = vmatpush1.bf16.msra.mxu0 %v5059_v19  ;;  %4211 = vmatpush1.bf16.msra.mxu1 %v5187_v21  ;;  %v5235_v19 = vcombine.low %v588_v7, %v592_v8  ;;  %v5363_v21 = vcombine.low %v716_v9, %v720_v10  ;;  %v5275_v7 = vcombine.low %v628_v56, %v632_v58 }
 0x17f   : > { %4171 = vmatprep.subr.bf16.mxu0 %v5068_v22  ;;  %4212 = vmatprep.subr.bf16.mxu1 %v5196_v23  ;;  %v5244_v22 = vcombine.high %v596_v15, %v600_v16  ;;  %v5372_v23 = vcombine.high %v724_v17, %v728_v18  ;;  %v5403_v8 = vcombine.low %v756_v62, %v760_v63 }
 0x182   : > { %4172 = vmatpush1.bf16.msra.mxu0 %v5067_v31  ;;  %4213 = vmatpush1.bf16.msra.mxu1 %v5195_v33  ;;  %v5243_v31 = vcombine.low %v596_v15, %v600_v16  ;;  %v5371_v33 = vcombine.low %v724_v17, %v728_v18  ;;  %v772_v16 = vld [vmem:[%s6036_s3 + $0xdc8] sm:$0xff] }
 0x183   : > { %4173 = vmatprep.subr.bf16.mxu0 %v5076_v34  ;;  %4214 = vmatprep.subr.bf16.mxu1 %v5204_v35  ;;  %v5252_v34 = vcombine.high %v604_v25, %v608_v26  ;;  %v5380_v35 = vcombine.high %v732_v28, %v736_v29  ;;  %v776_v17 = vld [vmem:[%s6036_s3 + $0xde8] sm:$0xff] }
 0x186   : > { %4174 = vmatpush1.bf16.msra.mxu0 %v5075_v45  ;;  %4215 = vmatpush1.bf16.msra.mxu1 %v5203_v47  ;;  %v5251_v45 = vcombine.low %v604_v25, %v608_v26  ;;  %v5379_v47 = vcombine.low %v732_v28, %v736_v29  ;;  %v5420_v29 = vcombine.high %v772_v16, %v776_v17 }
 0x187   : > { %4175 = vmatprep.subr.bf16.mxu0 %v5084_v48  ;;  %4216 = vmatprep.subr.bf16.mxu1 %v5212_v30  ;;  %v5260_v48 = vcombine.high %v612_v36, %v616_v37  ;;  %v5388_v30 = vcombine.high %v740_v40, %v744_v42 }
 0x188   : > { %v6349_v20 = vpop.f32.mrb[0].mxu0  ;;  %v6353_v59 = vpop.f32.mrb[0].mxu1 }
 0x189   : > { %v6355_v61 = vpop.f32.mrb[1].mxu0  ;;  %v6359_v0 = vpop.f32.mrb[1].mxu1 }
 0x18a   : > { %v1271_v1 = vpop.f32.mrb[2].mxu0  ;;  %4176 = vmatpush1.bf16.msra.mxu0 %v5083_v52  ;;  %v1312_v2 = vpop.f32.mrb[2].mxu1  ;;  %4217 = vmatpush1.bf16.msra.mxu1 %v5211_v53  ;;  %v5259_v52 = vcombine.low %v612_v36, %v616_v37  ;;  %v5387_v53 = vcombine.low %v740_v40, %v744_v42  ;;  %v5419_v37 = vcombine.low %v772_v16, %v776_v17 }
 0x18b   : > { %v1272_v3 = vpop.f32.mrb[3].mxu0  ;;  %4177 = vmatprep.subr.bf16.mxu0 %v5092_v54  ;;  %v1313_v5 = vpop.f32.mrb[3].mxu1  ;;  %4218 = vmatprep.subr.bf16.mxu1 %v5220_v55  ;;  %v5268_v54 = vcombine.high %v620_v49, %v624_v24  ;;  %v5396_v55 = vcombine.high %v748_v32, %v752_v50  ;;  %v5267_v1 = vcombine.low %v620_v49, %v624_v24 }
 0x18c   : > { %v5276_v2 = vcombine.high %v628_v56, %v632_v58  ;;  %v5404_v3 = vcombine.high %v756_v62, %v760_v63  ;;  %v764_v5 = vld [vmem:[%s6036_s3 + $0xd88] sm:$0xff] }
 0x18e   : > { %4178 = vmatpush1.bf16.msra.mxu0 %v5091_v43  ;;  %4219 = vmatpush1.bf16.msra.mxu1 %v5219_v46  ;;  %v5395_v43 = vcombine.low %v748_v32, %v752_v50  ;;  %v636_v46 = vld [vmem:[%s6036_s3 + $0x988] sm:$0xff] }
 0x18f   : > { %4179 = vmatprep.subr.bf16.mxu0 %v5100_v4  ;;  %4220 = vmatprep.subr.bf16.mxu1 %v5228_v6  ;;  %v640_v4 = vld [vmem:[%s6036_s3 + $0x9a8] sm:$0xff] }
 0x190   : > { %v768_v6 = vld [vmem:[%s6036_s3 + $0xda8] sm:$0xff]  ;;  %v5284_v9 = vcombine.high %v636_v46, %v640_v4 }
 0x191   : > { %v5411_v25 = vcombine.low %v764_v5, %v768_v6 }
 0x192   : > { %4180 = vmatpush1.bf16.msra.mxu0 %v5099_v11  ;;  %4221 = vmatpush1.bf16.msra.mxu1 %v5227_v12  ;;  %v5412_v11 = vcombine.high %v764_v5, %v768_v6  ;;  %v644_v12 = vld [vmem:[%s6036_s3 + $0x9c8] sm:$0xff] }
 0x193   : > { %4231 = vmatprep.subr.bf16.mxu0 %v5236_v13  ;;  %4272 = vmatprep.subr.bf16.mxu1 %v5364_v14  ;;  %v648_v13 = vld [vmem:[%s6036_s3 + $0x9e8] sm:$0xff] }
 0x194   : > { %v5292_v26 = vcombine.high %v644_v12, %v648_v13  ;;  %v5291_v36 = vcombine.low %v644_v12, %v648_v13 }
 0x195   : > { %4182 = vmatmul.mubr.bf16.vlgmr.msra.gmra.mrb[16].mxu0 %v6197_v39  ;;  %4223 = vmatmul.mubr.bf16.vlgmr.msra.gmra.mrb[16].mxu1 %v6205_v44 }
 0x196   : > { %4232 = vmatpush1.bf16.msra.mxu0 %v5235_v19  ;;  %4273 = vmatpush1.bf16.msra.mxu1 %v5363_v21  ;;  %v5283_v21 = vcombine.low %v636_v46, %v640_v4 }
 0x197   : > { %4233 = vmatprep.subr.bf16.mxu0 %v5244_v22  ;;  %4274 = vmatprep.subr.bf16.mxu1 %v5372_v23 }
 0x198   : > { %4263 = vmatprep.mubr.bf16.mxu0 %v6213_v27  ;;  %4304 = vmatprep.mubr.bf16.mxu1 %v6220_v51 }
 0x19a   : > { %4234 = vmatpush1.bf16.msra.mxu0 %v5243_v31  ;;  %4275 = vmatpush1.bf16.msra.mxu1 %v5371_v33  ;;  %v652_v31 = vld [vmem:[%s6036_s3 + $0xa08] sm:$0xff] }
 0x19b   : > { %4235 = vmatprep.subr.bf16.mxu0 %v5252_v34  ;;  %4276 = vmatprep.subr.bf16.mxu1 %v5380_v35  ;;  %v656_v33 = vld [vmem:[%s6036_s3 + $0xa28] sm:$0xff] }
 0x19c   : > { %v780_v34 = vld [vmem:[%s6036_s3 + $0xe08] sm:$0xff]  ;;  %v5300_v40 = vcombine.high %v652_v31, %v656_v33  ;;  %v5299_v49 = vcombine.low %v652_v31, %v656_v33 }
 0x19d   : > { %v784_v35 = vld [vmem:[%s6036_s3 + $0xe28] sm:$0xff] }
 0x19e   : > { %4236 = vmatpush1.bf16.msra.mxu0 %v5251_v45  ;;  %4277 = vmatpush1.bf16.msra.mxu1 %v5379_v47  ;;  %v5428_v42 = vcombine.high %v780_v34, %v784_v35  ;;  %v660_v45 = vld [vmem:[%s6036_s3 + $0xa48] sm:$0xff]  ;;  %v5427_v24 = vcombine.low %v780_v34, %v784_v35 }
 0x19f   : > { %4237 = vmatprep.subr.bf16.mxu0 %v5260_v48  ;;  %4278 = vmatprep.subr.bf16.mxu1 %v5388_v30  ;;  %v664_v47 = vld [vmem:[%s6036_s3 + $0xa68] sm:$0xff] }
 0x1a0   : > { %v788_v48 = vld [vmem:[%s6036_s3 + $0xe48] sm:$0xff]  ;;  %v5308_v32 = vcombine.high %v660_v45, %v664_v47  ;;  %v5307_v56 = vcombine.low %v660_v45, %v664_v47 }
 0x1a1   : > { %v792_v30 = vld [vmem:[%s6036_s3 + $0xe68] sm:$0xff] }
 0x1a2   : > { %4238 = vmatpush1.bf16.msra.mxu0 %v5259_v52  ;;  %4279 = vmatpush1.bf16.msra.mxu1 %v5387_v53  ;;  %v5436_v50 = vcombine.high %v788_v48, %v792_v30  ;;  %v668_v52 = vld [vmem:[%s6036_s3 + $0xa88] sm:$0xff]  ;;  %v5435_v58 = vcombine.low %v788_v48, %v792_v30 }
 0x1a3   : > { %4239 = vmatprep.subr.bf16.mxu0 %v5268_v54  ;;  %4280 = vmatprep.subr.bf16.mxu1 %v5396_v55  ;;  %v672_v53 = vld [vmem:[%s6036_s3 + $0xaa8] sm:$0xff] }
 0x1a4   : > { %v796_v54 = vld [vmem:[%s6036_s3 + $0xe88] sm:$0xff]  ;;  %v5316_v62 = vcombine.high %v668_v52, %v672_v53  ;;  %v5315_v46 = vcombine.low %v668_v52, %v672_v53  ;;  %v333_v52 = vld [vmem:[%s6036_s3 + $0x10] sm:$0xff] }
 0x1a5   : > { %v800_v55 = vld [vmem:[%s6036_s3 + $0xea8] sm:$0xff]  ;;  %v337_v53 = vld [vmem:[%s6036_s3 + $0x30] sm:$0xff] }
 0x1a6   : > { %4240 = vmatpush1.bf16.msra.mxu0 %v5267_v1  ;;  %4281 = vmatpush1.bf16.msra.mxu1 %v5395_v43  ;;  %v5444_v63 = vcombine.high %v796_v54, %v800_v55  ;;  %v676_v1 = vld [vmem:[%s6036_s3 + $0xac8] sm:$0xff]  ;;  %v5443_v4 = vcombine.low %v796_v54, %v800_v55  ;;  %v461_v54 = vld [vmem:[%s6036_s3 + $0x410] sm:$0xff] }
 0x1a7   : > { %4241 = vmatprep.subr.bf16.mxu0 %v5276_v2  ;;  %4282 = vmatprep.subr.bf16.mxu1 %v5404_v3  ;;  %v680_v43 = vld [vmem:[%s6036_s3 + $0xae8] sm:$0xff]  ;;  %v465_v55 = vld [vmem:[%s6036_s3 + $0x430] sm:$0xff] }
 0x1a8   : > { %v6393_v10 = vpop.f32.mrb[4].mxu0  ;;  %v6397_v14 = vpop.f32.mrb[4].mxu1  ;;  %v804_v2 = vld [vmem:[%s6036_s3 + $0xec8] sm:$0xff]  ;;  %v5324_v5 = vcombine.high %v676_v1, %v680_v43  ;;  %v5323_v12 = vcombine.low %v676_v1, %v680_v43  ;;  %v341_v1 = vld [vmem:[%s6036_s3 + $0x50] sm:$0xff] }
 0x1a9   : > { %v6399_v15 = vpop.f32.mrb[5].mxu0  ;;  %v6403_v18 = vpop.f32.mrb[5].mxu1  ;;  %v808_v3 = vld [vmem:[%s6036_s3 + $0xee8] sm:$0xff]  ;;  %v345_v43 = vld [vmem:[%s6036_s3 + $0x70] sm:$0xff] }
 0x1aa   : > { %v1353_v19 = vpop.f32.mrb[6].mxu0  ;;  %4242 = vmatpush1.bf16.msra.mxu0 %v5275_v7  ;;  %v1394_v22 = vpop.f32.mrb[6].mxu1  ;;  %4283 = vmatpush1.bf16.msra.mxu1 %v5403_v8  ;;  %v5452_v6 = vcombine.high %v804_v2, %v808_v3  ;;  %v684_v7 = vld [vmem:[%s6036_s3 + $0xb08] sm:$0xff]  ;;  %v5451_v13 = vcombine.low %v804_v2, %v808_v3  ;;  %v469_v2 = vld [vmem:[%s6036_s3 + $0x450] sm:$0xff] }
 0x1ab   : > { %v1354_v23 = vpop.f32.mrb[7].mxu0  ;;  %4243 = vmatprep.subr.bf16.mxu0 %v5284_v9  ;;  %v1395_v28 = vpop.f32.mrb[7].mxu1  ;;  %4284 = vmatprep.subr.bf16.mxu1 %v5412_v11  ;;  %v688_v8 = vld [vmem:[%s6036_s3 + $0xb28] sm:$0xff]  ;;  %v473_v3 = vld [vmem:[%s6036_s3 + $0x470] sm:$0xff] }
 0x1ac   : > { %v812_v9 = vld [vmem:[%s6036_s3 + $0xf08] sm:$0xff]  ;;  %v5332_v16 = vcombine.high %v684_v7, %v688_v8 }
 0x1ad   : > { %v816_v11 = vld [vmem:[%s6036_s3 + $0xf28] sm:$0xff] }
 0x1ae   : > { %4244 = vmatpush1.bf16.msra.mxu0 %v5283_v21  ;;  %4285 = vmatpush1.bf16.msra.mxu1 %v5411_v25  ;;  %v5460_v17 = vcombine.high %v812_v9, %v816_v11  ;;  %v692_v19 = vld [vmem:[%s6036_s3 + $0xb48] sm:$0xff]  ;;  %v5331_v25 = vcombine.low %v684_v7, %v688_v8  ;;  %v349_v7 = vld [vmem:[%s6036_s3 + $0x90] sm:$0xff] }
 0x1af   : > { %4245 = vmatprep.subr.bf16.mxu0 %v5292_v26  ;;  %4286 = vmatprep.subr.bf16.mxu1 %v5420_v29  ;;  %v696_v21 = vld [vmem:[%s6036_s3 + $0xb68] sm:$0xff]  ;;  %v5459_v26 = vcombine.low %v812_v9, %v816_v11  ;;  %v353_v8 = vld [vmem:[%s6036_s3 + $0xb0] sm:$0xff] }
 0x1b0   : > { %v820_v22 = vld [vmem:[%s6036_s3 + $0xf48] sm:$0xff]  ;;  %v5340_v28 = vcombine.high %v692_v19, %v696_v21  ;;  %v477_v9 = vld [vmem:[%s6036_s3 + $0x490] sm:$0xff] }
 0x1b1   : > { %v824_v23 = vld [vmem:[%s6036_s3 + $0xf68] sm:$0xff]  ;;  %v481_v11 = vld [vmem:[%s6036_s3 + $0x4b0] sm:$0xff] }
 0x1b2   : > { %4246 = vmatpush1.bf16.msra.mxu0 %v5291_v36  ;;  %4287 = vmatpush1.bf16.msra.mxu1 %v5419_v37  ;;  %v5468_v29 = vcombine.high %v820_v22, %v824_v23  ;;  %v700_v31 = vld [vmem:[%s6036_s3 + $0xb88] sm:$0xff]  ;;  %v5339_v36 = vcombine.low %v692_v19, %v696_v21  ;;  %v5467_v37 = vcombine.low %v820_v22, %v824_v23  ;;  %v357_v19 = vld [vmem:[%s6036_s3 + $0xd0] sm:$0xff] }
 0x1b3   : > { %4247 = vmatprep.subr.bf16.mxu0 %v5300_v40  ;;  %4288 = vmatprep.subr.bf16.mxu1 %v5428_v42  ;;  %v704_v33 = vld [vmem:[%s6036_s3 + $0xba8] sm:$0xff]  ;;  %v361_v21 = vld [vmem:[%s6036_s3 + $0xf0] sm:$0xff] }
 0x1b4   : > { %v828_v34 = vld [vmem:[%s6036_s3 + $0xf88] sm:$0xff]  ;;  %v5348_v40 = vcombine.high %v700_v31, %v704_v33  ;;  %v485_v22 = vld [vmem:[%s6036_s3 + $0x4d0] sm:$0xff] }
 0x1b5   : > { %v832_v35 = vld [vmem:[%s6036_s3 + $0xfa8] sm:$0xff]  ;;  %v489_v23 = vld [vmem:[%s6036_s3 + $0x4f0] sm:$0xff] }
 0x1b6   : > { %4248 = vmatpush1.bf16.msra.mxu0 %v5299_v49  ;;  %4289 = vmatpush1.bf16.msra.mxu1 %v5427_v24  ;;  %v5476_v42 = vcombine.high %v828_v34, %v832_v35  ;;  %v708_v45 = vld [vmem:[%s6036_s3 + $0xbc8] sm:$0xff]  ;;  %v5347_v49 = vcombine.low %v700_v31, %v704_v33  ;;  %v5475_v24 = vcombine.low %v828_v34, %v832_v35  ;;  %v365_v31 = vld [vmem:[%s6036_s3 + $0x110] sm:$0xff] }
 0x1b7   : > { %4249 = vmatprep.subr.bf16.mxu0 %v5308_v32  ;;  %4290 = vmatprep.subr.bf16.mxu1 %v5436_v50  ;;  %v712_v47 = vld [vmem:[%s6036_s3 + $0xbe8] sm:$0xff]  ;;  %v369_v33 = vld [vmem:[%s6036_s3 + $0x130] sm:$0xff] }
 0x1b8   : > { %v836_v48 = vld [vmem:[%s6036_s3 + $0xfc8] sm:$0xff]  ;;  %v5356_v32 = vcombine.high %v708_v45, %v712_v47  ;;  %v493_v34 = vld [vmem:[%s6036_s3 + $0x510] sm:$0xff] }
 0x1b9   : > { %v840_v30 = vld [vmem:[%s6036_s3 + $0xfe8] sm:$0xff]  ;;  %v497_v35 = vld [vmem:[%s6036_s3 + $0x530] sm:$0xff] }
 0x1ba   : > { %4250 = vmatpush1.bf16.msra.mxu0 %v5307_v56  ;;  %4291 = vmatpush1.bf16.msra.mxu1 %v5435_v58  ;;  %v5484_v50 = vcombine.high %v836_v48, %v840_v30  ;;  %v5355_v56 = vcombine.low %v708_v45, %v712_v47  ;;  %v5483_v58 = vcombine.low %v836_v48, %v840_v30  ;;  %v373_v45 = vld [vmem:[%s6036_s3 + $0x150] sm:$0xff] }
 0x1bb   : > { %4251 = vmatprep.subr.bf16.mxu0 %v5316_v62  ;;  %4292 = vmatprep.subr.bf16.mxu1 %v5444_v63  ;;  %v4982_v62 = vcombine.high %v333_v52, %v337_v53  ;;  %v5110_v63 = vcombine.high %v461_v54, %v465_v55  ;;  %v377_v47 = vld [vmem:[%s6036_s3 + $0x170] sm:$0xff] }
 0x1bc   : > { %v501_v48 = vld [vmem:[%s6036_s3 + $0x550] sm:$0xff] }
 0x1bd   : > { %v505_v30 = vld [vmem:[%s6036_s3 + $0x570] sm:$0xff] }
 0x1be   : > { %4252 = vmatpush1.bf16.msra.mxu0 %v5315_v46  ;;  %4293 = vmatpush1.bf16.msra.mxu1 %v5443_v4  ;;  %v4981_v46 = vcombine.low %v333_v52, %v337_v53  ;;  %v5109_v4 = vcombine.low %v461_v54, %v465_v55  ;;  %v381_v52 = vld [vmem:[%s6036_s3 + $0x190] sm:$0xff] }
 0x1bf   : > { %4253 = vmatprep.subr.bf16.mxu0 %v5324_v5  ;;  %4294 = vmatprep.subr.bf16.mxu1 %v5452_v6  ;;  %v4990_v5 = vcombine.high %v341_v1, %v345_v43  ;;  %v5118_v6 = vcombine.high %v469_v2, %v473_v3  ;;  %v385_v53 = vld [vmem:[%s6036_s3 + $0x1b0] sm:$0xff] }
 0x1c0   : > { %v509_v54 = vld [vmem:[%s6036_s3 + $0x590] sm:$0xff] }
 0x1c1   : > { %v513_v55 = vld [vmem:[%s6036_s3 + $0x5b0] sm:$0xff] }
 0x1c2   : > { %4254 = vmatpush1.bf16.msra.mxu0 %v5323_v12  ;;  %4295 = vmatpush1.bf16.msra.mxu1 %v5451_v13  ;;  %v4989_v12 = vcombine.low %v341_v1, %v345_v43  ;;  %v5117_v13 = vcombine.low %v469_v2, %v473_v3  ;;  %v5158_v1 = vcombine.high %v509_v54, %v513_v55  ;;  %v389_v43 = vld [vmem:[%s6036_s3 + $0x1d0] sm:$0xff] }
 0x1c3   : > { %4255 = vmatprep.subr.bf16.mxu0 %v5332_v16  ;;  %4296 = vmatprep.subr.bf16.mxu1 %v5460_v17  ;;  %v4998_v16 = vcombine.high %v349_v7, %v353_v8  ;;  %v5126_v17 = vcombine.high %v477_v9, %v481_v11  ;;  %v393_v2 = vld [vmem:[%s6036_s3 + $0x1f0] sm:$0xff] }
 0x1c6   : > { %4256 = vmatpush1.bf16.msra.mxu0 %v5331_v25  ;;  %4297 = vmatpush1.bf16.msra.mxu1 %v5459_v26  ;;  %v4997_v25 = vcombine.low %v349_v7, %v353_v8  ;;  %v5125_v26 = vcombine.low %v477_v9, %v481_v11  ;;  %v5029_v11 = vcombine.low %v381_v52, %v385_v53 }
 0x1c7   : > { %4257 = vmatprep.subr.bf16.mxu0 %v5340_v28  ;;  %4298 = vmatprep.subr.bf16.mxu1 %v5468_v29  ;;  %v5006_v28 = vcombine.high %v357_v19, %v361_v21  ;;  %v5134_v29 = vcombine.high %v485_v22, %v489_v23 }
 0x1ca   : > { %4258 = vmatpush1.bf16.msra.mxu0 %v5339_v36  ;;  %4299 = vmatpush1.bf16.msra.mxu1 %v5467_v37  ;;  %v5005_v36 = vcombine.low %v357_v19, %v361_v21  ;;  %v5133_v37 = vcombine.low %v485_v22, %v489_v23  ;;  %v397_v22 = vld [vmem:[%s6036_s3 + $0x210] sm:$0xff] }
 0x1cb   : > { %4259 = vmatprep.subr.bf16.mxu0 %v5348_v40  ;;  %4300 = vmatprep.subr.bf16.mxu1 %v5476_v42  ;;  %v5014_v40 = vcombine.high %v365_v31, %v369_v33  ;;  %v5142_v42 = vcombine.high %v493_v34, %v497_v35  ;;  %v401_v23 = vld [vmem:[%s6036_s3 + $0x230] sm:$0xff] }
 0x1ce   : > { %4260 = vmatpush1.bf16.msra.mxu0 %v5347_v49  ;;  %4301 = vmatpush1.bf16.msra.mxu1 %v5475_v24  ;;  %v5013_v49 = vcombine.low %v365_v31, %v369_v33  ;;  %v5141_v24 = vcombine.low %v493_v34, %v497_v35  ;;  %v5046_v31 = vcombine.high %v397_v22, %v401_v23  ;;  %v405_v34 = vld [vmem:[%s6036_s3 + $0x250] sm:$0xff] }
 0x1cf   : > { %4261 = vmatprep.subr.bf16.mxu0 %v5356_v32  ;;  %4302 = vmatprep.subr.bf16.mxu1 %v5484_v50  ;;  %v5022_v32 = vcombine.high %v373_v45, %v377_v47  ;;  %v5150_v50 = vcombine.high %v501_v48, %v505_v30  ;;  %v409_v35 = vld [vmem:[%s6036_s3 + $0x270] sm:$0xff] }
 0x1d2   : > { %4262 = vmatpush1.bf16.msra.mxu0 %v5355_v56  ;;  %4303 = vmatpush1.bf16.msra.mxu1 %v5483_v58  ;;  %v5021_v56 = vcombine.low %v373_v45, %v377_v47  ;;  %v5149_v58 = vcombine.low %v501_v48, %v505_v30  ;;  %v5054_v45 = vcombine.high %v405_v34, %v409_v35  ;;  %v413_v48 = vld [vmem:[%s6036_s3 + $0x290] sm:$0xff] }
 0x1d3   : > { %4313 = vmatprep.subr.bf16.mxu0 %v4982_v62  ;;  %4354 = vmatprep.subr.bf16.mxu1 %v5110_v63  ;;  %v5030_v62 = vcombine.high %v381_v52, %v385_v53  ;;  %v417_v30 = vld [vmem:[%s6036_s3 + $0x2b0] sm:$0xff] }
 0x1d4   : > { %v5062_v52 = vcombine.high %v413_v48, %v417_v30 }
 0x1d5   : > { %4264 = vmatmul.mubr.bf16.vlgmr.msra.gmra.mrb[20].mxu0 %v6285_v57  ;;  %4305 = vmatmul.mubr.bf16.vlgmr.msra.gmra.mrb[20].mxu1 %v6291_v60 }
 0x1d6   : > { %4314 = vmatpush1.bf16.msra.mxu0 %v4981_v46  ;;  %4355 = vmatpush1.bf16.msra.mxu1 %v5109_v4 }
 0x1d7   : > { %4315 = vmatprep.subr.bf16.mxu0 %v4990_v5  ;;  %4356 = vmatprep.subr.bf16.mxu1 %v5118_v6  ;;  %v517_v5 = vld [vmem:[%s6036_s3 + $0x5d0] sm:$0xff] }
 0x1d8   : > { %4345 = vmatprep.mubr.bf16.mxu0 %v6121_v38  ;;  %4386 = vmatprep.mubr.bf16.mxu1 %v6130_v41  ;;  %v521_v6 = vld [vmem:[%s6036_s3 + $0x5f0] sm:$0xff] }
 0x1d9   : > { %v5166_v21 = vcombine.high %v517_v5, %v521_v6 }
 0x1da   : > { %4316 = vmatpush1.bf16.msra.mxu0 %v4989_v12  ;;  %4357 = vmatpush1.bf16.msra.mxu1 %v5117_v13 }
 0x1db   : > { %4317 = vmatprep.subr.bf16.mxu0 %v4998_v16  ;;  %4358 = vmatprep.subr.bf16.mxu1 %v5126_v17  ;;  %v5038_v17 = vcombine.high %v389_v43, %v393_v2 }
 0x1de   : > { %4318 = vmatpush1.bf16.msra.mxu0 %v4997_v25  ;;  %4359 = vmatpush1.bf16.msra.mxu1 %v5125_v26  ;;  %v525_v25 = vld [vmem:[%s6036_s3 + $0x610] sm:$0xff] }
 0x1df   : > { %4319 = vmatprep.subr.bf16.mxu0 %v5006_v28  ;;  %4360 = vmatprep.subr.bf16.mxu1 %v5134_v29  ;;  %v529_v26 = vld [vmem:[%s6036_s3 + $0x630] sm:$0xff]  ;;  %v5037_v28 = vcombine.low %v389_v43, %v393_v2  ;;  %v5165_v29 = vcombine.low %v517_v5, %v521_v6 }
 0x1e0   : > { %v5174_v33 = vcombine.high %v525_v25, %v529_v26  ;;  %v429_v2 = vld [vmem:[%s6036_s3 + $0x310] sm:$0xff] }
 0x1e2   : > { %4320 = vmatpush1.bf16.msra.mxu0 %v5005_v36  ;;  %4361 = vmatpush1.bf16.msra.mxu1 %v5133_v37  ;;  %v533_v36 = vld [vmem:[%s6036_s3 + $0x650] sm:$0xff] }
 0x1e3   : > { %4321 = vmatprep.subr.bf16.mxu0 %v5014_v40  ;;  %4362 = vmatprep.subr.bf16.mxu1 %v5142_v42  ;;  %v537_v37 = vld [vmem:[%s6036_s3 + $0x670] sm:$0xff]  ;;  %v5045_v40 = vcombine.low %v397_v22, %v401_v23  ;;  %v5173_v42 = vcombine.low %v525_v25, %v529_v26 }
 0x1e4   : > { %v5182_v47 = vcombine.high %v533_v36, %v537_v37  ;;  %v445_v22 = vld [vmem:[%s6036_s3 + $0x390] sm:$0xff] }
 0x1e5   : > { %v449_v23 = vld [vmem:[%s6036_s3 + $0x3b0] sm:$0xff] }
 0x1e6   : > { %4322 = vmatpush1.bf16.msra.mxu0 %v5013_v49  ;;  %4363 = vmatpush1.bf16.msra.mxu1 %v5141_v24  ;;  %v541_v49 = vld [vmem:[%s6036_s3 + $0x690] sm:$0xff] }
 0x1e7   : > { %4323 = vmatprep.subr.bf16.mxu0 %v5022_v32  ;;  %4364 = vmatprep.subr.bf16.mxu1 %v5150_v50  ;;  %v545_v24 = vld [vmem:[%s6036_s3 + $0x6b0] sm:$0xff]  ;;  %v5053_v32 = vcombine.low %v405_v34, %v409_v35  ;;  %v5181_v50 = vcombine.low %v533_v36, %v537_v37 }
 0x1e8   : > { %v4019_v63 = vpop.f32.mrb[8].mxu0  ;;  %v4060_v46 = vpop.f32.mrb[8].mxu1  ;;  %v5190_v53 = vcombine.high %v541_v49, %v545_v24  ;;  %v573_v25 = vld [vmem:[%s6036_s3 + $0x790] sm:$0xff] }
 0x1e9   : > { %v4020_v3 = vadd.f32 %v4019_v63, %v6349_v20  ;;  %v4021_v4 = vpop.f32.mrb[9].mxu0  ;;  %v4062_v8 = vpop.f32.mrb[9].mxu1  ;;  %v5157_v20 = vcombine.low %v509_v54, %v513_v55  ;;  %v421_v54 = vld [vmem:[%s6036_s3 + $0x2d0] sm:$0xff]  ;;  %v5189_v63 = vcombine.low %v541_v49, %v545_v24 }
 0x1ea   : > { %v4022_v7 = vadd.f32 %v4021_v4, %v6355_v61  ;;  %v4023_v9 = vpop.f32.mrb[10].mxu0  ;;  %4324 = vmatpush1.bf16.msra.mxu0 %v5021_v56  ;;  %v4064_v13 = vpop.f32.mrb[10].mxu1  ;;  %4365 = vmatpush1.bf16.msra.mxu1 %v5149_v58  ;;  %v425_v55 = vld [vmem:[%s6036_s3 + $0x2f0] sm:$0xff] }
 0x1eb   : > { %v6475_v12 = vadd.f32 %v4060_v46, %v4020_v3  ;;  %v4024_v16 = vpop.f32.mrb[11].mxu0  ;;  %4325 = vmatprep.subr.bf16.mxu0 %v5030_v62  ;;  %v4065_v61 = vpop.f32.mrb[11].mxu1  ;;  %4366 = vmatprep.subr.bf16.mxu1 %v5158_v1  ;;  %v549_v56 = vld [vmem:[%s6036_s3 + $0x6d0] sm:$0xff]  ;;  %v5061_v62 = vcombine.low %v413_v48, %v417_v30  ;;  %v5070_v1 = vcombine.high %v421_v54, %v425_v55 }
 0x1ec   : > { %v6477_v19 = vadd.f32 %v4062_v8, %v4022_v7  ;;  %v553_v58 = vld [vmem:[%s6036_s3 + $0x6f0] sm:$0xff]  ;;  %v5069_v5 = vcombine.low %v421_v54, %v425_v55 }
 0x1ed   : > { %v5198_v43 = vcombine.high %v549_v56, %v553_v58  ;;  %v433_v3 = vld [vmem:[%s6036_s3 + $0x330] sm:$0xff]  ;;  %v5197_v6 = vcombine.low %v549_v56, %v553_v58 }
 0x1ee   : > { %4326 = vmatpush1.bf16.msra.mxu0 %v5029_v11  ;;  %4367 = vmatpush1.bf16.msra.mxu1 %v5157_v20  ;;  %v557_v46 = vld [vmem:[%s6036_s3 + $0x710] sm:$0xff]  ;;  %v5078_v7 = vcombine.high %v429_v2, %v433_v3  ;;  %v5077_v20 = vcombine.low %v429_v2, %v433_v3 }
 0x1ef   : > { %4327 = vmatprep.subr.bf16.mxu0 %v5038_v17  ;;  %4368 = vmatprep.subr.bf16.mxu1 %v5166_v21  ;;  %v561_v4 = vld [vmem:[%s6036_s3 + $0x730] sm:$0xff] }
 0x1f0   : > { %v5206_v8 = vcombine.high %v557_v46, %v561_v4  ;;  %v437_v9 = vld [vmem:[%s6036_s3 + $0x350] sm:$0xff]  ;;  %v5205_v17 = vcombine.low %v557_v46, %v561_v4 }
 0x1f1   : > { %v441_v11 = vld [vmem:[%s6036_s3 + $0x370] sm:$0xff] }
 0x1f2   : > { %4328 = vmatpush1.bf16.msra.mxu0 %v5037_v28  ;;  %4369 = vmatpush1.bf16.msra.mxu1 %v5165_v29  ;;  %v565_v13 = vld [vmem:[%s6036_s3 + $0x750] sm:$0xff]  ;;  %v5086_v61 = vcombine.high %v437_v9, %v441_v11  ;;  %v5085_v28 = vcombine.low %v437_v9, %v441_v11 }
 0x1f3   : > { %4329 = vmatprep.subr.bf16.mxu0 %v5046_v31  ;;  %4370 = vmatprep.subr.bf16.mxu1 %v5174_v33  ;;  %v569_v16 = vld [vmem:[%s6036_s3 + $0x770] sm:$0xff]  ;;  %v5094_v31 = vcombine.high %v445_v22, %v449_v23 }
 0x1f4   : > { %v5214_v21 = vcombine.high %v565_v13, %v569_v16  ;;  %v577_v26 = vld [vmem:[%s6036_s3 + $0x7b0] sm:$0xff]  ;;  %v5213_v29 = vcombine.low %v565_v13, %v569_v16 }
 0x1f5   : > { %v5222_v33 = vcombine.high %v573_v25, %v577_v26  ;;  %v453_v34 = vld [vmem:[%s6036_s3 + $0x3d0] sm:$0xff] }
 0x1f6   : > { %4330 = vmatpush1.bf16.msra.mxu0 %v5045_v40  ;;  %4371 = vmatpush1.bf16.msra.mxu1 %v5173_v42  ;;  %v457_v35 = vld [vmem:[%s6036_s3 + $0x3f0] sm:$0xff]  ;;  %v5093_v40 = vcombine.low %v445_v22, %v449_v23  ;;  %v5221_v42 = vcombine.low %v573_v25, %v577_v26 }
 0x1f7   : > { %4331 = vmatprep.subr.bf16.mxu0 %v5054_v45  ;;  %4372 = vmatprep.subr.bf16.mxu1 %v5182_v47  ;;  %v581_v36 = vld [vmem:[%s6036_s3 + $0x7d0] sm:$0xff]  ;;  %v5102_v45 = vcombine.high %v453_v34, %v457_v35 }
 0x1f8   : > { %v585_v37 = vld [vmem:[%s6036_s3 + $0x7f0] sm:$0xff] }
 0x1f9   : > { %v5230_v47 = vcombine.high %v581_v36, %v585_v37  ;;  %v589_v48 = vld [vmem:[%s6036_s3 + $0x810] sm:$0xff] }
 0x1fa   : > { %4332 = vmatpush1.bf16.msra.mxu0 %v5053_v32  ;;  %4373 = vmatpush1.bf16.msra.mxu1 %v5181_v50  ;;  %v593_v30 = vld [vmem:[%s6036_s3 + $0x830] sm:$0xff]  ;;  %v5101_v32 = vcombine.low %v453_v34, %v457_v35  ;;  %v5229_v50 = vcombine.low %v581_v36, %v585_v37 }
 0x1fb   : > { %4333 = vmatprep.subr.bf16.mxu0 %v5062_v52  ;;  %4374 = vmatprep.subr.bf16.mxu1 %v5190_v53  ;;  %v717_v49 = vld [vmem:[%s6036_s3 + $0xc10] sm:$0xff]  ;;  %v5238_v52 = vcombine.high %v589_v48, %v593_v30 }
 0x1fc   : > { %v721_v24 = vld [vmem:[%s6036_s3 + $0xc30] sm:$0xff] }
 0x1fd   : > { %v5366_v53 = vcombine.high %v717_v49, %v721_v24  ;;  %v597_v54 = vld [vmem:[%s6036_s3 + $0x850] sm:$0xff] }
 0x1fe   : > { %4334 = vmatpush1.bf16.msra.mxu0 %v5061_v62  ;;  %4375 = vmatpush1.bf16.msra.mxu1 %v5189_v63  ;;  %v601_v55 = vld [vmem:[%s6036_s3 + $0x870] sm:$0xff]  ;;  %v5237_v62 = vcombine.low %v589_v48, %v593_v30  ;;  %v5365_v63 = vcombine.low %v717_v49, %v721_v24 }
 0x1ff   : > { %4335 = vmatprep.subr.bf16.mxu0 %v5070_v1  ;;  %4376 = vmatprep.subr.bf16.mxu1 %v5198_v43  ;;  %v725_v56 = vld [vmem:[%s6036_s3 + $0xc50] sm:$0xff]  ;;  %v5246_v1 = vcombine.high %v597_v54, %v601_v55 }
 0x200   : > { %v729_v58 = vld [vmem:[%s6036_s3 + $0xc70] sm:$0xff] }
 0x201   : > { %v5374_v43 = vcombine.high %v725_v56, %v729_v58  ;;  %v605_v2 = vld [vmem:[%s6036_s3 + $0x890] sm:$0xff] }
 0x202   : > { %4336 = vmatpush1.bf16.msra.mxu0 %v5069_v5  ;;  %4377 = vmatpush1.bf16.msra.mxu1 %v5197_v6  ;;  %v609_v3 = vld [vmem:[%s6036_s3 + $0x8b0] sm:$0xff]  ;;  %v5245_v5 = vcombine.low %v597_v54, %v601_v55  ;;  %v5373_v6 = vcombine.low %v725_v56, %v729_v58 }
 0x203   : > { %4337 = vmatprep.subr.bf16.mxu0 %v5078_v7  ;;  %4378 = vmatprep.subr.bf16.mxu1 %v5206_v8  ;;  %v733_v46 = vld [vmem:[%s6036_s3 + $0xc90] sm:$0xff]  ;;  %v5254_v7 = vcombine.high %v605_v2, %v609_v3 }
 0x204   : > { %v737_v4 = vld [vmem:[%s6036_s3 + $0xcb0] sm:$0xff] }
 0x205   : > { %v5382_v8 = vcombine.high %v733_v46, %v737_v4  ;;  %v613_v9 = vld [vmem:[%s6036_s3 + $0x8d0] sm:$0xff] }
 0x206   : > { %4338 = vmatpush1.bf16.msra.mxu0 %v5077_v20  ;;  %4379 = vmatpush1.bf16.msra.mxu1 %v5205_v17  ;;  %v617_v11 = vld [vmem:[%s6036_s3 + $0x8f0] sm:$0xff]  ;;  %v5253_v20 = vcombine.low %v605_v2, %v609_v3  ;;  %v5381_v17 = vcombine.low %v733_v46, %v737_v4 }
 0x207   : > { %4339 = vmatprep.subr.bf16.mxu0 %v5086_v61  ;;  %4380 = vmatprep.subr.bf16.mxu1 %v5214_v21  ;;  %v741_v13 = vld [vmem:[%s6036_s3 + $0xcd0] sm:$0xff]  ;;  %v5262_v61 = vcombine.high %v613_v9, %v617_v11 }
 0x208   : > { %v745_v16 = vld [vmem:[%s6036_s3 + $0xcf0] sm:$0xff] }
 0x209   : > { %v5390_v21 = vcombine.high %v741_v13, %v745_v16  ;;  %v621_v22 = vld [vmem:[%s6036_s3 + $0x910] sm:$0xff] }
 0x20a   : > { %4340 = vmatpush1.bf16.msra.mxu0 %v5085_v28  ;;  %4381 = vmatpush1.bf16.msra.mxu1 %v5213_v29  ;;  %v625_v23 = vld [vmem:[%s6036_s3 + $0x930] sm:$0xff]  ;;  %v4643_v28 = vlaneseq  ;;  %v5261_v29 = vcombine.low %v613_v9, %v617_v11 }
 0x20b   : > { %4341 = vmatprep.subr.bf16.mxu0 %v5094_v31  ;;  %4382 = vmatprep.subr.bf16.mxu1 %v5222_v33  ;;  %v749_v25 = vld [vmem:[%s6036_s3 + $0xd10] sm:$0xff]  ;;  %v5389_v31 = vcombine.low %v741_v13, %v745_v16  ;;  %v5270_v33 = vcombine.high %v621_v22, %v625_v23 }
 0x20c   : > { %v753_v26 = vld [vmem:[%s6036_s3 + $0xd30] sm:$0xff]  ;;  %v6537_v37 = vshrl.u32 %v4643_v28, 7 }
 0x20d   : > { %v5398_v34 = vcombine.high %v749_v25, %v753_v26  ;;  %v629_v35 = vld [vmem:[%s6036_s3 + $0x950] sm:$0xff] }
 0x20e   : > { %4342 = vmatpush1.bf16.msra.mxu0 %v5093_v40  ;;  %4383 = vmatpush1.bf16.msra.mxu1 %v5221_v42  ;;  %v633_v36 = vld [vmem:[%s6036_s3 + $0x970] sm:$0xff]  ;;  %v4649_v54 = vsub.s32 1, %v6537_v37 }
 0x20f   : > { %4343 = vmatprep.subr.bf16.mxu0 %v5102_v45  ;;  %4384 = vmatprep.subr.bf16.mxu1 %v5230_v47  ;;  %v757_v40 = vld [vmem:[%s6036_s3 + $0xd50] sm:$0xff]  ;;  %v5269_v45 = vcombine.low %v621_v22, %v625_v23  ;;  %v5397_v47 = vcombine.low %v749_v25, %v753_v26  ;;  %v5278_v48 = vcombine.high %v629_v35, %v633_v36 }
 0x210   : > { %v761_v42 = vld [vmem:[%s6036_s3 + $0xd70] sm:$0xff]  ;;  %v5277_v55 = vcombine.low %v629_v35, %v633_v36 }
 0x211   : > { %v5406_v30 = vcombine.high %v757_v40, %v761_v42  ;;  %v637_v49 = vld [vmem:[%s6036_s3 + $0x990] sm:$0xff]  ;;  %v5405_v56 = vcombine.low %v757_v40, %v761_v42 }
 0x212   : > { %4344 = vmatpush1.bf16.msra.mxu0 %v5101_v32  ;;  %4385 = vmatpush1.bf16.msra.mxu1 %v5229_v50  ;;  %v641_v24 = vld [vmem:[%s6036_s3 + $0x9b0] sm:$0xff]  ;;  %v4645_v32 = vsub.s32 0, %v6537_v37 }
 0x213   : > { %4395 = vmatprep.subr.bf16.mxu0 %v5238_v52  ;;  %4436 = vmatprep.subr.bf16.mxu1 %v5366_v53  ;;  %v765_v50 = vld [vmem:[%s6036_s3 + $0xd90] sm:$0xff]  ;;  %v6547_v53 = vld [vmem:[%s6043_s18] sm:$0xff]  ;;  %v5286_v58 = vcombine.high %v637_v49, %v641_v24  ;;  %v5285_v13 = vcombine.low %v637_v49, %v641_v24 }
 0x214   : > { %v769_v52 = vld [vmem:[%s6036_s3 + $0xdb0] sm:$0xff]  ;;  %v4646_v46 = vrot.slane %v6547_v53, %v4645_v32  ;;  %v4650_v9 = vrot.slane %v6547_v53, %v4649_v54 }
 0x215   : > { %4346 = vmatmul.mubr.bf16.vlgmr.msra.gmra.mrb[24].mxu0 %v6197_v39  ;;  %4387 = vmatmul.mubr.bf16.vlgmr.msra.gmra.mrb[24].mxu1 %v6205_v44  ;;  %v653_v23 = vld [vmem:[%s6036_s3 + $0xa10] sm:$0xff] }
 0x216   : > { %4396 = vmatpush1.bf16.msra.mxu0 %v5237_v62  ;;  %4437 = vmatpush1.bf16.msra.mxu1 %v5365_v63  ;;  %v5414_v63 = vcombine.high %v765_v50, %v769_v52  ;;  %v657_v25 = vld [vmem:[%s6036_s3 + $0xa30] sm:$0xff] }
 0x217   : > { %4397 = vmatprep.subr.bf16.mxu0 %v5246_v1  ;;  %4438 = vmatprep.subr.bf16.mxu1 %v5374_v43  ;;  %v645_v1 = vld [vmem:[%s6036_s3 + $0x9d0] sm:$0xff]  ;;  %v5302_v35 = vcombine.high %v653_v23, %v657_v25 }
 0x218   : > { %4427 = vmatprep.mubr.bf16.mxu0 %v6213_v27  ;;  %4468 = vmatprep.mubr.bf16.mxu1 %v6220_v51  ;;  %v649_v43 = vld [vmem:[%s6036_s3 + $0x9f0] sm:$0xff] }
 0x219   : > { %v781_v28 = vld [vmem:[%s6036_s3 + $0xe10] sm:$0xff] }
 0x21a   : > { %4398 = vmatpush1.bf16.msra.mxu0 %v5245_v5  ;;  %4439 = vmatpush1.bf16.msra.mxu1 %v5373_v6  ;;  %v773_v5 = vld [vmem:[%s6036_s3 + $0xdd0] sm:$0xff] }
 0x21b   : > { %4399 = vmatprep.subr.bf16.mxu0 %v5254_v7  ;;  %4440 = vmatprep.subr.bf16.mxu1 %v5382_v8  ;;  %v777_v6 = vld [vmem:[%s6036_s3 + $0xdf0] sm:$0xff] }
 0x21c   : > { %v661_v40 = vld [vmem:[%s6036_s3 + $0xa50] sm:$0xff] }
 0x21d   : > { %v665_v42 = vld [vmem:[%s6036_s3 + $0xa70] sm:$0xff] }
 0x21e   : > { %4400 = vmatpush1.bf16.msra.mxu0 %v5253_v20  ;;  %4441 = vmatpush1.bf16.msra.mxu1 %v5381_v17  ;;  %v5413_v17 = vcombine.low %v765_v50, %v769_v52  ;;  %v5310_v49 = vcombine.high %v661_v40, %v665_v42  ;;  %v669_v32 = vld [vmem:[%s6036_s3 + $0xa90] sm:$0xff] }
 0x21f   : > { %4401 = vmatprep.subr.bf16.mxu0 %v5262_v61  ;;  %4442 = vmatprep.subr.bf16.mxu1 %v5390_v21  ;;  %v5294_v61 = vcombine.high %v645_v1, %v649_v43  ;;  %v673_v50 = vld [vmem:[%s6036_s3 + $0xab0] sm:$0xff] }
 0x220   : > { %v797_v52 = vld [vmem:[%s6036_s3 + $0xe90] sm:$0xff] }
 0x221   : > { %v801_v54 = vld [vmem:[%s6036_s3 + $0xeb0] sm:$0xff] }
 0x222   : > { %4402 = vmatpush1.bf16.msra.mxu0 %v5261_v29  ;;  %4443 = vmatpush1.bf16.msra.mxu1 %v5389_v31  ;;  %v785_v29 = vld [vmem:[%s6036_s3 + $0xe30] sm:$0xff] }
 0x223   : > { %4403 = vmatprep.subr.bf16.mxu0 %v5270_v33  ;;  %4444 = vmatprep.subr.bf16.mxu1 %v5398_v34  ;;  %v5293_v33 = vcombine.low %v645_v1, %v649_v43  ;;  %v5421_v34 = vcombine.low %v773_v5, %v777_v6  ;;  %v5430_v36 = vcombine.high %v781_v28, %v785_v29  ;;  %v681_v1 = vld [vmem:[%s6036_s3 + $0xaf0] sm:$0xff] }
 0x224   : > { %v805_v43 = vld [vmem:[%s6036_s3 + $0xed0] sm:$0xff] }
 0x226   : > { %4404 = vmatpush1.bf16.msra.mxu0 %v5269_v45  ;;  %4445 = vmatpush1.bf16.msra.mxu1 %v5397_v47  ;;  %v789_v45 = vld [vmem:[%s6036_s3 + $0xe50] sm:$0xff] }
 0x227   : > { %4405 = vmatprep.subr.bf16.mxu0 %v5278_v48  ;;  %4446 = vmatprep.subr.bf16.mxu1 %v5406_v30  ;;  %v793_v47 = vld [vmem:[%s6036_s3 + $0xe70] sm:$0xff]  ;;  %v5301_v48 = vcombine.low %v653_v23, %v657_v25  ;;  %v5429_v30 = vcombine.low %v781_v28, %v785_v29 }
 0x228   : > { %v4101_v62 = vpop.f32.mrb[12].mxu0  ;;  %v4142_v3 = vpop.f32.mrb[12].mxu1  ;;  %v5438_v24 = vcombine.high %v789_v45, %v793_v47  ;;  %v701_v28 = vld [vmem:[%s6036_s3 + $0xb90] sm:$0xff] }
 0x229   : > { %v4102_v2 = vadd.f32 %v4101_v62, %v6475_v12  ;;  %v4103_v4 = vpop.f32.mrb[13].mxu0  ;;  %v4144_v8 = vpop.f32.mrb[13].mxu1  ;;  %v5446_v62 = vcombine.high %v797_v52, %v801_v54  ;;  %v705_v29 = vld [vmem:[%s6036_s3 + $0xbb0] sm:$0xff] }
 0x22a   : > { %v4104_v7 = vadd.f32 %v4103_v4, %v6477_v19  ;;  %v4105_v11 = vpop.f32.mrb[14].mxu0  ;;  %4406 = vmatpush1.bf16.msra.mxu0 %v5277_v55  ;;  %v4146_v12 = vpop.f32.mrb[14].mxu1  ;;  %4447 = vmatpush1.bf16.msra.mxu1 %v5405_v56  ;;  %v5422_v19 = vcombine.high %v773_v5, %v777_v6  ;;  %v5309_v55 = vcombine.low %v661_v40, %v665_v42  ;;  %v685_v6 = vld [vmem:[%s6036_s3 + $0xb10] sm:$0xff] }
 0x22b   : > { %v4143_v16 = vadd.f32 %v4142_v3, %v4102_v2  ;;  %v4106_v20 = vpop.f32.mrb[15].mxu0  ;;  %4407 = vmatprep.subr.bf16.mxu0 %v5286_v58  ;;  %v4147_v22 = vpop.f32.mrb[15].mxu1  ;;  %4448 = vmatprep.subr.bf16.mxu1 %v5414_v63  ;;  %v5437_v56 = vcombine.low %v789_v45, %v793_v47  ;;  %v5318_v58 = vcombine.high %v669_v32, %v673_v50  ;;  %v677_v63 = vld [vmem:[%s6036_s3 + $0xad0] sm:$0xff] }
 0x22c   : > { %v4145_v21 = vadd.f32 %v4144_v8, %v4104_v7  ;;  %v809_v2 = vld [vmem:[%s6036_s3 + $0xef0] sm:$0xff]  ;;  %v5317_v3 = vcombine.low %v669_v32, %v673_v50  ;;  %v5326_v4 = vcombine.high %v677_v63, %v681_v1  ;;  %v5325_v11 = vcombine.low %v677_v63, %v681_v1 }
 0x22d   : > { %v6560_v26 = vadd.f32 %v4646_v46, %v4143_v16  ;;  %v5445_v46 = vcombine.low %v797_v52, %v801_v54  ;;  %v5454_v5 = vcombine.high %v805_v43, %v809_v2  ;;  %v689_v7 = vld [vmem:[%s6036_s3 + $0xb30] sm:$0xff]  ;;  %v5350_v40 = vcombine.high %v701_v28, %v705_v29  ;;  %v334_v52 = vld [vmem:[%s6036_s3 + $0x18] sm:$0xff] }
 0x22e   : > { %v6564_v31 = vadd.f32 %v4650_v9, %v4145_v21  ;;  %4408 = vmatpush1.bf16.msra.mxu0 %v5285_v13  ;;  %4449 = vmatpush1.bf16.msra.mxu1 %v5413_v17  ;;  %v813_v8 = vld [vmem:[%s6036_s3 + $0xf10] sm:$0xff]  ;;  %v5453_v13 = vcombine.low %v805_v43, %v809_v2  ;;  %v5334_v16 = vcombine.high %v685_v6, %v689_v7  ;;  %v338_v54 = vld [vmem:[%s6036_s3 + $0x38] sm:$0xff] }
 0x22f   : > { %4409 = vmatprep.subr.bf16.mxu0 %v5294_v61  ;;  %4450 = vmatprep.subr.bf16.mxu1 %v5422_v19  ;;  %v817_v9 = vld [vmem:[%s6036_s3 + $0xf30] sm:$0xff]  ;;  %v5333_v22 = vcombine.low %v685_v6, %v689_v7  ;;  %v4984_v63 = vcombine.high %v334_v52, %v338_v54  ;;  %v342_v43 = vld [vmem:[%s6036_s3 + $0x58] sm:$0xff] }
 0x230   : > { %v5462_v12 = vcombine.high %v813_v8, %v817_v9  ;;  %v693_v20 = vld [vmem:[%s6036_s3 + $0xb50] sm:$0xff]  ;;  %v5461_v19 = vcombine.low %v813_v8, %v817_v9  ;;  %v346_v2 = vld [vmem:[%s6036_s3 + $0x78] sm:$0xff] }
 0x231   : > { %v697_v17 = vld [vmem:[%s6036_s3 + $0xb70] sm:$0xff]  ;;  %v4992_v6 = vcombine.high %v342_v43, %v346_v2  ;;  %v350_v8 = vld [vmem:[%s6036_s3 + $0x98] sm:$0xff] }
 0x232   : > { %4410 = vmatpush1.bf16.msra.mxu0 %v5293_v33  ;;  %4451 = vmatpush1.bf16.msra.mxu1 %v5421_v34  ;;  %v821_v61 = vld [vmem:[%s6036_s3 + $0xf50] sm:$0xff]  ;;  %v5342_v23 = vcombine.high %v693_v20, %v697_v17  ;;  %v354_v9 = vld [vmem:[%s6036_s3 + $0xb8] sm:$0xff] }
 0x233   : > { %4411 = vmatprep.subr.bf16.mxu0 %v5302_v35  ;;  %4452 = vmatprep.subr.bf16.mxu1 %v5430_v36  ;;  %v825_v21 = vld [vmem:[%s6036_s3 + $0xf70] sm:$0xff]  ;;  %v5341_v35 = vcombine.low %v693_v20, %v697_v17  ;;  %v5000_v20 = vcombine.high %v350_v8, %v354_v9 }
 0x234   : > { %v5470_v25 = vcombine.high %v821_v61, %v825_v21  ;;  %v829_v33 = vld [vmem:[%s6036_s3 + $0xf90] sm:$0xff]  ;;  %v5469_v36 = vcombine.low %v821_v61, %v825_v21  ;;  %v358_v61 = vld [vmem:[%s6036_s3 + $0xd8] sm:$0xff] }
 0x235   : > { %v833_v34 = vld [vmem:[%s6036_s3 + $0xfb0] sm:$0xff]  ;;  %v362_v21 = vld [vmem:[%s6036_s3 + $0xf8] sm:$0xff] }
 0x236   : > { %4412 = vmatpush1.bf16.msra.mxu0 %v5301_v48  ;;  %4453 = vmatpush1.bf16.msra.mxu1 %v5429_v30  ;;  %v5478_v42 = vcombine.high %v829_v33, %v833_v34  ;;  %v709_v45 = vld [vmem:[%s6036_s3 + $0xbd0] sm:$0xff] }
 0x237   : > { %4413 = vmatprep.subr.bf16.mxu0 %v5310_v49  ;;  %4454 = vmatprep.subr.bf16.mxu1 %v5438_v24  ;;  %v713_v47 = vld [vmem:[%s6036_s3 + $0xbf0] sm:$0xff]  ;;  %v5349_v49 = vcombine.low %v701_v28, %v705_v29  ;;  %v5477_v24 = vcombine.low %v829_v33, %v833_v34  ;;  %v5008_v28 = vcombine.high %v358_v61, %v362_v21  ;;  %v366_v33 = vld [vmem:[%s6036_s3 + $0x118] sm:$0xff] }
 0x238   : > { %v837_v48 = vld [vmem:[%s6036_s3 + $0xfd0] sm:$0xff]  ;;  %v5358_v32 = vcombine.high %v709_v45, %v713_v47  ;;  %v370_v34 = vld [vmem:[%s6036_s3 + $0x138] sm:$0xff] }
 0x239   : > { %v841_v30 = vld [vmem:[%s6036_s3 + $0xff0] sm:$0xff] }
 0x23a   : > { %4414 = vmatpush1.bf16.msra.mxu0 %v5309_v55  ;;  %4455 = vmatpush1.bf16.msra.mxu1 %v5437_v56  ;;  %v5486_v50 = vcombine.high %v837_v48, %v841_v30  ;;  %v462_v55 = vld [vmem:[%s6036_s3 + $0x418] sm:$0xff] }
 0x23b   : > { %4415 = vmatprep.subr.bf16.mxu0 %v5318_v58  ;;  %4456 = vmatprep.subr.bf16.mxu1 %v5446_v62  ;;  %v466_v56 = vld [vmem:[%s6036_s3 + $0x438] sm:$0xff]  ;;  %v5357_v58 = vcombine.low %v709_v45, %v713_v47  ;;  %v5485_v62 = vcombine.low %v837_v48, %v841_v30 }
 0x23c   : > { %v5112_v1 = vcombine.high %v462_v55, %v466_v56  ;;  %v374_v45 = vld [vmem:[%s6036_s3 + $0x158] sm:$0xff] }
 0x23d   : > { %v378_v47 = vld [vmem:[%s6036_s3 + $0x178] sm:$0xff] }
 0x23e   : > { %4416 = vmatpush1.bf16.msra.mxu0 %v5317_v3  ;;  %4457 = vmatpush1.bf16.msra.mxu1 %v5445_v46  ;;  %v470_v3 = vld [vmem:[%s6036_s3 + $0x458] sm:$0xff] }
 0x23f   : > { %4417 = vmatprep.subr.bf16.mxu0 %v5326_v4  ;;  %4458 = vmatprep.subr.bf16.mxu1 %v5454_v5  ;;  %v474_v46 = vld [vmem:[%s6036_s3 + $0x478] sm:$0xff]  ;;  %v4983_v4 = vcombine.low %v334_v52, %v338_v54  ;;  %v5111_v5 = vcombine.low %v462_v55, %v466_v56 }
 0x240   : > { %v5120_v7 = vcombine.high %v470_v3, %v474_v46  ;;  %v502_v48 = vld [vmem:[%s6036_s3 + $0x558] sm:$0xff] }
 0x241   : > { %v506_v30 = vld [vmem:[%s6036_s3 + $0x578] sm:$0xff] }
 0x242   : > { %4418 = vmatpush1.bf16.msra.mxu0 %v5325_v11  ;;  %4459 = vmatpush1.bf16.msra.mxu1 %v5453_v13  ;;  %v478_v11 = vld [vmem:[%s6036_s3 + $0x498] sm:$0xff] }
 0x243   : > { %4419 = vmatprep.subr.bf16.mxu0 %v5334_v16  ;;  %4460 = vmatprep.subr.bf16.mxu1 %v5462_v12  ;;  %v482_v13 = vld [vmem:[%s6036_s3 + $0x4b8] sm:$0xff]  ;;  %v4991_v16 = vcombine.low %v342_v43, %v346_v2  ;;  %v5119_v12 = vcombine.low %v470_v3, %v474_v46 }
 0x244   : > { %v5128_v17 = vcombine.high %v478_v11, %v482_v13  ;;  %v382_v52 = vld [vmem:[%s6036_s3 + $0x198] sm:$0xff] }
 0x245   : > { %v386_v54 = vld [vmem:[%s6036_s3 + $0x1b8] sm:$0xff] }
 0x246   : > { %4420 = vmatpush1.bf16.msra.mxu0 %v5333_v22  ;;  %4461 = vmatpush1.bf16.msra.mxu1 %v5461_v19  ;;  %v486_v22 = vld [vmem:[%s6036_s3 + $0x4d8] sm:$0xff] }
 0x247   : > { %4421 = vmatprep.subr.bf16.mxu0 %v5342_v23  ;;  %4462 = vmatprep.subr.bf16.mxu1 %v5470_v25  ;;  %v490_v19 = vld [vmem:[%s6036_s3 + $0x4f8] sm:$0xff]  ;;  %v4999_v23 = vcombine.low %v350_v8, %v354_v9  ;;  %v5127_v25 = vcombine.low %v478_v11, %v482_v13  ;;  %v5031_v13 = vcombine.low %v382_v52, %v386_v54 }
 0x248   : > { %v5136_v29 = vcombine.high %v486_v22, %v490_v19  ;;  %v510_v55 = vld [vmem:[%s6036_s3 + $0x598] sm:$0xff] }
 0x249   : > { %v514_v56 = vld [vmem:[%s6036_s3 + $0x5b8] sm:$0xff] }
 0x24a   : > { %4422 = vmatpush1.bf16.msra.mxu0 %v5341_v35  ;;  %4463 = vmatpush1.bf16.msra.mxu1 %v5469_v36  ;;  %v494_v35 = vld [vmem:[%s6036_s3 + $0x518] sm:$0xff]  ;;  %v5007_v36 = vcombine.low %v358_v61, %v362_v21  ;;  %v5160_v43 = vcombine.high %v510_v55, %v514_v56 }
 0x24b   : > { %4423 = vmatprep.subr.bf16.mxu0 %v5350_v40  ;;  %4464 = vmatprep.subr.bf16.mxu1 %v5478_v42  ;;  %v5016_v40 = vcombine.high %v366_v33, %v370_v34  ;;  %v390_v2 = vld [vmem:[%s6036_s3 + $0x1d8] sm:$0xff] }
 0x24c   : > { %v394_v3 = vld [vmem:[%s6036_s3 + $0x1f8] sm:$0xff] }
 0x24e   : > { %4424 = vmatpush1.bf16.msra.mxu0 %v5349_v49  ;;  %4465 = vmatpush1.bf16.msra.mxu1 %v5477_v24  ;;  %v5015_v49 = vcombine.low %v366_v33, %v370_v34 }
 0x24f   : > { %4425 = vmatprep.subr.bf16.mxu0 %v5358_v32  ;;  %4466 = vmatprep.subr.bf16.mxu1 %v5486_v50  ;;  %v5024_v32 = vcombine.high %v374_v45, %v378_v47  ;;  %v5152_v50 = vcombine.high %v502_v48, %v506_v30 }
 0x252   : > { %4426 = vmatpush1.bf16.msra.mxu0 %v5357_v58  ;;  %4467 = vmatpush1.bf16.msra.mxu1 %v5485_v62  ;;  %v5023_v58 = vcombine.low %v374_v45, %v378_v47  ;;  %v5151_v62 = vcombine.low %v502_v48, %v506_v30  ;;  %v414_v48 = vld [vmem:[%s6036_s3 + $0x298] sm:$0xff] }
 0x253   : > { %4477 = vmatprep.subr.bf16.mxu0 %v4984_v63  ;;  %4518 = vmatprep.subr.bf16.mxu1 %v5112_v1  ;;  %v5032_v63 = vcombine.high %v382_v52, %v386_v54  ;;  %v418_v30 = vld [vmem:[%s6036_s3 + $0x2b8] sm:$0xff] }
 0x254   : > { %v5064_v52 = vcombine.high %v414_v48, %v418_v30 }
 0x255   : > { %4428 = vmatmul.mubr.bf16.vlgmr.msra.gmra.mrb[28].mxu0 %v6285_v57  ;;  %4469 = vmatmul.mubr.bf16.vlgmr.msra.gmra.mrb[28].mxu1 %v6291_v60 }
 0x256   : > { %4478 = vmatpush1.bf16.msra.mxu0 %v4983_v4  ;;  %4519 = vmatpush1.bf16.msra.mxu1 %v5111_v5 }
 0x257   : > { %4479 = vmatprep.subr.bf16.mxu0 %v4992_v6  ;;  %4520 = vmatprep.subr.bf16.mxu1 %v5120_v7  ;;  %v518_v6 = vld [vmem:[%s6036_s3 + $0x5d8] sm:$0xff] }
 0x258   : > { %4509 = vmatprep.mubr.bf16.mxu0 %v6121_v38  ;;  %4550 = vmatprep.mubr.bf16.mxu1 %v6130_v41  ;;  %v498_v38 = vld [vmem:[%s6036_s3 + $0x538] sm:$0xff]  ;;  %v5135_v41 = vcombine.low %v486_v22, %v490_v19 }
 0x259   : > { %v5144_v42 = vcombine.high %v494_v35, %v498_v38  ;;  %v5143_v24 = vcombine.low %v494_v35, %v498_v38  ;;  %v522_v7 = vld [vmem:[%s6036_s3 + $0x5f8] sm:$0xff] }
 0x25a   : > { %4480 = vmatpush1.bf16.msra.mxu0 %v4991_v16  ;;  %4521 = vmatpush1.bf16.msra.mxu1 %v5119_v12  ;;  %v5168_v21 = vcombine.high %v518_v6, %v522_v7  ;;  %v398_v22 = vld [vmem:[%s6036_s3 + $0x218] sm:$0xff] }
 0x25b   : > { %4481 = vmatprep.subr.bf16.mxu0 %v5000_v20  ;;  %4522 = vmatprep.subr.bf16.mxu1 %v5128_v17  ;;  %v5040_v17 = vcombine.high %v390_v2, %v394_v3  ;;  %v402_v19 = vld [vmem:[%s6036_s3 + $0x238] sm:$0xff] }
 0x25c   : > { %v5048_v33 = vcombine.high %v398_v22, %v402_v19  ;;  %v406_v35 = vld [vmem:[%s6036_s3 + $0x258] sm:$0xff] }
 0x25d   : > { %v410_v38 = vld [vmem:[%s6036_s3 + $0x278] sm:$0xff] }
 0x25e   : > { %4482 = vmatpush1.bf16.msra.mxu0 %v4999_v23  ;;  %4523 = vmatpush1.bf16.msra.mxu1 %v5127_v25  ;;  %v526_v23 = vld [vmem:[%s6036_s3 + $0x618] sm:$0xff]  ;;  %v5056_v45 = vcombine.high %v406_v35, %v410_v38 }
 0x25f   : > { %4483 = vmatprep.subr.bf16.mxu0 %v5008_v28  ;;  %4524 = vmatprep.subr.bf16.mxu1 %v5136_v29  ;;  %v530_v25 = vld [vmem:[%s6036_s3 + $0x638] sm:$0xff]  ;;  %v5039_v28 = vcombine.low %v390_v2, %v394_v3  ;;  %v5167_v29 = vcombine.low %v518_v6, %v522_v7 }
 0x260   : > { %v5176_v34 = vcombine.high %v526_v23, %v530_v25  ;;  %v430_v3 = vld [vmem:[%s6036_s3 + $0x318] sm:$0xff] }
 0x262   : > { %4484 = vmatpush1.bf16.msra.mxu0 %v5007_v36  ;;  %4525 = vmatpush1.bf16.msra.mxu1 %v5135_v41  ;;  %v534_v36 = vld [vmem:[%s6036_s3 + $0x658] sm:$0xff] }
 0x263   : > { %4485 = vmatprep.subr.bf16.mxu0 %v5016_v40  ;;  %4526 = vmatprep.subr.bf16.mxu1 %v5144_v42  ;;  %v538_v41 = vld [vmem:[%s6036_s3 + $0x678] sm:$0xff]  ;;  %v5047_v40 = vcombine.low %v398_v22, %v402_v19  ;;  %v5175_v42 = vcombine.low %v526_v23, %v530_v25 }
 0x264   : > { %v5184_v47 = vcombine.high %v534_v36, %v538_v41  ;;  %v446_v22 = vld [vmem:[%s6036_s3 + $0x398] sm:$0xff] }
 0x265   : > { %v450_v19 = vld [vmem:[%s6036_s3 + $0x3b8] sm:$0xff] }
 0x266   : > { %4486 = vmatpush1.bf16.msra.mxu0 %v5015_v49  ;;  %4527 = vmatpush1.bf16.msra.mxu1 %v5143_v24  ;;  %v542_v49 = vld [vmem:[%s6036_s3 + $0x698] sm:$0xff] }
 0x267   : > { %4487 = vmatprep.subr.bf16.mxu0 %v5024_v32  ;;  %4528 = vmatprep.subr.bf16.mxu1 %v5152_v50  ;;  %v546_v24 = vld [vmem:[%s6036_s3 + $0x6b8] sm:$0xff]  ;;  %v5055_v32 = vcombine.low %v406_v35, %v410_v38  ;;  %v5183_v50 = vcombine.low %v534_v36, %v538_v41 }
 0x268   : > { %v4183_v1 = vpop.f32.mrb[16].mxu0  ;;  %v4224_v4 = vpop.f32.mrb[16].mxu1  ;;  %v5192_v54 = vcombine.high %v542_v49, %v546_v24  ;;  %v574_v23 = vld [vmem:[%s6036_s3 + $0x798] sm:$0xff] }
 0x269   : > { %v4184_v46 = vadd.f32 %v4183_v1, %v6353_v59  ;;  %v4185_v5 = vpop.f32.mrb[17].mxu0  ;;  %v4226_v9 = vpop.f32.mrb[17].mxu1  ;;  %v5159_v59 = vcombine.low %v510_v55, %v514_v56  ;;  %v422_v55 = vld [vmem:[%s6036_s3 + $0x2d8] sm:$0xff]  ;;  %v5191_v1 = vcombine.low %v542_v49, %v546_v24 }
 0x26a   : > { %v4186_v8 = vadd.f32 %v4185_v5, %v6359_v0  ;;  %v4187_v11 = vpop.f32.mrb[18].mxu0  ;;  %4488 = vmatpush1.bf16.msra.mxu0 %v5023_v58  ;;  %v4228_v12 = vpop.f32.mrb[18].mxu1  ;;  %4529 = vmatpush1.bf16.msra.mxu1 %v5151_v62  ;;  %v426_v56 = vld [vmem:[%s6036_s3 + $0x2f8] sm:$0xff] }
 0x26b   : > { %v6632_v16 = vadd.f32 %v4224_v4, %v4184_v46  ;;  %v4188_v20 = vpop.f32.mrb[19].mxu0  ;;  %4489 = vmatprep.subr.bf16.mxu0 %v5032_v63  ;;  %v4229_v0 = vpop.f32.mrb[19].mxu1  ;;  %4530 = vmatprep.subr.bf16.mxu1 %v5160_v43  ;;  %v550_v58 = vld [vmem:[%s6036_s3 + $0x6d8] sm:$0xff]  ;;  %v5063_v63 = vcombine.low %v414_v48, %v418_v30  ;;  %v5072_v43 = vcombine.high %v422_v55, %v426_v56 }
 0x26c   : > { %v6634_v61 = vadd.f32 %v4226_v9, %v4186_v8  ;;  %v554_v62 = vld [vmem:[%s6036_s3 + $0x6f8] sm:$0xff]  ;;  %v5071_v6 = vcombine.low %v422_v55, %v426_v56 }
 0x26d   : > { %v5200_v2 = vcombine.high %v550_v58, %v554_v62  ;;  %v434_v46 = vld [vmem:[%s6036_s3 + $0x338] sm:$0xff]  ;;  %v5199_v7 = vcombine.low %v550_v58, %v554_v62 }
 0x26e   : > { %4490 = vmatpush1.bf16.msra.mxu0 %v5031_v13  ;;  %4531 = vmatpush1.bf16.msra.mxu1 %v5159_v59  ;;  %v558_v4 = vld [vmem:[%s6036_s3 + $0x718] sm:$0xff]  ;;  %v5080_v8 = vcombine.high %v430_v3, %v434_v46  ;;  %v5079_v59 = vcombine.low %v430_v3, %v434_v46 }
 0x26f   : > { %4491 = vmatprep.subr.bf16.mxu0 %v5040_v17  ;;  %4532 = vmatprep.subr.bf16.mxu1 %v5168_v21  ;;  %v562_v5 = vld [vmem:[%s6036_s3 + $0x738] sm:$0xff] }
 0x270   : > { %v5208_v9 = vcombine.high %v558_v4, %v562_v5  ;;  %v438_v11 = vld [vmem:[%s6036_s3 + $0x358] sm:$0xff]  ;;  %v5207_v17 = vcombine.low %v558_v4, %v562_v5 }
 0x271   : > { %v442_v13 = vld [vmem:[%s6036_s3 + $0x378] sm:$0xff] }
 0x272   : > { %4492 = vmatpush1.bf16.msra.mxu0 %v5039_v28  ;;  %4533 = vmatpush1.bf16.msra.mxu1 %v5167_v29  ;;  %v566_v12 = vld [vmem:[%s6036_s3 + $0x758] sm:$0xff]  ;;  %v5088_v0 = vcombine.high %v438_v11, %v442_v13  ;;  %v5087_v28 = vcombine.low %v438_v11, %v442_v13 }
 0x273   : > { %4493 = vmatprep.subr.bf16.mxu0 %v5048_v33  ;;  %4534 = vmatprep.subr.bf16.mxu1 %v5176_v34  ;;  %v570_v20 = vld [vmem:[%s6036_s3 + $0x778] sm:$0xff]  ;;  %v5096_v33 = vcombine.high %v446_v22, %v450_v19 }
 0x274   : > { %v5216_v21 = vcombine.high %v566_v12, %v570_v20  ;;  %v578_v25 = vld [vmem:[%s6036_s3 + $0x7b8] sm:$0xff]  ;;  %v5215_v29 = vcombine.low %v566_v12, %v570_v20 }
 0x275   : > { %v5224_v34 = vcombine.high %v574_v23, %v578_v25  ;;  %v454_v35 = vld [vmem:[%s6036_s3 + $0x3d8] sm:$0xff] }
 0x276   : > { %4494 = vmatpush1.bf16.msra.mxu0 %v5047_v40  ;;  %4535 = vmatpush1.bf16.msra.mxu1 %v5175_v42  ;;  %v458_v38 = vld [vmem:[%s6036_s3 + $0x3f8] sm:$0xff]  ;;  %v5095_v40 = vcombine.low %v446_v22, %v450_v19  ;;  %v5223_v42 = vcombine.low %v574_v23, %v578_v25 }
 0x277   : > { %4495 = vmatprep.subr.bf16.mxu0 %v5056_v45  ;;  %4536 = vmatprep.subr.bf16.mxu1 %v5184_v47  ;;  %v582_v36 = vld [vmem:[%s6036_s3 + $0x7d8] sm:$0xff]  ;;  %v5104_v45 = vcombine.high %v454_v35, %v458_v38 }
 0x278   : > { %v586_v41 = vld [vmem:[%s6036_s3 + $0x7f8] sm:$0xff] }
 0x279   : > { %v5232_v47 = vcombine.high %v582_v36, %v586_v41  ;;  %v590_v48 = vld [vmem:[%s6036_s3 + $0x818] sm:$0xff] }
 0x27a   : > { %4496 = vmatpush1.bf16.msra.mxu0 %v5055_v32  ;;  %4537 = vmatpush1.bf16.msra.mxu1 %v5183_v50  ;;  %v594_v30 = vld [vmem:[%s6036_s3 + $0x838] sm:$0xff]  ;;  %v5103_v32 = vcombine.low %v454_v35, %v458_v38  ;;  %v5231_v50 = vcombine.low %v582_v36, %v586_v41 }
 0x27b   : > { %4497 = vmatprep.subr.bf16.mxu0 %v5064_v52  ;;  %4538 = vmatprep.subr.bf16.mxu1 %v5192_v54  ;;  %v718_v49 = vld [vmem:[%s6036_s3 + $0xc18] sm:$0xff]  ;;  %v5240_v52 = vcombine.high %v590_v48, %v594_v30 }
 0x27c   : > { %v722_v24 = vld [vmem:[%s6036_s3 + $0xc38] sm:$0xff] }
 0x27d   : > { %v5368_v54 = vcombine.high %v718_v49, %v722_v24  ;;  %v598_v55 = vld [vmem:[%s6036_s3 + $0x858] sm:$0xff] }
 0x27e   : > { %4498 = vmatpush1.bf16.msra.mxu0 %v5063_v63  ;;  %4539 = vmatpush1.bf16.msra.mxu1 %v5191_v1  ;;  %v602_v56 = vld [vmem:[%s6036_s3 + $0x878] sm:$0xff]  ;;  %v5239_v63 = vcombine.low %v590_v48, %v594_v30  ;;  %v5367_v1 = vcombine.low %v718_v49, %v722_v24  ;;  %v4657_v30 = vsub.s32 3, %v6537_v37 }
 0x27f   : > { %4499 = vmatprep.subr.bf16.mxu0 %v5072_v43  ;;  %4540 = vmatprep.subr.bf16.mxu1 %v5200_v2  ;;  %v726_v58 = vld [vmem:[%s6036_s3 + $0xc58] sm:$0xff]  ;;  %v5248_v43 = vcombine.high %v598_v55, %v602_v56 }
 0x280   : > { %v730_v62 = vld [vmem:[%s6036_s3 + $0xc78] sm:$0xff] }
 0x281   : > { %v5376_v2 = vcombine.high %v726_v58, %v730_v62  ;;  %v606_v3 = vld [vmem:[%s6036_s3 + $0x898] sm:$0xff] }
 0x282   : > { %4500 = vmatpush1.bf16.msra.mxu0 %v5071_v6  ;;  %4541 = vmatpush1.bf16.msra.mxu1 %v5199_v7  ;;  %v610_v46 = vld [vmem:[%s6036_s3 + $0x8b8] sm:$0xff]  ;;  %v5247_v6 = vcombine.low %v598_v55, %v602_v56  ;;  %v5375_v7 = vcombine.low %v726_v58, %v730_v62 }
 0x283   : > { %4501 = vmatprep.subr.bf16.mxu0 %v5080_v8  ;;  %4542 = vmatprep.subr.bf16.mxu1 %v5208_v9  ;;  %v734_v4 = vld [vmem:[%s6036_s3 + $0xc98] sm:$0xff]  ;;  %v5256_v8 = vcombine.high %v606_v3, %v610_v46 }
 0x284   : > { %v738_v5 = vld [vmem:[%s6036_s3 + $0xcb8] sm:$0xff] }
 0x285   : > { %v5384_v9 = vcombine.high %v734_v4, %v738_v5  ;;  %v614_v11 = vld [vmem:[%s6036_s3 + $0x8d8] sm:$0xff]  ;;  %v5383_v20 = vcombine.low %v734_v4, %v738_v5 }
 0x286   : > { %4502 = vmatpush1.bf16.msra.mxu0 %v5079_v59  ;;  %4543 = vmatpush1.bf16.msra.mxu1 %v5207_v17  ;;  %v618_v13 = vld [vmem:[%s6036_s3 + $0x8f8] sm:$0xff] }
 0x287   : > { %4503 = vmatprep.subr.bf16.mxu0 %v5088_v0  ;;  %4544 = vmatprep.subr.bf16.mxu1 %v5216_v21  ;;  %v746_v12 = vld [vmem:[%s6036_s3 + $0xcf8] sm:$0xff]  ;;  %v5264_v59 = vcombine.high %v614_v11, %v618_v13  ;;  %v5263_v19 = vcombine.low %v614_v11, %v618_v13 }
 0x288   : > { %v622_v0 = vld [vmem:[%s6036_s3 + $0x918] sm:$0xff] }
 0x289   : > { %v626_v21 = vld [vmem:[%s6036_s3 + $0x938] sm:$0xff] }
 0x28a   : > { %4504 = vmatpush1.bf16.msra.mxu0 %v5087_v28  ;;  %4545 = vmatpush1.bf16.msra.mxu1 %v5215_v29  ;;  %v750_v22 = vld [vmem:[%s6036_s3 + $0xd18] sm:$0xff]  ;;  %v5272_v23 = vcombine.high %v622_v0, %v626_v21  ;;  %v5271_v35 = vcombine.low %v622_v0, %v626_v21 }
 0x28b   : > { %4505 = vmatprep.subr.bf16.mxu0 %v5096_v33  ;;  %4546 = vmatprep.subr.bf16.mxu1 %v5224_v34  ;;  %v630_v28 = vld [vmem:[%s6036_s3 + $0x958] sm:$0xff] }
 0x28c   : > { %v634_v29 = vld [vmem:[%s6036_s3 + $0x978] sm:$0xff] }
 0x28d   : > { %v758_v33 = vld [vmem:[%s6036_s3 + $0xd58] sm:$0xff]  ;;  %v5280_v36 = vcombine.high %v630_v28, %v634_v29  ;;  %v5279_v49 = vcombine.low %v630_v28, %v634_v29 }
 0x28e   : > { %4506 = vmatpush1.bf16.msra.mxu0 %v5095_v40  ;;  %4547 = vmatpush1.bf16.msra.mxu1 %v5223_v42  ;;  %v762_v34 = vld [vmem:[%s6036_s3 + $0xd78] sm:$0xff] }
 0x28f   : > { %4507 = vmatprep.subr.bf16.mxu0 %v5104_v45  ;;  %4548 = vmatprep.subr.bf16.mxu1 %v5232_v47  ;;  %v5408_v41 = vcombine.high %v758_v33, %v762_v34  ;;  %v638_v40 = vld [vmem:[%s6036_s3 + $0x998] sm:$0xff]  ;;  %v4653_v45 = vsub.s32 2, %v6537_v37  ;;  %v5407_v24 = vcombine.low %v758_v33, %v762_v34 }
 0x290   : > { %v642_v42 = vld [vmem:[%s6036_s3 + $0x9b8] sm:$0xff] }
 0x291   : > { %v766_v47 = vld [vmem:[%s6036_s3 + $0xd98] sm:$0xff]  ;;  %v4654_v62 = vrot.slane %v6547_v53, %v4653_v45  ;;  %v5287_v5 = vcombine.low %v638_v40, %v642_v42 }
 0x292   : > { %4508 = vmatpush1.bf16.msra.mxu0 %v5103_v32  ;;  %4549 = vmatpush1.bf16.msra.mxu1 %v5231_v50  ;;  %v770_v48 = vld [vmem:[%s6036_s3 + $0xdb8] sm:$0xff]  ;;  %v5288_v32 = vcombine.high %v638_v40, %v642_v42 }
 0x293   : > { %4559 = vmatprep.subr.bf16.mxu0 %v5240_v52  ;;  %4600 = vmatprep.subr.bf16.mxu1 %v5368_v54  ;;  %v5416_v52 = vcombine.high %v766_v47, %v770_v48  ;;  %v646_v54 = vld [vmem:[%s6036_s3 + $0x9d8] sm:$0xff] }
 0x294   : > { %v650_v55 = vld [vmem:[%s6036_s3 + $0x9f8] sm:$0xff] }
 0x295   : > { %4510 = vmatmul.mubr.bf16.vlgmr.msra.gmra.mrb[32].mxu0 %v6197_v39  ;;  %4551 = vmatmul.mubr.bf16.vlgmr.msra.gmra.mrb[32].mxu1 %v6205_v44  ;;  %v742_v39 = vld [vmem:[%s6036_s3 + $0xcd8] sm:$0xff]  ;;  %v5255_v44 = vcombine.low %v606_v3, %v610_v46  ;;  %v4658_v46 = vrot.slane %v6547_v53, %v4657_v30 }
 0x296   : > { %4560 = vmatpush1.bf16.msra.mxu0 %v5239_v63  ;;  %4601 = vmatpush1.bf16.msra.mxu1 %v5367_v1  ;;  %v5392_v17 = vcombine.high %v742_v39, %v746_v12  ;;  %v774_v1 = vld [vmem:[%s6036_s3 + $0xdd8] sm:$0xff] }
 0x297   : > { %4561 = vmatprep.subr.bf16.mxu0 %v5248_v43  ;;  %4602 = vmatprep.subr.bf16.mxu1 %v5376_v2  ;;  %v778_v43 = vld [vmem:[%s6036_s3 + $0xdf8] sm:$0xff] }
 0x298   : > { %4591 = vmatprep.mubr.bf16.mxu0 %v6213_v27  ;;  %4632 = vmatprep.mubr.bf16.mxu1 %v6220_v51  ;;  %v754_v27 = vld [vmem:[%s6036_s3 + $0xd38] sm:$0xff]  ;;  %v5391_v51 = vcombine.low %v742_v39, %v746_v12  ;;  %v5423_v0 = vcombine.low %v774_v1, %v778_v43 }
 0x299   : > { %v5400_v25 = vcombine.high %v750_v22, %v754_v27  ;;  %v5399_v38 = vcombine.low %v750_v22, %v754_v27  ;;  %v654_v53 = vld [vmem:[%s6036_s3 + $0xa18] sm:$0xff] }
 0x29a   : > { %4562 = vmatpush1.bf16.msra.mxu0 %v5247_v6  ;;  %4603 = vmatpush1.bf16.msra.mxu1 %v5375_v7  ;;  %v658_v39 = vld [vmem:[%s6036_s3 + $0xa38] sm:$0xff] }
 0x29b   : > { %4563 = vmatprep.subr.bf16.mxu0 %v5256_v8  ;;  %4604 = vmatprep.subr.bf16.mxu1 %v5384_v9  ;;  %v5415_v8 = vcombine.low %v766_v47, %v770_v48  ;;  %v5296_v9 = vcombine.high %v646_v54, %v650_v55  ;;  %v5304_v21 = vcombine.high %v654_v53, %v658_v39  ;;  %v662_v27 = vld [vmem:[%s6036_s3 + $0xa58] sm:$0xff] }
 0x29c   : > { %v670_v34 = vld [vmem:[%s6036_s3 + $0xa98] sm:$0xff] }
 0x29d   : > { %v678_v47 = vld [vmem:[%s6036_s3 + $0xad8] sm:$0xff] }
 0x29e   : > { %4564 = vmatpush1.bf16.msra.mxu0 %v5255_v44  ;;  %4605 = vmatpush1.bf16.msra.mxu1 %v5383_v20  ;;  %v782_v44 = vld [vmem:[%s6036_s3 + $0xe18] sm:$0xff] }
 0x29f   : > { %4565 = vmatprep.subr.bf16.mxu0 %v5264_v59  ;;  %4606 = vmatprep.subr.bf16.mxu1 %v5392_v17  ;;  %v786_v20 = vld [vmem:[%s6036_s3 + $0xe38] sm:$0xff]  ;;  %v5295_v17 = vcombine.low %v646_v54, %v650_v55 }
 0x2a0   : > { %v5432_v22 = vcombine.high %v782_v44, %v786_v20  ;;  %v5431_v28 = vcombine.low %v782_v44, %v786_v20  ;;  %v682_v48 = vld [vmem:[%s6036_s3 + $0xaf8] sm:$0xff] }
 0x2a1   : > { %v806_v30 = vld [vmem:[%s6036_s3 + $0xed8] sm:$0xff] }
 0x2a2   : > { %4566 = vmatpush1.bf16.msra.mxu0 %v5263_v19  ;;  %4607 = vmatpush1.bf16.msra.mxu1 %v5391_v51  ;;  %v666_v19 = vld [vmem:[%s6036_s3 + $0xa78] sm:$0xff] }
 0x2a3   : > { %4567 = vmatprep.subr.bf16.mxu0 %v5272_v23  ;;  %4608 = vmatprep.subr.bf16.mxu1 %v5400_v25  ;;  %v790_v51 = vld [vmem:[%s6036_s3 + $0xe58] sm:$0xff]  ;;  %v5303_v25 = vcombine.low %v654_v53, %v658_v39  ;;  %v5312_v29 = vcombine.high %v662_v27, %v666_v19 }
 0x2a4   : > { %v794_v23 = vld [vmem:[%s6036_s3 + $0xe78] sm:$0xff] }
 0x2a5   : > { %v5440_v33 = vcombine.high %v790_v51, %v794_v23  ;;  %v5439_v40 = vcombine.low %v790_v51, %v794_v23  ;;  %v686_v54 = vld [vmem:[%s6036_s3 + $0xb18] sm:$0xff] }
 0x2a6   : > { %4568 = vmatpush1.bf16.msra.mxu0 %v5271_v35  ;;  %4609 = vmatpush1.bf16.msra.mxu1 %v5399_v38  ;;  %v674_v35 = vld [vmem:[%s6036_s3 + $0xab8] sm:$0xff] }
 0x2a7   : > { %4569 = vmatprep.subr.bf16.mxu0 %v5280_v36  ;;  %4610 = vmatprep.subr.bf16.mxu1 %v5408_v41  ;;  %v798_v38 = vld [vmem:[%s6036_s3 + $0xe98] sm:$0xff]  ;;  %v5311_v41 = vcombine.low %v662_v27, %v666_v19  ;;  %v5320_v42 = vcombine.high %v670_v34, %v674_v35 }
 0x2a8   : > { %v4265_v50 = vpop.f32.mrb[20].mxu0  ;;  %v4306_v58 = vpop.f32.mrb[20].mxu1  ;;  %v802_v36 = vld [vmem:[%s6036_s3 + $0xeb8] sm:$0xff] }
 0x2a9   : > { %v4266_v56 = vadd.f32 %v4265_v50, %v6632_v16  ;;  %v4267_v63 = vpop.f32.mrb[21].mxu0  ;;  %v4308_v3 = vpop.f32.mrb[21].mxu1  ;;  %v5448_v45 = vcombine.high %v798_v38, %v802_v36  ;;  %v5328_v50 = vcombine.high %v678_v47, %v682_v48  ;;  %v690_v55 = vld [vmem:[%s6036_s3 + $0xb38] sm:$0xff] }
 0x2aa   : > { %v4268_v2 = vadd.f32 %v4267_v63, %v6634_v61  ;;  %v4269_v4 = vpop.f32.mrb[22].mxu0  ;;  %4570 = vmatpush1.bf16.msra.mxu0 %v5279_v49  ;;  %v4310_v16 = vpop.f32.mrb[22].mxu1  ;;  %4611 = vmatpush1.bf16.msra.mxu1 %v5407_v24  ;;  %v5424_v61 = vcombine.high %v774_v1, %v778_v43  ;;  %v810_v49 = vld [vmem:[%s6036_s3 + $0xef8] sm:$0xff]  ;;  %v5319_v24 = vcombine.low %v670_v34, %v674_v35 }
 0x2ab   : > { %v4307_v6 = vadd.f32 %v4306_v58, %v4266_v56  ;;  %v4270_v7 = vpop.f32.mrb[23].mxu0  ;;  %4571 = vmatprep.subr.bf16.mxu0 %v5288_v32  ;;  %v4311_v13 = vpop.f32.mrb[23].mxu1  ;;  %4612 = vmatprep.subr.bf16.mxu1 %v5416_v52  ;;  %v5447_v32 = vcombine.low %v798_v38, %v802_v36  ;;  %v5456_v52 = vcombine.high %v806_v30, %v810_v49  ;;  %v814_v56 = vld [vmem:[%s6036_s3 + $0xf18] sm:$0xff] }
 0x2ac   : > { %v4309_v11 = vadd.f32 %v4308_v3, %v4268_v2  ;;  %v818_v58 = vld [vmem:[%s6036_s3 + $0xf38] sm:$0xff]  ;;  %v5455_v63 = vcombine.low %v806_v30, %v810_v49  ;;  %v5336_v1 = vcombine.high %v686_v54, %v690_v55 }
 0x2ad   : > { %v6712_v12 = vadd.f32 %v4654_v62, %v4307_v6  ;;  %v5327_v62 = vcombine.low %v678_v47, %v682_v48  ;;  %v5464_v43 = vcombine.high %v814_v56, %v818_v58  ;;  %v694_v2 = vld [vmem:[%s6036_s3 + $0xb58] sm:$0xff]  ;;  %v5463_v6 = vcombine.low %v814_v56, %v818_v58 }
 0x2ae   : > { %v6716_v59 = vadd.f32 %v4658_v46, %v4309_v11  ;;  %4572 = vmatpush1.bf16.msra.mxu0 %v5287_v5  ;;  %4613 = vmatpush1.bf16.msra.mxu1 %v5415_v8  ;;  %v698_v3 = vld [vmem:[%s6036_s3 + $0xb78] sm:$0xff]  ;;  %v5335_v5 = vcombine.low %v686_v54, %v690_v55  ;;  %v4661_v48 = vsub.s32 4, %v6537_v37 }
 0x2af   : > { %4573 = vmatprep.subr.bf16.mxu0 %v5296_v9  ;;  %4614 = vmatprep.subr.bf16.mxu1 %v5424_v61  ;;  %v822_v46 = vld [vmem:[%s6036_s3 + $0xf58] sm:$0xff]  ;;  %v5344_v16 = vcombine.high %v694_v2, %v698_v3  ;;  %v5343_v61 = vcombine.low %v694_v2, %v698_v3 }
 0x2b0   : > { %v826_v4 = vld [vmem:[%s6036_s3 + $0xf78] sm:$0xff] }
 0x2b1   : > { %v5472_v7 = vcombine.high %v822_v46, %v826_v4  ;;  %v702_v8 = vld [vmem:[%s6036_s3 + $0xb98] sm:$0xff]  ;;  %v5471_v53 = vcombine.low %v822_v46, %v826_v4 }
 0x2b2   : > { %4574 = vmatpush1.bf16.msra.mxu0 %v5295_v17  ;;  %4615 = vmatpush1.bf16.msra.mxu1 %v5423_v0  ;;  %v706_v9 = vld [vmem:[%s6036_s3 + $0xbb8] sm:$0xff] }
 0x2b3   : > { %4575 = vmatprep.subr.bf16.mxu0 %v5304_v21  ;;  %4616 = vmatprep.subr.bf16.mxu1 %v5432_v22  ;;  %v830_v11 = vld [vmem:[%s6036_s3 + $0xf98] sm:$0xff]  ;;  %v5352_v39 = vcombine.high %v702_v8, %v706_v9  ;;  %v5351_v22 = vcombine.low %v702_v8, %v706_v9 }
 0x2b4   : > { %v834_v13 = vld [vmem:[%s6036_s3 + $0xfb8] sm:$0xff] }
 0x2b5   : > { %v5480_v44 = vcombine.high %v830_v11, %v834_v13  ;;  %v710_v20 = vld [vmem:[%s6036_s3 + $0xbd8] sm:$0xff]  ;;  %v5479_v27 = vcombine.low %v830_v11, %v834_v13 }
 0x2b6   : > { %4576 = vmatpush1.bf16.msra.mxu0 %v5303_v25  ;;  %4617 = vmatpush1.bf16.msra.mxu1 %v5431_v28  ;;  %v714_v17 = vld [vmem:[%s6036_s3 + $0xbf8] sm:$0xff] }
 0x2b7   : > { %4577 = vmatprep.subr.bf16.mxu0 %v5312_v29  ;;  %4618 = vmatprep.subr.bf16.mxu1 %v5440_v33  ;;  %v838_v0 = vld [vmem:[%s6036_s3 + $0xfd8] sm:$0xff]  ;;  %v5360_v19 = vcombine.high %v710_v20, %v714_v17  ;;  %v5359_v23 = vcombine.low %v710_v20, %v714_v17 }
 0x2b8   : > { %v842_v21 = vld [vmem:[%s6036_s3 + $0xff8] sm:$0xff] }
 0x2b9   : > { %v5488_v51 = vcombine.high %v838_v0, %v842_v21  ;;  %v5487_v25 = vcombine.low %v838_v0, %v842_v21 }
 0x2ba   : > { %4578 = vmatpush1.bf16.msra.mxu0 %v5311_v41  ;;  %4619 = vmatpush1.bf16.msra.mxu1 %v5439_v40 }
 0x2bb   : > { %4579 = vmatprep.subr.bf16.mxu0 %v5320_v42  ;;  %4620 = vmatprep.subr.bf16.mxu1 %v5448_v45 }
 0x2be   : > { %4580 = vmatpush1.bf16.msra.mxu0 %v5319_v24  ;;  %4621 = vmatpush1.bf16.msra.mxu1 %v5447_v32 }
 0x2bf   : > { %4581 = vmatprep.subr.bf16.mxu0 %v5328_v50  ;;  %4622 = vmatprep.subr.bf16.mxu1 %v5456_v52 }
 0x2c2   : > { %4582 = vmatpush1.bf16.msra.mxu0 %v5327_v62  ;;  %4623 = vmatpush1.bf16.msra.mxu1 %v5455_v63 }
 0x2c3   : > { %4583 = vmatprep.subr.bf16.mxu0 %v5336_v1  ;;  %4624 = vmatprep.subr.bf16.mxu1 %v5464_v43 }
 0x2c6   : > { %4584 = vmatpush1.bf16.msra.mxu0 %v5335_v5  ;;  %4625 = vmatpush1.bf16.msra.mxu1 %v5463_v6 }
 0x2c7   : > { %4585 = vmatprep.subr.bf16.mxu0 %v5344_v16  ;;  %4626 = vmatprep.subr.bf16.mxu1 %v5472_v7 }
 0x2ca   : > { %4586 = vmatpush1.bf16.msra.mxu0 %v5343_v61  ;;  %4627 = vmatpush1.bf16.msra.mxu1 %v5471_v53  ;;  %v4669_v61 = vsub.s32 6, %v6537_v37  ;;  %v4673_v53 = vsub.s32 7, %v6537_v37 }
 0x2cb   : > { %4587 = vmatprep.subr.bf16.mxu0 %v5352_v39  ;;  %4628 = vmatprep.subr.bf16.mxu1 %v5480_v44 }
 0x2ce   : > { %4588 = vmatpush1.bf16.msra.mxu0 %v5351_v22  ;;  %4629 = vmatpush1.bf16.msra.mxu1 %v5479_v27 }
 0x2cf   : > { %4589 = vmatprep.subr.bf16.mxu0 %v5360_v19  ;;  %4630 = vmatprep.subr.bf16.mxu1 %v5488_v51 }
 0x2d2   : > { %4590 = vmatpush1.bf16.msra.mxu0 %v5359_v23  ;;  %4631 = vmatpush1.bf16.msra.mxu1 %v5487_v25 }
 0x2d5   : > { %4592 = vmatmul.mubr.bf16.vlgmr.msra.gmra.mrb[36].mxu0 %v6285_v57  ;;  %4633 = vmatmul.mubr.bf16.vlgmr.msra.gmra.mrb[36].mxu1 %v6291_v60  ;;  %v4665_v57 = vsub.s32 5, %v6537_v37  ;;  %v4695_v37 = vmax.f32 (!%p5489_p5), %v6560_v26, 0.0 }
 0x2e8   : > { %v4347_v28 = vpop.f32.mrb[24].mxu0  ;;  %v4388_v33 = vpop.f32.mrb[24].mxu1 }
 0x2e9   : > { %v4348_v29 = vadd.f32 %v4347_v28, %v6393_v10  ;;  %v4349_v34 = vpop.f32.mrb[25].mxu0  ;;  %v4390_v38 = vpop.f32.mrb[25].mxu1  ;;  %v5609_v10 = vld [vmem:[%s6043_s18] sm:$0xff] }
 0x2ea   : > { %v4350_v35 = vadd.f32 %v4349_v34, %v6399_v15  ;;  %v4351_v36 = vpop.f32.mrb[26].mxu0  ;;  %v4392_v40 = vpop.f32.mrb[26].mxu1  ;;  %v4662_v24 = vrot.slane %v5609_v10, %v4661_v48  ;;  %v4666_v15 = vrot.slane %v5609_v10, %v4665_v57  ;;  %v4670_v17 = vrot.slane %v5609_v10, %v4669_v61 }
 0x2eb   : > { %v4389_v41 = vadd.f32 %v4388_v33, %v4348_v29  ;;  %v4352_v42 = vpop.f32.mrb[27].mxu0  ;;  %v4393_v47 = vpop.f32.mrb[27].mxu1  ;;  %v4674_v22 = vrot.slane %v5609_v10, %v4673_v53  ;;  %v4696_v33 = vmax.f32 (!%p5489_p5), %v6564_v31, 0.0  ;;  %v4697_v34 = vmax.f32 (!%p5489_p5), %v6712_v12, 0.0 }
 0x2ec   : > { %v4391_v45 = vadd.f32 %v4390_v38, %v4350_v35  ;;  %v4698_v35 = vmax.f32 (!%p5489_p5), %v6716_v59, 0.0 }
 0x2ed   : > { %v5507_v42 = vpack.c.bf16 (!%p5489_p5), %v4696_v33, %v4695_v37 }
 0x2ef   : > { %4735 = vst [vmem:[#allocation2] sm:$0xff] (!%p5489_p5), %v5507_v42 }
 0x328   : > { %v4429_v60 = vpop.f32.mrb[28].mxu0  ;;  %v4470_v49 = vpop.f32.mrb[28].mxu1 }
 0x329   : > { %v4430_v30 = vadd.f32 %v4429_v60, %v4389_v41  ;;  %v4431_v32 = vpop.f32.mrb[29].mxu0  ;;  %v4472_v52 = vpop.f32.mrb[29].mxu1 }
 0x32a   : > { %v4432_v50 = vadd.f32 %v4431_v32, %v4391_v45  ;;  %v4433_v54 = vpop.f32.mrb[30].mxu0  ;;  %v4474_v56 = vpop.f32.mrb[30].mxu1  ;;  %v5508_v45 = vpack.c.bf16 (!%p5489_p5), %v4698_v35, %v4697_v34 }
 0x32b   : > { %v4471_v55 = vadd.f32 %v4470_v49, %v4430_v30  ;;  %v4434_v58 = vpop.f32.mrb[31].mxu0  ;;  %v4475_v63 = vpop.f32.mrb[31].mxu1 }
 0x32c   : > { %v4473_v62 = vadd.f32 %v4472_v52, %v4432_v50  ;;  %4736 = vst [vmem:[#allocation2 + $0x8] sm:$0xff] (!%p5489_p5), %v5508_v45 }
 0x32d   : > { %v4687_v1 = vadd.f32 %v4662_v24, %v4471_v55 }
 0x32e   : > { %v4688_v43 = vadd.f32 %v4666_v15, %v4473_v62 }
 0x32f   : > { %v4699_v38 = vmax.f32 (!%p5489_p5), %v4687_v1, 0.0 }
 0x330   : > { %v4700_v36 = vmax.f32 (!%p5489_p5), %v4688_v43, 0.0 }
 0x332   : > { %v5509_v47 = vpack.c.bf16 (!%p5489_p5), %v4700_v36, %v4699_v38 }
 0x334   : > { %4737 = vst [vmem:[#allocation2 + $0x10] sm:$0xff] (!%p5489_p5), %v5509_v47 }
 0x368   : > { %v4511_v2 = vpop.f32.mrb[32].mxu0  ;;  %v4552_v46 = vpop.f32.mrb[32].mxu1 }
 0x369   : > { %v4512_v3 = vadd.f32 %v4511_v2, %v6397_v14  ;;  %v4513_v4 = vpop.f32.mrb[33].mxu0  ;;  %v4554_v6 = vpop.f32.mrb[33].mxu1 }
 0x36a   : > { %v4514_v5 = vadd.f32 %v4513_v4, %v6403_v18  ;;  %v4515_v16 = vpop.f32.mrb[34].mxu0  ;;  %v4556_v8 = vpop.f32.mrb[34].mxu1 }
 0x36b   : > { %v4553_v7 = vadd.f32 %v4552_v46, %v4512_v3  ;;  %v4516_v9 = vpop.f32.mrb[35].mxu0  ;;  %v4557_v13 = vpop.f32.mrb[35].mxu1 }
 0x36c   : > { %v4555_v11 = vadd.f32 %v4554_v6, %v4514_v5 }
 0x3a8   : > { %v4593_v39 = vpop.f32.mrb[36].mxu0  ;;  %v4634_v20 = vpop.f32.mrb[36].mxu1  ;;  %4694 = sbr.rel (%p5489_p5) target bundleno = 949 (0x3b5), region = 56 }
 0x3a9   : > { %v4594_v44 = vadd.f32 %v4593_v39, %v4553_v7  ;;  %v4595_v14 = vpop.f32.mrb[37].mxu0  ;;  %v4636_v21 = vpop.f32.mrb[37].mxu1 }
 0x3aa   : > { %v4596_v0 = vadd.f32 %v4595_v14, %v4555_v11  ;;  %v4597_v18 = vpop.f32.mrb[38].mxu0  ;;  %v4638_v19 = vpop.f32.mrb[38].mxu1 }
 0x3ab   : > { %v4635_v27 = vadd.f32 %v4634_v20, %v4594_v44  ;;  %v4598_v51 = vpop.f32.mrb[39].mxu0  ;;  %v4639_v25 = vpop.f32.mrb[39].mxu1 }
 0x3ac   : > { %v4637_v23 = vadd.f32 %v4636_v21, %v4596_v0 }
 0x3ad   : > { %v4689_v28 = vadd.f32 %v4670_v17, %v4635_v27 }
 0x3ae   : > { %v4690_v29 = vadd.f32 %v4674_v22, %v4637_v23 }
 0x3af   : > { %v4701_v41 = vmax.f32 %v4689_v28, 0.0 }
 0x3b0   : > { %v4702_v40 = vmax.f32 %v4690_v29, 0.0 }
 0x3b2   : > { %v5510_v48 = vpack.c.bf16 %v4702_v40, %v4701_v41 }
 0x3b4   : > { %4738 = vst [vmem:[#allocation2 + $0x18] sm:$0xff] %v5510_v48 }
 0x3b5 PF: > { %p5494_p7 = scmp.lt.s32.totalorder %s5864_s22, 7 }
 0x3b6   : > { %4743 = vst [vmem:[%s6056_s26] sm:$0xff] (!%p5494_p7), %v6560_v26  ;;  %4744 = vst [vmem:[%s6056_s26 + $0x8] sm:$0xff] (!%p5494_p7), %v6564_v31 }
 0x3b7   : > { %4742 = sbr.rel (%p5494_p7) target bundleno = 958 (0x3be), region = 60  ;;  %4745 = vst [vmem:[%s6056_s26 + $0x10] sm:$0xff] (!%p5494_p7), %v6712_v12  ;;  %4746 = vst [vmem:[%s6056_s26 + $0x18] sm:$0xff] (!%p5494_p7), %v6716_v59 }
 0x3b8   : > { %4747 = vst [vmem:[%s6056_s26 + $0x20] sm:$0xff] (!%p5494_p7), %v4687_v1  ;;  %4748 = vst [vmem:[%s6056_s26 + $0x28] sm:$0xff] (!%p5494_p7), %v4688_v43 }
 0x3b9   : > { %4749 = vst [vmem:[%s6056_s26 + $0x30] sm:$0xff] (!%p5494_p7), %v4689_v28  ;;  %4750 = vst [vmem:[%s6056_s26 + $0x38] sm:$0xff] (!%p5494_p7), %v4690_v29 }
 0x3be PF: > { %s5496_s3 = sadd.s32 4294967289, %s5864_s22  ;;  %s4769_s18 = sshll.u32 %s6056_s26, 4  ;;  %s6777_s18 = int_to_ptr.vmem [resolvable:$true] %s4769_s18 }
 0x3bf   : > { %p4760_p10 = scmp.gt.s32.totalorder %s5496_s3, 0  ;;  %s4752_s20 = scalar_lea.sflag [#allocation5], %s271_s7 }
 0x3c0   : > { %s5698_s11 = scalar_lea.vmem %s6777_s18, 1024  ;;  %p6865_p8 = scmp.ne.s32.totalorder %s6842_s30, 0 }
 0x3c1   : > { %s6881_s3 = smov (!%p4760_p10, %s5496_s3), 0  ;;  %p5699_p12 = scmp.ne.s32.totalorder %s6777_s18, %s5698_s11 }
 0x3c2   : > { %s5511_s1 = sshll.u32 %s6881_s3, 10  ;;  %s5804_s22 = smov [#allocation9]  }
 0x3c3   : > { %s4767_s8 = scalar_lea.hbm %s6830_s4, %s5511_s1  ;;  %p5700_p13 = pnand %p5699_p12, %p6865_p8 }
 0x3c4   : > { %s5702_s26 = sshll.u32 %s5804_s22, 4  ;;  %s5703_s26 = int_to_ptr.vmem [resolvable:$false] %s5702_s26 }
 0x3c5   : > { %p5701_p1 = pneg %p5700_p13  ;;  %s5704_s12 = scalar_lea.vmem %s5703_s26, 2048 }
 0x3c6   : > { %p5705_p3 = scmp.lt.s32.totalorder %s6777_s18, %s5703_s26  ;;  %p5706_p4 = scmp.lt.s32.totalorder %s5704_s12, %s5698_s11 }
 0x3c8   : > { %p5707_p6 = por %p5706_p4, %p5705_p3 }
 0x3ca   : > { %p5708_p2 = pnand %p5707_p6, %p5701_p1 }
 0x3cc   : > { %5711 = shalt.err (!%p5708_p2)
}
 0x3cd   : > { %s5712_s9 = scalar_lea.hbm %s4767_s8, 1024  ;;  %s5716_s25 = scalar_lea.hbm %s6830_s4, 4096 }
 0x3ce   : > { %p5713_p9 = scmp.ne.s32.totalorder %s4767_s8, %s5712_s9  ;;  %p5717_p5 = scmp.lt.u32.totalorder %s4767_s8, %s6830_s4 }
 0x3cf   : > { %p5718_p7 = scmp.lt.u32.totalorder %s5716_s25, %s5712_s9  ;;  %p5720_p12 = scmp.lt.u32.totalorder %s5712_s9, %s4767_s8 }
 0x3d0   : > { %p5714_p11 = pnand %p5713_p9, %p6865_p8 }
 0x3d1   : > { %p5719_p10 = por %p5718_p7, %p5717_p5 }
 0x3d2   : > { %p5715_p0 = pneg %p5714_p11 }
 0x3d3   : > { %p5721_p13 = por %p5720_p12, %p5719_p10 }
 0x3d5   : > { %p5722_p1 = pnand %p5721_p13, %p5715_p0 }
 0x3d7   : > { %5725 = shalt.err (!%p5722_p1)
}
 0x3d8   : > { %5520 = dma.vmem_to_hbm [thread:$0]  (%p6865_p8), %s6777_s18, 1024, %s4767_s8, %s4752_s20  }
 0x3d9 PF: > { %p5540_p3 = scmp.ge.s32.totalorder %s5796_s21, 2  ;;  %s4781_s23 = sand.u32 1, %s5772_s15  }
 0x3da   : > { %p6866_p4 = scmp.ne.s32.totalorder %s6844_s6, 0  ;;  %s4782_s27 = scalar_lea.sflag [#allocation5], %s4781_s23 }
 0x3dc   : > { %p5534_p6 = pnand %p5540_p3, %p6866_p4 }
 0x3de   : > { %5767 = dma.done.wait (!%p5534_p6), %s4782_s27, 1024  }
 0x3df   : > { %5769 = vsyncadd (!%p5534_p6), %s4782_s27, 4294966272  ;;  %s6867_s10 = sld [smem:[#allocation15_spill]]  ;;  %s6868_s3 = sld [smem:[#allocation14_spill]] }
 0x3e0   : > { %s6869_s20 = sld [smem:[#allocation16_spill]]  ;;  %p20_p8 = scmp.ge.s32.totalorder %s5868_s24, 13  }
 0x3e1   : > { %s6870_s15 = smov %s5776_s16  ;;  %s6871_s16 = smov %s5780_s17 }
 0x3e2   : > { %s6873_s18 = smov %s5788_s19  ;;  %s6875_s21 = smov %s5868_s24 }
 0x3e3   :  { %22 = sbr.rel (!%p20_p8) target bundleno = 12 (0xc), region = 110 }
 0x3e5   : > { %s6872_s17 = smov %s6867_s10  ;;  %s6874_s19 = smov %s6868_s3 }
 0x3ea   :  { %4787 = vsyncpa [#allocation4], 1 }
 0x3eb   :  { %4789 = vsyncpa [#allocation4 + $0x1], 1 }
 0x3ec   :  { %4790 = vsyncpa [#allocation7], 1 }
 0x3ed   :  { %4792 = vsyncpa [#allocation7 + $0x1], 1 }
 0x3ee   :  { %4793 = vsyncpa [#allocation5], 1 }
 0x3ef   :  { %4795 = vsyncpa [#allocation5 + $0x1], 1 }

</bundles_post_ra>
